<compile_context>
chip_gen: v5e
topology: v5e:2x2
jax: 0.10.0
libtpu: 0.0.40
codegen_flags: <defaults>
</compile_context>

<pallas_src>
import math
import functools

import jax
import jax.numpy as jnp
from jax.experimental import pallas as pl
from jax.experimental.pallas import tpu as pltpu

IN_FEATURES = 28 * 28          # 784; kept unpadded (multiple of 8/16 -> dense bf16 weight tiling)
HIDDEN = 600                   # logical hidden width
HIDDEN_PAD = 640               # 5 * 128, lane-aligned hidden width (do not pad to 768)
NUM_CLASSES = 10
NUM_CLASSES_PAD = 128          # lane-dense padded class dim (masked via baked -1e30 bias)
SINGLE_TILE_MAX = 256          # whole batch in one tile up to this many (8-padded) rows
MULTI_TILE_MAX = 512           # per-tile row cap for large batches (even tile counts)
NEG_INF = -1e30


def _round_up(v, m):
    return ((v + m - 1) // m) * m


def _cdiv(a, b):
    return (a + b - 1) // b


def _choose_batch_tile(batch):
    """Tile rows / padded batch.

    B <= 256 (after 8-padding): single tile — splitting a small batch across the two v7x
    TensorCores would duplicate the ~2.8 MiB weight DMA for <=0.4 us of compute saved.
    Larger B: an even number of tiles, each <= 512 rows, so both v7x cores get work and
    the per-grid-step overhead is amortized over a large MXU tile.
    """
    bp8 = _round_up(max(batch, 1), 8)
    if bp8 <= SINGLE_TILE_MAX:
        return bp8, bp8
    num_tiles = 2 * _cdiv(bp8, 2 * MULTI_TILE_MAX)     # always even
    tile = _round_up(_cdiv(bp8, num_tiles), 8)         # <= 512, multiple of 8
    return tile, tile * num_tiles


def _mlp_kernel(x_ref, w1_ref, b1_ref, w2_ref, b2_ref, w3_ref, b3_ref,
                w4_ref, b4_ref, out_ref, *, log_pmin, clamping):
    # In-kernel f32 -> bf16 cast of the input tile (no separate XLA pad/cast pass).
    x = x_ref[...].astype(jnp.bfloat16)

    # Layers 1..3: bf16 matmul on the MXU with f32 accumulation; bias + ReLU in f32.
    h = jnp.dot(x, w1_ref[...], preferred_element_type=jnp.float32) + b1_ref[...]
    h = jnp.maximum(h, 0.0)
    h = jnp.dot(h.astype(jnp.bfloat16), w2_ref[...],
                preferred_element_type=jnp.float32) + b2_ref[...]
    h = jnp.maximum(h, 0.0)
    h = jnp.dot(h.astype(jnp.bfloat16), w3_ref[...],
                preferred_element_type=jnp.float32) + b3_ref[...]
    h = jnp.maximum(h, 0.0)

    # Layer 4: logits over the padded class dim.  Padded lanes carry a -1e30 bias baked
    # into b4, so no in-kernel iota/mask is needed before the softmax.  Epilogue stays f32
    # so exp() of the masked lanes underflows to exactly 0.
    logits = jnp.dot(h.astype(jnp.bfloat16), w4_ref[...],
                     preferred_element_type=jnp.float32) + b4_ref[...]

    m = jnp.max(logits, axis=1, keepdims=True)
    z = logits - m
    lse = jnp.log(jnp.sum(jnp.exp(z), axis=1, keepdims=True))
    logp = z - lse

    if clamping:
        logp = jnp.maximum(logp, jnp.float32(log_pmin))
    out_ref[...] = logp


def prob_nnet4l_forward(x, params, *, clamping=True, pmin=1e-4):
    """x: (B, 1, 28, 28) / (B, 28, 28) / (B, 784). Returns (B, NUM_CLASSES) f32 log-probs."""
    w1, b1, w2, b2, w3, b3, w4, b4 = params
    B = x.shape[0]

    x2 = x.reshape(B, IN_FEATURES)
    if x2.dtype != jnp.float32:
        x2 = x2.astype(jnp.float32)

    tile, Bp = _choose_batch_tile(B)
    if Bp != B:
        x2 = jnp.pad(x2, ((0, Bp - B), (0, 0)))        # batch rows only; feature dim unpadded

    grid = (Bp // tile,)
    kernel = functools.partial(
        _mlp_kernel,
        log_pmin=float(math.log(pmin)),
        clamping=clamping,
    )

    def resident(shape):
        # Constant index_map -> never re-DMA'd across grid steps; single-buffer it.
        return pl.BlockSpec(shape, lambda i: (0, 0), pipeline_mode=pl.Buffered(1))

    out = pl.pallas_call(
        kernel,
        out_shape=jax.ShapeDtypeStruct((Bp, NUM_CLASSES_PAD), jnp.float32),
        grid=grid,
        in_specs=[
            pl.BlockSpec((tile, IN_FEATURES), lambda i: (i, 0)),                  # x tile (f32)
            resident((IN_FEATURES, HIDDEN_PAD)),     resident((1, HIDDEN_PAD)),        # W1, b1
            resident((HIDDEN_PAD, HIDDEN_PAD)),      resident((1, HIDDEN_PAD)),        # W2, b2
            resident((HIDDEN_PAD, HIDDEN_PAD)),      resident((1, HIDDEN_PAD)),        # W3, b3
            resident((HIDDEN_PAD, NUM_CLASSES_PAD)), resident((1, NUM_CLASSES_PAD)),   # W4, b4
        ],
        out_specs=pl.BlockSpec((tile, NUM_CLASSES_PAD), lambda i: (i, 0)),
        compiler_params=pltpu.CompilerParams(
            dimension_semantics=("parallel",),
            vmem_limit_bytes=32 * 1024 * 1024,
        ),
    )(x2, w1, b1, w2, b2, w3, b3, w4, b4)

    return out[:B, :NUM_CLASSES]


def init_params(key):
    """Posterior means (mu) mirroring ProbLinear init:
       weight.mu ~ trunc_normal(0, 1/sqrt(fan_in), +-2/sqrt(fan_in)), bias.mu = 0.
       Weights are zero-padded on the output dim to lane-aligned widths and stored as bf16
       (f32 accumulation in-kernel); biases stay f32.  b4's padded class lanes carry -1e30
       so they act as the class mask."""
    ks = jax.random.split(key, 4)

    def linear_mu(k, fan_in, fan_out, pad_in, pad_out, pad_bias=0.0):
        sigma = 1.0 / math.sqrt(fan_in)
        w = jax.random.truncated_normal(k, -2.0, 2.0, (fan_in, fan_out), jnp.float32) * sigma
        w = jnp.pad(w, ((0, pad_in - fan_in), (0, pad_out - fan_out)))
        b = jnp.zeros((fan_out,), jnp.float32)
        b = jnp.pad(b, (0, pad_out - fan_out), constant_values=pad_bias)
        return w.astype(jnp.bfloat16), b.reshape(1, pad_out)

    w1, b1 = linear_mu(ks[0], IN_FEATURES, HIDDEN, IN_FEATURES, HIDDEN_PAD)
    w2, b2 = linear_mu(ks[1], HIDDEN, HIDDEN, HIDDEN_PAD, HIDDEN_PAD)
    w3, b3 = linear_mu(ks[2], HIDDEN, HIDDEN, HIDDEN_PAD, HIDDEN_PAD)
    w4, b4 = linear_mu(ks[3], HIDDEN, NUM_CLASSES, HIDDEN_PAD, NUM_CLASSES_PAD,
                       pad_bias=NEG_INF)
    return (w1, b1, w2, b2, w3, b3, w4, b4)


def _reference_forward(x, params, *, clamping=True, pmin=1e-4):
    """Pure-JAX reference using the same bf16 weights / bf16 activations / f32 accumulation.
       Note: bf16 operands deviate from torch's f32 forward at the ~1e-3 level."""
    w1, b1, w2, b2, w3, b3, w4, b4 = params
    B = x.shape[0]
    h = x.reshape(B, IN_FEATURES).astype(jnp.float32).astype(jnp.bfloat16)
    h = jnp.maximum(jnp.dot(h, w1, preferred_element_type=jnp.float32) + b1, 0.0)
    h = jnp.maximum(jnp.dot(h.astype(jnp.bfloat16), w2,
                            preferred_element_type=jnp.float32) + b2, 0.0)
    h = jnp.maximum(jnp.dot(h.astype(jnp.bfloat16), w3,
                            preferred_element_type=jnp.float32) + b3, 0.0)
    logits = (jnp.dot(h.astype(jnp.bfloat16), w4,
                      preferred_element_type=jnp.float32) + b4)[:, :NUM_CLASSES]
    logp = jax.nn.log_softmax(logits, axis=1)
    if clamping:
        logp = jnp.maximum(logp, math.log(pmin))
    return logp


if __name__ == "__main__":
    key = jax.random.PRNGKey(0)
    pkey, xkey, xkey2 = jax.random.split(key, 3)

    params = init_params(pkey)

    # Small MNIST-shaped NCHW input (single-tile path, batch padded 2 -> 8).
    x = jax.random.normal(xkey, (2, 1, 28, 28), jnp.float32)
    out = jax.block_until_ready(prob_nnet4l_forward(x, params))
    ref = _reference_forward(x, params)
    assert out.shape == (2, NUM_CLASSES), out.shape
    assert jnp.allclose(out, ref, atol=2e-3, rtol=2e-3), \
        float(jnp.max(jnp.abs(out - ref)))

    # Multi-tile path (even tile count: 2 x 152 rows; batch padding exercised).
    x2 = jax.random.normal(xkey2, (300, 1, 28, 28), jnp.float32)
    out2 = jax.block_until_ready(prob_nnet4l_forward(x2, params))
    ref2 = _reference_forward(x2, params)
    assert out2.shape == (300, NUM_CLASSES), out2.shape
    assert jnp.allclose(out2, ref2, atol=2e-3, rtol=2e-3), \
        float(jnp.max(jnp.abs(out2 - ref2)))

    print("KERNEL_OK")
</pallas_src>

<mosaic_0001>
module attributes {stable_mosaic.version = 11 : i64} {
  func.func @_mlp_kernel(%arg0: i32, %arg1: memref<8x784xf32, #tpu.memory_space<vmem>>, %arg2: memref<784x640xbf16, #tpu.memory_space<vmem>>, %arg3: memref<1x640xf32, #tpu.memory_space<vmem>>, %arg4: memref<640x640xbf16, #tpu.memory_space<vmem>>, %arg5: memref<1x640xf32, #tpu.memory_space<vmem>>, %arg6: memref<640x640xbf16, #tpu.memory_space<vmem>>, %arg7: memref<1x640xf32, #tpu.memory_space<vmem>>, %arg8: memref<640x128xbf16, #tpu.memory_space<vmem>>, %arg9: memref<1x128xf32, #tpu.memory_space<vmem>>, %arg10: memref<8x128xf32, #tpu.memory_space<vmem>>) attributes {dimension_semantics = [#tpu.dimension_semantics<parallel>], iteration_bounds = array<i64: 1>, scalar_prefetch = 0 : i64, scratch_operands = 0 : i64, tpu.core_type = #tpu.core_type<tc>, window_params = [{transform_indices = @transform_0, window_bounds = array<i64: 8, 784>}, {pipeline_mode = #tpu.pipeline_mode<synchronous>, transform_indices = @transform_1, window_bounds = array<i64: 784, 640>}, {pipeline_mode = #tpu.pipeline_mode<synchronous>, transform_indices = @transform_2, window_bounds = array<i64: 1, 640>}, {pipeline_mode = #tpu.pipeline_mode<synchronous>, transform_indices = @transform_3, window_bounds = array<i64: 640, 640>}, {pipeline_mode = #tpu.pipeline_mode<synchronous>, transform_indices = @transform_4, window_bounds = array<i64: 1, 640>}, {pipeline_mode = #tpu.pipeline_mode<synchronous>, transform_indices = @transform_5, window_bounds = array<i64: 640, 640>}, {pipeline_mode = #tpu.pipeline_mode<synchronous>, transform_indices = @transform_6, window_bounds = array<i64: 1, 640>}, {pipeline_mode = #tpu.pipeline_mode<synchronous>, transform_indices = @transform_7, window_bounds = array<i64: 640, 128>}, {pipeline_mode = #tpu.pipeline_mode<synchronous>, transform_indices = @transform_8, window_bounds = array<i64: 1, 128>}, {transform_indices = @transform_9, window_bounds = array<i64: 8, 128>}]} {
    %c0 = arith.constant 0 : index
    %c0_0 = arith.constant 0 : index
    %0 = vector.load %arg1[%c0, %c0_0] : memref<8x784xf32, #tpu.memory_space<vmem>>, vector<8x784xf32>
    %1 = arith.truncf %0 : vector<8x784xf32> to vector<8x784xbf16>
    %c0_1 = arith.constant 0 : index
    %c0_2 = arith.constant 0 : index
    %2 = vector.load %arg2[%c0_1, %c0_2] : memref<784x640xbf16, #tpu.memory_space<vmem>>, vector<784x640xbf16>
    %cst = arith.constant dense<0.000000e+00> : vector<8x640xf32>
    %3 = tpu.matmul %1, %2, %cst {dimension_numbers = #tpu.dot_dimension_numbers<[1], [0], [0], [1], [0, 0, 1, 1], [], []>} : vector<8x784xbf16>, vector<784x640xbf16>, vector<8x640xf32> -> vector<8x640xf32>
    %c0_3 = arith.constant 0 : index
    %c0_4 = arith.constant 0 : index
    %4 = vector.load %arg3[%c0_3, %c0_4] : memref<1x640xf32, #tpu.memory_space<vmem>>, vector<1x640xf32>
    %5 = vector.broadcast %4 : vector<1x640xf32> to vector<8x640xf32>
    %6 = arith.addf %3, %5 : vector<8x640xf32>
    %cst_5 = arith.constant 0.000000e+00 : f32
    %7 = vector.broadcast %cst_5 : f32 to vector<8x640xf32>
    %8 = arith.maximumf %6, %7 : vector<8x640xf32>
    %9 = arith.truncf %8 : vector<8x640xf32> to vector<8x640xbf16>
    %c0_6 = arith.constant 0 : index
    %c0_7 = arith.constant 0 : index
    %10 = vector.load %arg4[%c0_6, %c0_7] : memref<640x640xbf16, #tpu.memory_space<vmem>>, vector<640x640xbf16>
    %cst_8 = arith.constant dense<0.000000e+00> : vector<8x640xf32>
    %11 = tpu.matmul %9, %10, %cst_8 {dimension_numbers = #tpu.dot_dimension_numbers<[1], [0], [0], [1], [0, 0, 1, 1], [], []>} : vector<8x640xbf16>, vector<640x640xbf16>, vector<8x640xf32> -> vector<8x640xf32>
    %c0_9 = arith.constant 0 : index
    %c0_10 = arith.constant 0 : index
    %12 = vector.load %arg5[%c0_9, %c0_10] : memref<1x640xf32, #tpu.memory_space<vmem>>, vector<1x640xf32>
    %13 = vector.broadcast %12 : vector<1x640xf32> to vector<8x640xf32>
    %14 = arith.addf %11, %13 : vector<8x640xf32>
    %cst_11 = arith.constant 0.000000e+00 : f32
    %15 = vector.broadcast %cst_11 : f32 to vector<8x640xf32>
    %16 = arith.maximumf %14, %15 : vector<8x640xf32>
    %17 = arith.truncf %16 : vector<8x640xf32> to vector<8x640xbf16>
    %c0_12 = arith.constant 0 : index
    %c0_13 = arith.constant 0 : index
    %18 = vector.load %arg6[%c0_12, %c0_13] : memref<640x640xbf16, #tpu.memory_space<vmem>>, vector<640x640xbf16>
    %cst_14 = arith.constant dense<0.000000e+00> : vector<8x640xf32>
    %19 = tpu.matmul %17, %18, %cst_14 {dimension_numbers = #tpu.dot_dimension_numbers<[1], [0], [0], [1], [0, 0, 1, 1], [], []>} : vector<8x640xbf16>, vector<640x640xbf16>, vector<8x640xf32> -> vector<8x640xf32>
    %c0_15 = arith.constant 0 : index
    %c0_16 = arith.constant 0 : index
    %20 = vector.load %arg7[%c0_15, %c0_16] : memref<1x640xf32, #tpu.memory_space<vmem>>, vector<1x640xf32>
    %21 = vector.broadcast %20 : vector<1x640xf32> to vector<8x640xf32>
    %22 = arith.addf %19, %21 : vector<8x640xf32>
    %cst_17 = arith.constant 0.000000e+00 : f32
    %23 = vector.broadcast %cst_17 : f32 to vector<8x640xf32>
    %24 = arith.maximumf %22, %23 : vector<8x640xf32>
    %25 = arith.truncf %24 : vector<8x640xf32> to vector<8x640xbf16>
    %c0_18 = arith.constant 0 : index
    %c0_19 = arith.constant 0 : index
    %26 = vector.load %arg8[%c0_18, %c0_19] : memref<640x128xbf16, #tpu.memory_space<vmem>>, vector<640x128xbf16>
    %cst_20 = arith.constant dense<0.000000e+00> : vector<8x128xf32>
    %27 = tpu.matmul %25, %26, %cst_20 {dimension_numbers = #tpu.dot_dimension_numbers<[1], [0], [0], [1], [0, 0, 1, 1], [], []>} : vector<8x640xbf16>, vector<640x128xbf16>, vector<8x128xf32> -> vector<8x128xf32>
    %c0_21 = arith.constant 0 : index
    %c0_22 = arith.constant 0 : index
    %28 = vector.load %arg9[%c0_21, %c0_22] : memref<1x128xf32, #tpu.memory_space<vmem>>, vector<1x128xf32>
    %29 = vector.broadcast %28 : vector<1x128xf32> to vector<8x128xf32>
    %30 = arith.addf %27, %29 : vector<8x128xf32>
    %cst_23 = arith.constant dense<0xFF800000> : vector<8xf32>
    %31 = vector.multi_reduction <maximumf>, %30, %cst_23 [1] : vector<8x128xf32> to vector<8xf32>
    %32 = vector.shape_cast %31 : vector<8xf32> to vector<8x1xf32>
    %33 = vector.broadcast %32 : vector<8x1xf32> to vector<8x128xf32>
    %34 = arith.subf %30, %33 : vector<8x128xf32>
    %35 = math.exp %34 : vector<8x128xf32>
    %cst_24 = arith.constant dense<0.000000e+00> : vector<8xf32>
    %36 = vector.multi_reduction <add>, %35, %cst_24 [1] : vector<8x128xf32> to vector<8xf32>
    %37 = vector.shape_cast %36 : vector<8xf32> to vector<8x1xf32>
    %38 = math.log %37 : vector<8x1xf32>
    %39 = vector.broadcast %38 : vector<8x1xf32> to vector<8x128xf32>
    %40 = arith.subf %34, %39 : vector<8x128xf32>
    %cst_25 = arith.constant -9.21034049 : f32
    %41 = vector.broadcast %cst_25 : f32 to vector<8x128xf32>
    %42 = arith.maximumf %40, %41 : vector<8x128xf32>
    %c0_26 = arith.constant 0 : index
    %c0_27 = arith.constant 0 : index
    %43 = vector.load %arg10[%c0_26, %c0_27] : memref<8x128xf32, #tpu.memory_space<vmem>>, vector<8x128xf32>
    tpu.vector_store %arg10[%c0_26, %c0_27], %42 {strides = array<i32>} : memref<8x128xf32, #tpu.memory_space<vmem>>, vector<8x128xf32>,
    return
  }
  func.func @transform_0(%arg0: i32) -> (i32, i32) {
    %c0_i32 = arith.constant 0 : i32
    %c0_i32_0 = arith.constant 0 : i32
    return %arg0, %c0_i32 : i32, i32
  }
  func.func @transform_1(%arg0: i32) -> (i32, i32) {
    %c0_i32 = arith.constant 0 : i32
    %c0_i32_0 = arith.constant 0 : i32
    %c0_i32_1 = arith.constant 0 : i32
    return %c0_i32, %c0_i32_0 : i32, i32
  }
  func.func @transform_2(%arg0: i32) -> (i32, i32) {
    %c0_i32 = arith.constant 0 : i32
    %c0_i32_0 = arith.constant 0 : i32
    %c0_i32_1 = arith.constant 0 : i32
    return %c0_i32, %c0_i32_0 : i32, i32
  }
  func.func @transform_3(%arg0: i32) -> (i32, i32) {
    %c0_i32 = arith.constant 0 : i32
    %c0_i32_0 = arith.constant 0 : i32
    %c0_i32_1 = arith.constant 0 : i32
    return %c0_i32, %c0_i32_0 : i32, i32
  }
  func.func @transform_4(%arg0: i32) -> (i32, i32) {
    %c0_i32 = arith.constant 0 : i32
    %c0_i32_0 = arith.constant 0 : i32
    %c0_i32_1 = arith.constant 0 : i32
    return %c0_i32, %c0_i32_0 : i32, i32
  }
  func.func @transform_5(%arg0: i32) -> (i32, i32) {
    %c0_i32 = arith.constant 0 : i32
    %c0_i32_0 = arith.constant 0 : i32
    %c0_i32_1 = arith.constant 0 : i32
    return %c0_i32, %c0_i32_0 : i32, i32
  }
  func.func @transform_6(%arg0: i32) -> (i32, i32) {
    %c0_i32 = arith.constant 0 : i32
    %c0_i32_0 = arith.constant 0 : i32
    %c0_i32_1 = arith.constant 0 : i32
    return %c0_i32, %c0_i32_0 : i32, i32
  }
  func.func @transform_7(%arg0: i32) -> (i32, i32) {
    %c0_i32 = arith.constant 0 : i32
    %c0_i32_0 = arith.constant 0 : i32
    %c0_i32_1 = arith.constant 0 : i32
    return %c0_i32, %c0_i32_0 : i32, i32
  }
  func.func @transform_8(%arg0: i32) -> (i32, i32) {
    %c0_i32 = arith.constant 0 : i32
    %c0_i32_0 = arith.constant 0 : i32
    %c0_i32_1 = arith.constant 0 : i32
    return %c0_i32, %c0_i32_0 : i32, i32
  }
  func.func @transform_9(%arg0: i32) -> (i32, i32) {
    %c0_i32 = arith.constant 0 : i32
    %c0_i32_0 = arith.constant 0 : i32
    return %arg0, %c0_i32 : i32, i32
  }
}

</mosaic_0001>

<bundles_post_ra>
// kernel: tpu_custom_call.1
= control target key start
LH: loop header
LB: loop body
LE: loop exit
PB: predicated region body
PF: predicated region fallthrough
CT: control target
= control target key end

     0   :  { %14 = vsyncpa [#allocation3], 0  ;;  %s9875_s0 = inlined_call_operand.hbm [shape: f32[8,784], index: 0, kind: input, shape index: {}]   ;;  %s9876_s1 = inlined_call_operand.hbm [shape: bf16[784,640], index: 1, kind: input, shape index: {}]   ;;  %s9877_s2 = inlined_call_operand.hbm [shape: f32[1,640], index: 2, kind: input, shape index: {}]   ;;  %s9878_s3 = inlined_call_operand.hbm [shape: bf16[640,640], index: 3, kind: input, shape index: {}]   ;;  %s9879_s4 = inlined_call_operand.hbm [shape: f32[1,640], index: 4, kind: input, shape index: {}]   ;;  %s9880_s5 = inlined_call_operand.hbm [shape: bf16[640,640], index: 5, kind: input, shape index: {}]   ;;  %s9881_s6 = inlined_call_operand.vmem [shape: f32[1,640], index: 6, kind: input, shape index: {}]   ;;  %s9882_s7 = inlined_call_operand.hbm [shape: bf16[640,128], index: 7, kind: input, shape index: {}]   ;;  %s9883_s8 = inlined_call_operand.vmem [shape: f32[1,128], index: 8, kind: input, shape index: {}]   ;;  %s9884_s9 = inlined_call_operand.hbm [shape: f32[8,128], index: 9, kind: output, shape index: {}]  }
   0x1   :  { %15 = vsyncpa [#allocation6], 0 }
   0x2   :  { %16 = vsyncpa [#allocation9], 0 }
   0x3   :  { %17 = vsyncpa [#allocation12], 0  ;;  %s34_s11 = sshll.u32 %s9876_s1, 4  ;;  %s35_s11 = int_to_ptr.hbm [resolvable:$true] %s34_s11 }
   0x4   :  { %18 = vsyncpa [#allocation4], 0  ;;  %s9526_s12 = smov [#allocation5]   ;;  %s58_s16 = sshll.u32 %s9878_s3, 4  ;;  %s59_s16 = int_to_ptr.hbm [resolvable:$true] %s58_s16 }
   0x5   :  { %s36_s13 = sshll.u32 %s9526_s12, 4  ;;  %s9527_s17 = smov 320   ;;  %s37_s13 = int_to_ptr.vmem [resolvable:$true] %s36_s13 }
   0x6   :  { %s9528_s18 = smov 20   ;;  %s9529_s19 = smov [#allocation8]  }
   0x7   :  { %42 = dma.hbm_to_vmem [thread:$0]  %s35_s11, 31360, %s37_s13, [#allocation6], %s9527_s17, %s9527_s17, %s9528_s18  }
   0x8   :  { %s60_s20 = sshll.u32 %s9529_s19, 4  ;;  %s82_s23 = sshll.u32 %s9880_s5, 4  ;;  %s61_s20 = int_to_ptr.vmem [resolvable:$true] %s60_s20  ;;  %s83_s23 = int_to_ptr.hbm [resolvable:$true] %s82_s23 }
   0x9   :  { %66 = dma.hbm_to_vmem [thread:$0]  %s59_s16, 25600, %s61_s20, [#allocation9], %s9527_s17, %s9527_s17, %s9528_s18  }
   0xa   :  { %s24_s25 = sshll.u32 %s9875_s0, 4  ;;  %s9530_s26 = smov [#allocation11]   ;;  %s25_s25 = int_to_ptr.hbm [resolvable:$true] %s24_s25 }
   0xb   :  { %s84_s27 = sshll.u32 %s9530_s26, 4  ;;  %s9531_s3 = smov [#allocation2]   ;;  %s85_s27 = int_to_ptr.vmem [resolvable:$true] %s84_s27 }
   0xc   :  { %90 = dma.hbm_to_vmem [thread:$0]  %s83_s23, 25600, %s85_s27, [#allocation12], %s9527_s17, %s9527_s17, %s9528_s18  }
   0xd   :  { %s26_s28 = sshll.u32 %s9531_s3, 4  ;;  %s48_s10 = sshll.u32 %s9877_s2, 4  ;;  %s27_s28 = int_to_ptr.vmem [resolvable:$true] %s26_s28  ;;  %s49_s10 = int_to_ptr.hbm [resolvable:$true] %s48_s10 }
   0xe   :  { %29 = dma.hbm_to_vmem [thread:$0]  %s25_s25, 896, %s27_s28, [#allocation3]  }
   0xf   :  { %s72_s12 = sshll.u32 %s9879_s4, 4  ;;  %s9532_s13 = smov [#allocation7]   ;;  %s73_s12 = int_to_ptr.hbm [resolvable:$true] %s72_s12 }
  0x10   :  { %s50_s0 = sshll.u32 %s9532_s13, 4  ;;  %s9533_s14 = smov [#allocation10]   ;;  %s51_s0 = int_to_ptr.vmem [resolvable:$true] %s50_s0 }
  0x11   :  { %53 = dma.hbm_to_vmem [thread:$0]  %s49_s10, 80, %s51_s0, [#allocation6]  }
  0x12   :  { %s74_s15 = sshll.u32 %s9533_s14, 4  ;;  %s97_s18 = sshll.u32 %s9882_s7, 4  ;;  %s75_s15 = int_to_ptr.vmem [resolvable:$true] %s74_s15  ;;  %s98_s18 = int_to_ptr.hbm [resolvable:$true] %s97_s18 }
  0x13   :  { %77 = dma.hbm_to_vmem [thread:$0]  %s73_s12, 80, %s75_s15, [#allocation9]  }
  0x14   :  { %s9534_s2 = smov [#allocation13]   ;;  %s9535_s20 = smov 64  }
  0x15   :  { %s99_s19 = sshll.u32 %s9534_s2, 4  ;;  %s9536_s21 = smov 4   ;;  %s100_s19 = int_to_ptr.vmem [resolvable:$true] %s99_s19 }
  0x16   :  { %105 = dma.hbm_to_vmem [thread:$0]  %s98_s18, 5120, %s100_s19, [#allocation12], %s9535_s20, %s9535_s20, %s9536_s21  }
  0x17   :  { %9516 = dma.done.wait [#allocation3], 896  }
  0x18   :  { %9517 = vsyncadd [#allocation3], 4294966400 }
  0x19   :  { %9518 = dma.done.wait [#allocation6], 31440  }
  0x1a   :  { %9519 = vsyncadd [#allocation6], 4294935856 }
  0x1b   :  { %9520 = dma.done.wait [#allocation9], 25680  }
  0x1c   :  { %9521 = vsyncadd [#allocation9], 4294941616 }
  0x1d   :  { %9522 = dma.done.wait [#allocation12], 30720  }
  0x1e   :  { %9523 = vsyncadd [#allocation12], 4294936576  ;;  %v6017_v0 = vld [vmem:[#allocation5 + $0x118] sm:$0xf]  ;;  %v8657_v1 = vld [vmem:[#allocation5 + $0x128] sm:$0xf0] }
  0x1f   :  { %v6177_v2 = vld [vmem:[#allocation5 + $0x258] sm:$0xf]  ;;  %v6018_v3 = vor.u32 %v8657_v1, %v6017_v0  ;;  %v8697_v4 = vld [vmem:[#allocation5 + $0x268] sm:$0xf0]  ;;  %v5997_v11 = vld [vmem:[#allocation5 + $0xf0] sm:$0xf] }
  0x20   :  { %v6337_v5 = vld [vmem:[#allocation5 + $0x398] sm:$0xf]  ;;  %v8737_v6 = vld [vmem:[#allocation5 + $0x3a8] sm:$0xf0]  ;;  %v6178_v7 = vor.u32 %v8697_v4, %v6177_v2  ;;  %v8652_v13 = vld [vmem:[#allocation5 + $0x100] sm:$0xf0] }
  0x21   :  { %v6338_v8 = vor.u32 %v8737_v6, %v6337_v5  ;;  %v6497_v9 = vld [vmem:[#allocation5 + $0x4d8] sm:$0xf]  ;;  %v8777_v10 = vld [vmem:[#allocation5 + $0x4e8] sm:$0xf0]  ;;  %1735 = vmatpush.bf16.msra.mxu0 %v6018_v3  ;;  %v6157_v14 = vld [vmem:[#allocation5 + $0x230] sm:$0xf]  ;;  %v5998_v16 = vor.u32 %v8652_v13, %v5997_v11 }
  0x22   :  { %v6498_v12 = vor.u32 %v8777_v10, %v6497_v9  ;;  %v8692_v15 = vld [vmem:[#allocation5 + $0x240] sm:$0xf0]  ;;  %1748 = vmatpush.bf16.msra.mxu1 %v6178_v7  ;;  %v6317_v18 = vld [vmem:[#allocation5 + $0x370] sm:$0xf]  ;;  %v5977_v23 = vld [vmem:[#allocation5 + $0xc8] sm:$0xf] }
  0x23   :  { %1761 = vmatpush.bf16.msra.mxu2 %v6338_v8  ;;  %v6158_v17 = vor.u32 %v8692_v15, %v6157_v14  ;;  %v8732_v19 = vld [vmem:[#allocation5 + $0x380] sm:$0xf0]  ;;  %v6477_v20 = vld [vmem:[#allocation5 + $0x4b0] sm:$0xf]  ;;  %v8647_v24 = vld [vmem:[#allocation5 + $0xd8] sm:$0xf0] }
  0x24   :  { %1774 = vmatpush.bf16.msra.mxu3 %v6498_v12  ;;  %v6318_v21 = vor.u32 %v8732_v19, %v6317_v18  ;;  %v8772_v22 = vld [vmem:[#allocation5 + $0x4c0] sm:$0xf0]  ;;  %v6137_v26 = vld [vmem:[#allocation5 + $0x208] sm:$0xf]  ;;  %v8687_v27 = vld [vmem:[#allocation5 + $0x218] sm:$0xf0]  ;;  %v5978_v29 = vor.u32 %v8647_v24, %v5977_v23 }
  0x25   :  { %v6478_v25 = vor.u32 %v8772_v22, %v6477_v20  ;;  %v6297_v28 = vld [vmem:[#allocation5 + $0x348] sm:$0xf]  ;;  %1736 = vmatpush.bf16.msra.mxu0 %v5998_v16  ;;  %v8727_v30 = vld [vmem:[#allocation5 + $0x358] sm:$0xf0]  ;;  %v6138_v33 = vor.u32 %v8687_v27, %v6137_v26  ;;  %v5957_v35 = vld [vmem:[#allocation5 + $0xa0] sm:$0xf] }
  0x26   :  { %v6457_v31 = vld [vmem:[#allocation5 + $0x488] sm:$0xf]  ;;  %v8767_v32 = vld [vmem:[#allocation5 + $0x498] sm:$0xf0]  ;;  %1749 = vmatpush.bf16.msra.mxu1 %v6158_v17  ;;  %v6298_v34 = vor.u32 %v8727_v30, %v6297_v28  ;;  %v8642_v36 = vld [vmem:[#allocation5 + $0xb0] sm:$0xf0] }
  0x27   :  { %1762 = vmatpush.bf16.msra.mxu2 %v6318_v21  ;;  %v6117_v37 = vld [vmem:[#allocation5 + $0x1e0] sm:$0xf]  ;;  %v6458_v38 = vor.u32 %v8767_v32, %v6457_v31  ;;  %v8682_v39 = vld [vmem:[#allocation5 + $0x1f0] sm:$0xf0]  ;;  %v5958_v44 = vor.u32 %v8642_v36, %v5957_v35  ;;  %v5937_v47 = vld [vmem:[#allocation5 + $0x78] sm:$0xf] }
  0x28   :  { %1775 = vmatpush.bf16.msra.mxu3 %v6478_v25  ;;  %v6277_v40 = vld [vmem:[#allocation5 + $0x320] sm:$0xf]  ;;  %v8722_v41 = vld [vmem:[#allocation5 + $0x330] sm:$0xf0]  ;;  %v6118_v45 = vor.u32 %v8682_v39, %v6117_v37  ;;  %v8637_v48 = vld [vmem:[#allocation5 + $0x88] sm:$0xf0] }
  0x29   :  { %v6437_v42 = vld [vmem:[#allocation5 + $0x460] sm:$0xf]  ;;  %v8762_v43 = vld [vmem:[#allocation5 + $0x470] sm:$0xf0]  ;;  %1737 = vmatpush.bf16.msra.mxu0 %v5978_v29  ;;  %v6278_v46 = vor.u32 %v8722_v41, %v6277_v40  ;;  %v6097_v49 = vld [vmem:[#allocation5 + $0x1b8] sm:$0xf]  ;;  %v5938_v56 = vor.u32 %v8637_v48, %v5937_v47 }
  0x2a   :  { %1750 = vmatpush.bf16.msra.mxu1 %v6138_v33  ;;  %v6438_v50 = vor.u32 %v8762_v43, %v6437_v42  ;;  %v8677_v51 = vld [vmem:[#allocation5 + $0x1c8] sm:$0xf0]  ;;  %v6257_v52 = vld [vmem:[#allocation5 + $0x2f8] sm:$0xf]  ;;  %v5917_v59 = vld [vmem:[#allocation5 + $0x50] sm:$0xf] }
  0x2b   :  { %1763 = vmatpush.bf16.msra.mxu2 %v6298_v34  ;;  %v8717_v53 = vld [vmem:[#allocation5 + $0x308] sm:$0xf0]  ;;  %v6417_v54 = vld [vmem:[#allocation5 + $0x438] sm:$0xf]  ;;  %v6098_v57 = vor.u32 %v8677_v51, %v6097_v49  ;;  %v8632_v60 = vld [vmem:[#allocation5 + $0x60] sm:$0xf0] }
  0x2c   :  { %1776 = vmatpush.bf16.msra.mxu3 %v6458_v38  ;;  %v8757_v55 = vld [vmem:[#allocation5 + $0x448] sm:$0xf0]  ;;  %v6258_v58 = vor.u32 %v8717_v53, %v6257_v52  ;;  %v6077_v61 = vld [vmem:[#allocation5 + $0x190] sm:$0xf]  ;;  %v8672_v63 = vld [vmem:[#allocation5 + $0x1a0] sm:$0xf0]  ;;  %v5918_v4 = vor.u32 %v8632_v60, %v5917_v59 }
  0x2d   :  { %1738 = vmatpush.bf16.msra.mxu0 %v5958_v44  ;;  %v6418_v62 = vor.u32 %v8757_v55, %v6417_v54  ;;  %v6237_v0 = vld [vmem:[#allocation5 + $0x2d0] sm:$0xf]  ;;  %v8712_v1 = vld [vmem:[#allocation5 + $0x2e0] sm:$0xf0]  ;;  %v6078_v5 = vor.u32 %v8672_v63, %v6077_v61  ;;  %v5897_v7 = vld [vmem:[#allocation5 + $0x28] sm:$0xf] }
  0x2e   :  { %1751 = vmatpush.bf16.msra.mxu1 %v6118_v45  ;;  %v6397_v2 = vld [vmem:[#allocation5 + $0x410] sm:$0xf]  ;;  %v8752_v3 = vld [vmem:[#allocation5 + $0x420] sm:$0xf0]  ;;  %v6238_v6 = vor.u32 %v8712_v1, %v6237_v0  ;;  %v8627_v8 = vld [vmem:[#allocation5 + $0x38] sm:$0xf0] }
  0x2f   :  { %1764 = vmatpush.bf16.msra.mxu2 %v6278_v46  ;;  %v6057_v9 = vld [vmem:[#allocation5 + $0x168] sm:$0xf]  ;;  %v6398_v10 = vor.u32 %v8752_v3, %v6397_v2  ;;  %v8667_v11 = vld [vmem:[#allocation5 + $0x178] sm:$0xf0]  ;;  %v5898_v16 = vor.u32 %v8627_v8, %v5897_v7  ;;  %v5877_v17 = vld [vmem:[#allocation5] sm:$0xf] }
  0x30   :  { %1777 = vmatpush.bf16.msra.mxu3 %v6438_v50  ;;  %v6217_v12 = vld [vmem:[#allocation5 + $0x2a8] sm:$0xf]  ;;  %v8707_v13 = vld [vmem:[#allocation5 + $0x2b8] sm:$0xf0]  ;;  %v8622_v18 = vld [vmem:[#allocation5 + $0x10] sm:$0xf0]  ;;  %v6058_v19 = vor.u32 %v8667_v11, %v6057_v9 }
  0x31   :  { %1739 = vmatpush.bf16.msra.mxu0 %v5938_v56  ;;  %v6377_v14 = vld [vmem:[#allocation5 + $0x3e8] sm:$0xf]  ;;  %v8747_v15 = vld [vmem:[#allocation5 + $0x3f8] sm:$0xf0]  ;;  %v6218_v20 = vor.u32 %v8707_v13, %v6217_v12  ;;  %v6037_v21 = vld [vmem:[#allocation5 + $0x140] sm:$0xf]  ;;  %v5878_v31 = vor.u32 %v8622_v18, %v5877_v17 }
  0x32   :  { %1752 = vmatpush.bf16.msra.mxu1 %v6098_v57  ;;  %v8662_v22 = vld [vmem:[#allocation5 + $0x150] sm:$0xf0]  ;;  %v6197_v23 = vld [vmem:[#allocation5 + $0x280] sm:$0xf]  ;;  %v6378_v24 = vor.u32 %v8747_v15, %v6377_v14  ;;  %v6657_v28 = vld [vmem:[#allocation5 + $0x618] sm:$0xf] }
  0x33   :  { %1765 = vmatpush.bf16.msra.mxu2 %v6258_v58  ;;  %v8702_v25 = vld [vmem:[#allocation5 + $0x290] sm:$0xf0]  ;;  %v6357_v26 = vld [vmem:[#allocation5 + $0x3c0] sm:$0xf]  ;;  %v8817_v29 = vld [vmem:[#allocation5 + $0x628] sm:$0xf0]  ;;  %v6038_v35 = vor.u32 %v8662_v22, %v6037_v21 }
  0x34   :  { %1778 = vmatpush.bf16.msra.mxu3 %v6418_v62  ;;  %v8742_v27 = vld [vmem:[#allocation5 + $0x3d0] sm:$0xf0]  ;;  %v6817_v30 = vld [vmem:[#allocation5 + $0x758] sm:$0xf]  ;;  %v8857_v32 = vld [vmem:[#allocation5 + $0x768] sm:$0xf0]  ;;  %v6198_v36 = vor.u32 %v8702_v25, %v6197_v23  ;;  %v6658_v40 = vor.u32 %v8817_v29, %v6657_v28 }
  0x35   :  { %1740 = vmatpush.bf16.msra.mxu0 %v5918_v4  ;;  %v8655_v33 = vld [vmem:[#allocation5 + $0x11c] sm:$0xf]  ;;  %v6019_v34 = vld [vmem:[#allocation5 + $0x12c] sm:$0xf0]  ;;  %v6837_v37 = vld [vmem:[#allocation5 + $0x780] sm:$0xf]  ;;  %v6358_v39 = vor.u32 %v8742_v27, %v6357_v26  ;;  %v6818_v44 = vor.u32 %v8857_v32, %v6817_v30 }
  0x36   :  { %1753 = vmatpush.bf16.msra.mxu1 %v6078_v5  ;;  %v8862_v38 = vld [vmem:[#allocation5 + $0x790] sm:$0xf0]  ;;  %v139_v41 = vld [vmem:[#allocation2 + $0x10] sm:$0xff]  ;;  %v6179_v43 = vld [vmem:[#allocation5 + $0x26c] sm:$0xf0]  ;;  %v6022_v45 = vor.u32 %v8655_v33, %v6019_v34  ;;  %vm1731_vm0 = vcmask 130048  }
  0x37   :  { %1766 = vmatpush.bf16.msra.mxu2 %v6238_v6  ;;  %v8695_v42 = vld [vmem:[#allocation5 + $0x25c] sm:$0xf]  ;;  %v6637_v46 = vld [vmem:[#allocation5 + $0x5f0] sm:$0xf]  ;;  %v8812_v47 = vld [vmem:[#allocation5 + $0x600] sm:$0xf0]  ;;  %v6838_v49 = vor.u32 %v8862_v38, %v6837_v37  ;;  %v9609_v53 = vpack.c.bf16 %v139_v41, %v139_v41 }
  0x38   :  { %1779 = vmatpush.bf16.msra.mxu3 %v6398_v10  ;;  %v6797_v48 = vld [vmem:[#allocation5 + $0x730] sm:$0xf]  ;;  %v8852_v50 = vld [vmem:[#allocation5 + $0x740] sm:$0xf0]  ;;  %v8650_v51 = vld [vmem:[#allocation5 + $0xf4] sm:$0xf]  ;;  %v6182_v56 = vor.u32 %v8695_v42, %v6179_v43  ;;  %v6638_v57 = vor.u32 %v8812_v47, %v6637_v46 }
  0x39   :  { %1741 = vmatpush.bf16.msra.mxu0 %v5898_v16  ;;  %v5999_v52 = vld [vmem:[#allocation5 + $0x104] sm:$0xf0]  ;;  %v8690_v54 = vld [vmem:[#allocation5 + $0x234] sm:$0xf]  ;;  %v8807_v60 = vld [vmem:[#allocation5 + $0x5d8] sm:$0xf0]  ;;  %v6798_v62 = vor.u32 %v8852_v50, %v6797_v48 }
  0x3a   :  { %1754 = vmatpush.bf16.msra.mxu1 %v6058_v19  ;;  %v137_v55 = vld [vmem:[#allocation2] sm:$0xff]  ;;  %v6002_v63 = vor.u32 %v8650_v51, %v5999_v52  ;;  %v8847_v1 = vld [vmem:[#allocation5 + $0x718] sm:$0xf0]  ;;  %v5979_v3 = vld [vmem:[#allocation5 + $0xdc] sm:$0xf0]  ;;  %s5862_s25 = sshll.u32 %s9884_s9, 4  ;;  %s5863_s25 = int_to_ptr.hbm [resolvable:$true] %s5862_s25 }
  0x3b   :  { %1767 = vmatpush.bf16.msra.mxu2 %v6218_v20  ;;  %v6159_v58 = vld [vmem:[#allocation5 + $0x244] sm:$0xf0]  ;;  %v9611_v61 = vpack.c.bf16 %v137_v55, %v137_v55  ;;  %v8645_v2 = vld [vmem:[#allocation5 + $0xcc] sm:$0xf]  ;;  %v138_v4 = vld [vmem:[#allocation2 + $0x8] sm:$0xff] }
  0x3c   :  { %1780 = vmatpush.bf16.msra.mxu3 %v6378_v24  ;;  %v6617_v59 = vld [vmem:[#allocation5 + $0x5c8] sm:$0xf]  ;;  %v140_v5 = vld [vmem:[#allocation2 + $0x18] sm:$0xff]  ;;  %v9615_v6 = vpack.c.bf16 %v138_v4, %v138_v4  ;;  %v6162_v8 = vor.u32 %v8690_v54, %v6159_v58  ;;  %v8685_v10 = vld [vmem:[#allocation5 + $0x20c] sm:$0xf]  ;;  %v5982_v13 = vor.u32 %v8645_v2, %v5979_v3 }
  0x3d   :  { %1742 = vmatpush.bf16.msra.mxu0 %v5878_v31  ;;  %v6777_v0 = vld [vmem:[#allocation5 + $0x708] sm:$0xf]  ;;  %v9617_v7 = vpack.c.bf16 %v140_v5, %v140_v5  ;;  %v6618_v9 = vor.u32 %v8807_v60, %v6617_v59  ;;  %v6139_v11 = vld [vmem:[#allocation5 + $0x21c] sm:$0xf0]  ;;  %v8802_v15 = vld [vmem:[#allocation5 + $0x5b0] sm:$0xf0] }
  0x3e   :  { %1755 = vmatpush.bf16.msra.mxu1 %v6038_v35  ;;  %v6778_v12 = vor.u32 %v8847_v1, %v6777_v0  ;;  %v6597_v14 = vld [vmem:[#allocation5 + $0x5a0] sm:$0xf]  ;;  %v8842_v17 = vld [vmem:[#allocation5 + $0x6f0] sm:$0xf0]  ;;  %v8640_v18 = vld [vmem:[#allocation5 + $0xa4] sm:$0xf]  ;;  %v6142_v20 = vor.u32 %v8685_v10, %v6139_v11 }
  0x3f   :  { %1768 = vmatpush.bf16.msra.mxu2 %v6198_v36  ;;  %v6757_v16 = vld [vmem:[#allocation5 + $0x6e0] sm:$0xf]  ;;  %v5959_v19 = vld [vmem:[#allocation5 + $0xb4] sm:$0xf0]  ;;  %v6598_v21 = vor.u32 %v8802_v15, %v6597_v14  ;;  %v8680_v22 = vld [vmem:[#allocation5 + $0x1e4] sm:$0xf] }
  0x40   :  { %1781 = vmatpush.bf16.msra.mxu3 %v6358_v39  ;;  %1743 = vmatmul.bf16.vlgmr.msra.gmra.mxu0 %v9611_v61  ;;  %v6119_v23 = vld [vmem:[#allocation5 + $0x1f4] sm:$0xf0]  ;;  %v6758_v24 = vor.u32 %v8842_v17, %v6757_v16  ;;  %v5962_v25 = vor.u32 %v8640_v18, %v5959_v19  ;;  %v8797_v27 = vld [vmem:[#allocation5 + $0x588] sm:$0xf0]  ;;  %v8635_v30 = vld [vmem:[#allocation5 + $0x7c] sm:$0xf] }
  0x41   :  { %1787 = vmatpush.bf16.msrb.mxu0 %v6658_v40  ;;  %1756 = vmatmul.bf16.vlgmr.msra.gmra.mxu1 %v9615_v6  ;;  %v6577_v26 = vld [vmem:[#allocation5 + $0x578] sm:$0xf]  ;;  %v8837_v29 = vld [vmem:[#allocation5 + $0x6c8] sm:$0xf0]  ;;  %v5939_v31 = vld [vmem:[#allocation5 + $0x8c] sm:$0xf0]  ;;  %v6122_v32 = vor.u32 %v8680_v22, %v6119_v23 }
  0x42   :  { %1800 = vmatpush.bf16.msrb.mxu1 %v6818_v44  ;;  %1769 = vmatmul.bf16.vlgmr.msra.gmra.mxu2 %v9609_v53  ;;  %v6737_v28 = vld [vmem:[#allocation5 + $0x6b8] sm:$0xf]  ;;  %v6578_v33 = vor.u32 %v8797_v27, %v6577_v26  ;;  %v8675_v34 = vld [vmem:[#allocation5 + $0x1bc] sm:$0xf]  ;;  %v6099_v35 = vld [vmem:[#allocation5 + $0x1cc] sm:$0xf0]  ;;  %v5942_v38 = vor.u32 %v8635_v30, %v5939_v31 }
  0x43   :  { %1820 = vmatpush.bf16.msrb.mxu2 %v6838_v49  ;;  %1782 = vmatmul.bf16.vlgmr.msra.gmra.mxu3 %v9617_v7  ;;  %v143_v36 = vld [vmem:[#allocation2 + $0x30] sm:$0xff]  ;;  %v6738_v37 = vor.u32 %v8837_v29, %v6737_v28  ;;  %v6557_v39 = vld [vmem:[#allocation5 + $0x550] sm:$0xf]  ;;  %v8792_v40 = vld [vmem:[#allocation5 + $0x560] sm:$0xf0]  ;;  %v6102_v46 = vor.u32 %v8675_v34, %v6099_v35 }
  0x44   :  { %1826 = vmatpush.bf16.msrb.mxu3 %v6022_v45  ;;  %v6717_v41 = vld [vmem:[#allocation5 + $0x690] sm:$0xf]  ;;  %v8832_v42 = vld [vmem:[#allocation5 + $0x6a0] sm:$0xf0]  ;;  %v8630_v43 = vld [vmem:[#allocation5 + $0x54] sm:$0xf]  ;;  %v9621_v45 = vpack.c.bf16 %v143_v36, %v143_v36  ;;  %v6558_v47 = vor.u32 %v8792_v40, %v6557_v39 }
  0x45   :  { %1788 = vmatpush.bf16.msrb.mxu0 %v6638_v57  ;;  %v5919_v44 = vld [vmem:[#allocation5 + $0x64] sm:$0xf0]  ;;  %v8670_v48 = vld [vmem:[#allocation5 + $0x194] sm:$0xf]  ;;  %v6718_v50 = vor.u32 %v8832_v42, %v6717_v41  ;;  %v8787_v54 = vld [vmem:[#allocation5 + $0x538] sm:$0xf0] }
  0x46   :  { %1801 = vmatpush.bf16.msrb.mxu1 %v6798_v62  ;;  %v6079_v49 = vld [vmem:[#allocation5 + $0x1a4] sm:$0xf0]  ;;  %v5922_v51 = vor.u32 %v8630_v43, %v5919_v44  ;;  %v8625_v57 = vld [vmem:[#allocation5 + $0x2c] sm:$0xf]  ;;  %v5899_v58 = vld [vmem:[#allocation5 + $0x3c] sm:$0xf0] }
  0x47   :  { %1839 = vmatpush.bf16.msra.mxu2 %v6182_v56  ;;  %v6537_v52 = vld [vmem:[#allocation5 + $0x528] sm:$0xf]  ;;  %v8827_v56 = vld [vmem:[#allocation5 + $0x678] sm:$0xf0]  ;;  %v6082_v59 = vor.u32 %v8670_v48, %v6079_v49  ;;  %v8665_v62 = vld [vmem:[#allocation5 + $0x16c] sm:$0xf]  ;;  %v5902_v2 = vor.u32 %v8625_v57, %v5899_v58 }
  0x48   :  { %1827 = vmatpush.bf16.msrb.mxu3 %v6002_v63  ;;  %v6697_v55 = vld [vmem:[#allocation5 + $0x668] sm:$0xf]  ;;  %v6538_v60 = vor.u32 %v8787_v54, %v6537_v52  ;;  %v6059_v63 = vld [vmem:[#allocation5 + $0x17c] sm:$0xf0]  ;;  %v8782_v3 = vld [vmem:[#allocation5 + $0x510] sm:$0xf0] }
  0x49   :  { %1789 = vmatpush.bf16.msrb.mxu0 %v6618_v9  ;;  %v6517_v0 = vld [vmem:[#allocation5 + $0x500] sm:$0xf]  ;;  %v6698_v1 = vor.u32 %v8827_v56, %v6697_v55  ;;  %v8822_v5 = vld [vmem:[#allocation5 + $0x650] sm:$0xf0]  ;;  %v5879_v9 = vld [vmem:[#allocation5 + $0x14] sm:$0xf0]  ;;  %v6062_v14 = vor.u32 %v8665_v62, %v6059_v63 }
  0x4a   :  { %1802 = vmatpush.bf16.msrb.mxu1 %v6778_v12  ;;  %v6677_v4 = vld [vmem:[#allocation5 + $0x640] sm:$0xf]  ;;  %v8735_v10 = vld [vmem:[#allocation5 + $0x39c] sm:$0xf]  ;;  %v6339_v11 = vld [vmem:[#allocation5 + $0x3ac] sm:$0xf0]  ;;  %v6518_v15 = vor.u32 %v8782_v3, %v6517_v0 }
  0x4b   :  { %1840 = vmatpush.bf16.msra.mxu2 %v6162_v8  ;;  %v8620_v8 = vld [vmem:[#allocation5 + $0x4] sm:$0xf]  ;;  %v8775_v12 = vld [vmem:[#allocation5 + $0x4dc] sm:$0xf]  ;;  %v6659_v17 = vld [vmem:[#allocation5 + $0x62c] sm:$0xf0]  ;;  %v6678_v19 = vor.u32 %v8822_v5, %v6677_v4 }
  0x4c   :  { %1828 = vmatpush.bf16.msrb.mxu3 %v5982_v13  ;;  %v6499_v13 = vld [vmem:[#allocation5 + $0x4ec] sm:$0xf0]  ;;  %v8815_v16 = vld [vmem:[#allocation5 + $0x61c] sm:$0xf]  ;;  %v141_v18 = vld [vmem:[#allocation2 + $0x20] sm:$0xff] }
  0x4d   :  { %1790 = vmatpush.bf16.msrb.mxu0 %v6598_v21  ;;  %v8660_v21 = vld [vmem:[#allocation5 + $0x144] sm:$0xf]  ;;  %v6039_v22 = vld [vmem:[#allocation5 + $0x154] sm:$0xf0]  ;;  %v142_v23 = vld [vmem:[#allocation2 + $0x28] sm:$0xff]  ;;  %v6662_v29 = vor.u32 %v8815_v16, %v6659_v17  ;;  %v9625_v30 = vpack.c.bf16 %v141_v18, %v141_v18 }
  0x4e   :  { %1803 = vmatpush.bf16.msrb.mxu1 %v6758_v24  ;;  %v6342_v24 = vor.u32 %v8735_v10, %v6339_v11  ;;  %v8855_v26 = vld [vmem:[#allocation5 + $0x75c] sm:$0xf]  ;;  %v6819_v27 = vld [vmem:[#allocation5 + $0x76c] sm:$0xf0]  ;;  %v8730_v28 = vld [vmem:[#allocation5 + $0x374] sm:$0xf]  ;;  %v6042_v34 = vor.u32 %v8660_v21, %v6039_v22  ;;  %v9627_v35 = vpack.c.bf16 %v142_v23, %v142_v23 }
  0x4f   :  { %1841 = vmatpush.bf16.msra.mxu2 %v6142_v20  ;;  %v5882_v20 = vor.u32 %v8620_v8, %v5879_v9  ;;  %v6319_v31 = vld [vmem:[#allocation5 + $0x384] sm:$0xf0]  ;;  %v8810_v36 = vld [vmem:[#allocation5 + $0x5f4] sm:$0xf]  ;;  %v8725_v43 = vld [vmem:[#allocation5 + $0x34c] sm:$0xf] }
  0x50   :  { %1829 = vmatpush.bf16.msrb.mxu3 %v5962_v25  ;;  %v6502_v25 = vor.u32 %v8775_v12, %v6499_v13  ;;  %v6322_v39 = vor.u32 %v8730_v28, %v6319_v31  ;;  %v8850_v41 = vld [vmem:[#allocation5 + $0x734] sm:$0xf]  ;;  %v6799_v42 = vld [vmem:[#allocation5 + $0x744] sm:$0xf0]  ;;  %v6459_v48 = vld [vmem:[#allocation5 + $0x49c] sm:$0xf0] }
  0x51   :  { %1791 = vmatpush.bf16.msrb.mxu0 %v6578_v33  ;;  %v6479_v33 = vld [vmem:[#allocation5 + $0x4c4] sm:$0xf0]  ;;  %v8805_v49 = vld [vmem:[#allocation5 + $0x5cc] sm:$0xf]  ;;  %v6779_v56 = vld [vmem:[#allocation5 + $0x71c] sm:$0xf0] }
  0x52   :  { %1804 = vmatpush.bf16.msrb.mxu1 %v6738_v37  ;;  %6855 = vmatmul.msk.bf16.vlgmr.msrb.gmra.mxu2 %vm1731_vm0, %v9621_v45  ;;  %v6639_v37 = vld [vmem:[#allocation5 + $0x604] sm:$0xf0]  ;;  %v8845_v55 = vld [vmem:[#allocation5 + $0x70c] sm:$0xf]  ;;  %v8720_v57 = vld [vmem:[#allocation5 + $0x324] sm:$0xf] }
  0x53   :  { %1842 = vmatpush.bf16.msra.mxu2 %v6122_v32  ;;  %v8770_v32 = vld [vmem:[#allocation5 + $0x4b4] sm:$0xf]  ;;  %v6642_v44 = vor.u32 %v8810_v36, %v6639_v37  ;;  %v6439_v62 = vld [vmem:[#allocation5 + $0x474] sm:$0xf0]  ;;  %v8800_v63 = vld [vmem:[#allocation5 + $0x5a4] sm:$0xf] }
  0x54   :  { %1830 = vmatpush.bf16.msrb.mxu3 %v5942_v38  ;;  %v6822_v38 = vor.u32 %v8855_v26, %v6819_v27  ;;  %v6482_v40 = vor.u32 %v8770_v32, %v6479_v33  ;;  %v6599_v0 = vld [vmem:[#allocation5 + $0x5b4] sm:$0xf0]  ;;  %v8840_v4 = vld [vmem:[#allocation5 + $0x6e4] sm:$0xf]  ;;  %v8715_v8 = vld [vmem:[#allocation5 + $0x2fc] sm:$0xf] }
  0x55   :  { %1792 = vmatpush.bf16.msrb.mxu0 %v6558_v47  ;;  %v8765_v47 = vld [vmem:[#allocation5 + $0x48c] sm:$0xf]  ;;  %v6759_v5 = vld [vmem:[#allocation5 + $0x6f4] sm:$0xf0]  ;;  %v6602_v9 = vor.u32 %v8800_v63, %v6599_v0  ;;  %v6259_v10 = vld [vmem:[#allocation5 + $0x30c] sm:$0xf0] }
  0x56   :  { %1805 = vmatpush.bf16.msrb.mxu1 %v6718_v50  ;;  %v6619_v50 = vld [vmem:[#allocation5 + $0x5dc] sm:$0xf0]  ;;  %v6462_v54 = vor.u32 %v8765_v47, %v6459_v48  ;;  %v8755_v11 = vld [vmem:[#allocation5 + $0x43c] sm:$0xf]  ;;  %v6419_v12 = vld [vmem:[#allocation5 + $0x44c] sm:$0xf0]  ;;  %v6262_v16 = vor.u32 %v8715_v8, %v6259_v10 }
  0x57   :  { %1843 = vmatpush.bf16.msra.mxu2 %v6102_v46  ;;  %v6299_v46 = vld [vmem:[#allocation5 + $0x35c] sm:$0xf0]  ;;  %v6622_v58 = vor.u32 %v8805_v49, %v6619_v50  ;;  %v8795_v13 = vld [vmem:[#allocation5 + $0x57c] sm:$0xf]  ;;  %v6422_v17 = vor.u32 %v8755_v11, %v6419_v12  ;;  %v6239_v22 = vld [vmem:[#allocation5 + $0x2e4] sm:$0xf0] }
  0x58   :  { %1831 = vmatpush.bf16.msrb.mxu3 %v5922_v51  ;;  %v6802_v51 = vor.u32 %v8850_v41, %v6799_v42  ;;  %v6302_v52 = vor.u32 %v8725_v43, %v6299_v46  ;;  %v8835_v18 = vld [vmem:[#allocation5 + $0x6bc] sm:$0xf]  ;;  %v8750_v23 = vld [vmem:[#allocation5 + $0x414] sm:$0xf]  ;;  %v6559_v26 = vld [vmem:[#allocation5 + $0x564] sm:$0xf0] }
  0x59   :  { %1793 = vmatpush.bf16.msrb.mxu0 %v6538_v60  ;;  %v8760_v60 = vld [vmem:[#allocation5 + $0x464] sm:$0xf]  ;;  %v8830_v31 = vld [vmem:[#allocation5 + $0x694] sm:$0xf]  ;;  %v6719_v32 = vld [vmem:[#allocation5 + $0x6a4] sm:$0xf0] }
  0x5a   :  { %1806 = vmatpush.bf16.msrb.mxu1 %v6698_v1  ;;  %v6782_v1 = vor.u32 %v8845_v55, %v6779_v56  ;;  %v6442_v3 = vor.u32 %v8760_v60, %v6439_v62  ;;  %v8705_v33 = vld [vmem:[#allocation5 + $0x2ac] sm:$0xf]  ;;  %v6219_v36 = vld [vmem:[#allocation5 + $0x2bc] sm:$0xf0]  ;;  %v6722_v41 = vor.u32 %v8830_v31, %v6719_v32  ;;  %v8700_v47 = vld [vmem:[#allocation5 + $0x284] sm:$0xf] }
  0x5b   :  { %1844 = vmatpush.bf16.msra.mxu2 %v6082_v59  ;;  %v6279_v59 = vld [vmem:[#allocation5 + $0x334] sm:$0xf0]  ;;  %v8745_v37 = vld [vmem:[#allocation5 + $0x3ec] sm:$0xf]  ;;  %v6699_v43 = vld [vmem:[#allocation5 + $0x67c] sm:$0xf0] }
  0x5c   :  { %1832 = vmatpush.bf16.msrb.mxu3 %v5902_v2  ;;  %v6282_v2 = vor.u32 %v8720_v57, %v6279_v59  ;;  %v8825_v42 = vld [vmem:[#allocation5 + $0x66c] sm:$0xf]  ;;  %v6199_v48 = vld [vmem:[#allocation5 + $0x294] sm:$0xf0]  ;;  %v8740_v49 = vld [vmem:[#allocation5 + $0x3c4] sm:$0xf] }
  0x5d   :  { %1794 = vmatpush.bf16.msrb.mxu0 %v6518_v15  ;;  %v6762_v15 = vor.u32 %v8840_v4, %v6759_v5  ;;  %v6025_v55 = vld [vmem:[#allocation5 + $0x120] sm:$0xf]  ;;  %v8658_v56 = vld [vmem:[#allocation5 + $0x130] sm:$0xf0]  ;;  %v8860_v60 = vld [vmem:[#allocation5 + $0x784] sm:$0xf]  ;;  %v6202_v63 = vor.u32 %v8700_v47, %v6199_v48 }
  0x5e   :  { %1807 = vmatpush.bf16.msrb.mxu1 %v6678_v19  ;;  %v6739_v19 = vld [vmem:[#allocation5 + $0x6cc] sm:$0xf0]  ;;  %v6185_v57 = vld [vmem:[#allocation5 + $0x260] sm:$0xf]  ;;  %v8698_v59 = vld [vmem:[#allocation5 + $0x270] sm:$0xf0]  ;;  %v6026_v5 = vor.u32 %v8658_v56, %v6025_v55 }
  0x5f   :  { %1845 = vmatpush.bf16.msra.mxu2 %v6062_v14  ;;  %v6579_v14 = vld [vmem:[#allocation5 + $0x58c] sm:$0xf0]  ;;  %v6742_v27 = vor.u32 %v8835_v18, %v6739_v19  ;;  %v6839_v62 = vld [vmem:[#allocation5 + $0x794] sm:$0xf0]  ;;  %v8738_v8 = vld [vmem:[#allocation5 + $0x3b0] sm:$0xf0]  ;;  %v6186_v11 = vor.u32 %v8698_v59, %v6185_v57 }
  0x60   :  { %1833 = vmatpush.bf16.msrb.mxu3 %v5882_v20  ;;  %1795 = vmatmul.bf16.vlgmr.msrb.gmra.mxu0 %v9625_v30  ;;  %v8710_v20 = vld [vmem:[#allocation5 + $0x2d4] sm:$0xf]  ;;  %v6582_v21 = vor.u32 %v8795_v13, %v6579_v14  ;;  %v6842_v12 = vor.u32 %v8860_v60, %v6839_v62  ;;  %v6005_v13 = vld [vmem:[#allocation5 + $0xf8] sm:$0xf]  ;;  %v8653_v14 = vld [vmem:[#allocation5 + $0x108] sm:$0xf0] }
  0x61   :  { %1852 = vmatpush.bf16.msra.mxu0 %v6342_v24  ;;  %1808 = vmatmul.bf16.vlgmr.msrb.gmra.mxu1 %v9627_v35  ;;  %v6399_v24 = vld [vmem:[#allocation5 + $0x424] sm:$0xf0]  ;;  %v6242_v28 = vor.u32 %v8710_v20, %v6239_v22  ;;  %v8778_v10 = vld [vmem:[#allocation5 + $0x4f0] sm:$0xf0]  ;;  %v6325_v20 = vld [vmem:[#allocation5 + $0x378] sm:$0xf] }
  0x62   :  { %1865 = vmatpush.bf16.msra.mxu1 %v6502_v25  ;;  %v8790_v25 = vld [vmem:[#allocation5 + $0x554] sm:$0xf]  ;;  %v8733_v22 = vld [vmem:[#allocation5 + $0x388] sm:$0xf0]  ;;  %v6285_v47 = vld [vmem:[#allocation5 + $0x328] sm:$0xf] }
  0x63   :  { %1846 = vmatpush.bf16.msra.mxu2 %v6042_v34  ;;  %1834 = vmatmul.bf16.vlgmr.msrb.gmra.mxu3 %v9611_v61  ;;  %v6562_v34 = vor.u32 %v8790_v25, %v6559_v26  ;;  %v5985_v26 = vld [vmem:[#allocation5 + $0xd0] sm:$0xf]  ;;  %v6326_v31 = vor.u32 %v8733_v22, %v6325_v20  ;;  %v8638_v55 = vld [vmem:[#allocation5 + $0x90] sm:$0xf0]  ;;  %v6105_v56 = vld [vmem:[#allocation5 + $0x1c0] sm:$0xf] }
  0x64   :  { %1878 = vmatpush.bf16.msra.mxu3 %v6662_v29  ;;  %v6402_v29 = vor.u32 %v8750_v23, %v6399_v24  ;;  %v6485_v23 = vld [vmem:[#allocation5 + $0x4b8] sm:$0xf]  ;;  %v8773_v24 = vld [vmem:[#allocation5 + $0x4c8] sm:$0xf0]  ;;  %v8678_v57 = vld [vmem:[#allocation5 + $0x1d0] sm:$0xf0] }
  0x65   :  { %1853 = vmatpush.bf16.msra.mxu0 %v6322_v39  ;;  %v8785_v39 = vld [vmem:[#allocation5 + $0x52c] sm:$0xf]  ;;  %v6486_v32 = vor.u32 %v8773_v24, %v6485_v23  ;;  %v6265_v60 = vld [vmem:[#allocation5 + $0x300] sm:$0xf]  ;;  %v8668_v20 = vld [vmem:[#allocation5 + $0x180] sm:$0xf0] }
  0x66   :  { %1866 = vmatpush.bf16.msra.mxu1 %v6482_v40  ;;  %1847 = vmatmul.bf16.vlgmr.msra.gmra.mxu2 %v9615_v6  ;;  %v6539_v40 = vld [vmem:[#allocation5 + $0x53c] sm:$0xf0]  ;;  %v6225_v23 = vld [vmem:[#allocation5 + $0x2b0] sm:$0xf]  ;;  %v8708_v24 = vld [vmem:[#allocation5 + $0x2c0] sm:$0xf0] }
  0x67   :  { %1891 = vmatpush.bf16.msrb.mxu2 %v6822_v38  ;;  %v6379_v38 = vld [vmem:[#allocation5 + $0x3fc] sm:$0xf0]  ;;  %v6542_v50 = vor.u32 %v8785_v39, %v6539_v40  ;;  %v5965_v40 = vld [vmem:[#allocation5 + $0xa8] sm:$0xf] }
  0x68   :  { %1879 = vmatpush.bf16.msra.mxu3 %v6642_v44  ;;  %v6222_v44 = vor.u32 %v8705_v33, %v6219_v36  ;;  %v6382_v46 = vor.u32 %v8745_v37, %v6379_v38  ;;  %v6305_v33 = vld [vmem:[#allocation5 + $0x350] sm:$0xf]  ;;  %v8728_v36 = vld [vmem:[#allocation5 + $0x360] sm:$0xf0] }
  0x69   :  { %1854 = vmatpush.bf16.msra.mxu0 %v6302_v52  ;;  %v8780_v52 = vld [vmem:[#allocation5 + $0x504] sm:$0xf]  ;;  %v6465_v37 = vld [vmem:[#allocation5 + $0x490] sm:$0xf] }
  0x6a   :  { %1867 = vmatpush.bf16.msra.mxu1 %v6462_v54  ;;  %v6519_v54 = vld [vmem:[#allocation5 + $0x514] sm:$0xf0]  ;;  %v8768_v38 = vld [vmem:[#allocation5 + $0x4a0] sm:$0xf0] }
  0x6b   :  { %1892 = vmatpush.bf16.msrb.mxu2 %v6802_v51  ;;  %v6359_v51 = vld [vmem:[#allocation5 + $0x3d4] sm:$0xf0]  ;;  %v6522_v4 = vor.u32 %v8780_v52, %v6519_v54  ;;  %v5945_v54 = vld [vmem:[#allocation5 + $0x80] sm:$0xf] }
  0x6c   :  { %1880 = vmatpush.bf16.msra.mxu3 %v6622_v58  ;;  %v6702_v58 = vor.u32 %v8825_v42, %v6699_v43  ;;  %v6362_v0 = vor.u32 %v8740_v49, %v6359_v51  ;;  %v6125_v42 = vld [vmem:[#allocation5 + $0x1e8] sm:$0xf]  ;;  %v8683_v43 = vld [vmem:[#allocation5 + $0x1f8] sm:$0xf0]  ;;  %v5946_v62 = vor.u32 %v8638_v55, %v5945_v54  ;;  %v6645_v55 = vld [vmem:[#allocation5 + $0x5f8] sm:$0xf] }
  0x6d   :  { %1855 = vmatpush.bf16.msra.mxu0 %v6282_v2  ;;  %v6679_v2 = vld [vmem:[#allocation5 + $0x654] sm:$0xf0]  ;;  %v8723_v49 = vld [vmem:[#allocation5 + $0x338] sm:$0xf0]  ;;  %v6126_v52 = vor.u32 %v8683_v43, %v6125_v42 }
  0x6e   :  { %1868 = vmatpush.bf16.msra.mxu1 %v6442_v3  ;;  %v6345_v3 = vld [vmem:[#allocation5 + $0x3a0] sm:$0xf]  ;;  %v8763_v51 = vld [vmem:[#allocation5 + $0x478] sm:$0xf0] }
  0x6f   :  { %1893 = vmatpush.bf16.msrb.mxu2 %v6782_v1  ;;  %v8820_v1 = vld [vmem:[#allocation5 + $0x644] sm:$0xf]  ;;  %v6346_v18 = vor.u32 %v8738_v8, %v6345_v3  ;;  %v5925_v3 = vld [vmem:[#allocation5 + $0x58] sm:$0xf]  ;;  %v8673_v8 = vld [vmem:[#allocation5 + $0x1a8] sm:$0xf0] }
  0x70   :  { %1881 = vmatpush.bf16.msra.mxu3 %v6602_v9  ;;  %v6505_v9 = vld [vmem:[#allocation5 + $0x4e0] sm:$0xf]  ;;  %v8703_v42 = vld [vmem:[#allocation5 + $0x298] sm:$0xf0] }
  0x71   :  { %1856 = vmatpush.bf16.msra.mxu0 %v6262_v16  ;;  %v6165_v16 = vld [vmem:[#allocation5 + $0x238] sm:$0xf]  ;;  %v6506_v19 = vor.u32 %v8778_v10, %v6505_v9 }
  0x72   :  { %1869 = vmatpush.bf16.msra.mxu1 %v6422_v17  ;;  %v8693_v17 = vld [vmem:[#allocation5 + $0x248] sm:$0xf0] }
  0x73   :  { %1894 = vmatpush.bf16.msrb.mxu2 %v6762_v15  ;;  %v6682_v15 = vor.u32 %v8820_v1, %v6679_v2  ;;  %v6166_v25 = vor.u32 %v8693_v17, %v6165_v16  ;;  %v8758_v1 = vld [vmem:[#allocation5 + $0x450] sm:$0xf0]  ;;  %v6106_v2 = vor.u32 %v8678_v57, %v6105_v56  ;;  %v5905_v17 = vld [vmem:[#allocation5 + $0x30] sm:$0xf]  ;;  %v8813_v56 = vld [vmem:[#allocation5 + $0x608] sm:$0xf0] }
  0x74   :  { %1882 = vmatpush.bf16.msra.mxu3 %v6582_v21  ;;  %v6006_v21 = vor.u32 %v8653_v14, %v6005_v13  ;;  %v8713_v13 = vld [vmem:[#allocation5 + $0x2e8] sm:$0xf0]  ;;  %v6405_v14 = vld [vmem:[#allocation5 + $0x418] sm:$0xf] }
  0x75   :  { %1857 = vmatpush.bf16.msra.mxu0 %v6242_v28  ;;  %v6145_v28 = vld [vmem:[#allocation5 + $0x210] sm:$0xf] }
  0x76   :  { %1870 = vmatpush.bf16.msra.mxu1 %v6402_v29  ;;  %v8688_v29 = vld [vmem:[#allocation5 + $0x220] sm:$0xf0] }
  0x77   :  { %1895 = vmatpush.bf16.msrb.mxu2 %v6742_v27  ;;  %v8648_v27 = vld [vmem:[#allocation5 + $0xe0] sm:$0xf0]  ;;  %v6146_v39 = vor.u32 %v8688_v29, %v6145_v28  ;;  %v5885_v28 = vld [vmem:[#allocation5 + $0x8] sm:$0xf] }
  0x78   :  { %1883 = vmatpush.bf16.msra.mxu3 %v6562_v34  ;;  %v5986_v34 = vor.u32 %v8648_v27, %v5985_v26  ;;  %v6385_v26 = vld [vmem:[#allocation5 + $0x3f0] sm:$0xf]  ;;  %v8748_v27 = vld [vmem:[#allocation5 + $0x400] sm:$0xf0] }
  0x79   :  { %1858 = vmatpush.bf16.msra.mxu0 %v6222_v44  ;;  %v6306_v44 = vor.u32 %v8728_v36, %v6305_v33  ;;  %v8663_v33 = vld [vmem:[#allocation5 + $0x158] sm:$0xf0]  ;;  %v8818_v36 = vld [vmem:[#allocation5 + $0x630] sm:$0xf0] }
  0x7a   :  { %1871 = vmatpush.bf16.msra.mxu1 %v6382_v46  ;;  %v6466_v46 = vor.u32 %v8768_v38, %v6465_v37  ;;  %v6825_v37 = vld [vmem:[#allocation5 + $0x760] sm:$0xf]  ;;  %v6226_v38 = vor.u32 %v8708_v24, %v6225_v23  ;;  %v6765_v23 = vld [vmem:[#allocation5 + $0x6e8] sm:$0xf]  ;;  %v8843_v24 = vld [vmem:[#allocation5 + $0x6f8] sm:$0xf0] }
  0x7b   :  { %1896 = vmatpush.bf16.msrb.mxu2 %v6722_v41  ;;  %v8643_v41 = vld [vmem:[#allocation5 + $0xb8] sm:$0xf0] }
  0x7c   :  { %1884 = vmatpush.bf16.msra.mxu3 %v6542_v50  ;;  %v5966_v48 = vor.u32 %v8643_v41, %v5965_v40  ;;  %v6445_v50 = vld [vmem:[#allocation5 + $0x468] sm:$0xf]  ;;  %v8858_v40 = vld [vmem:[#allocation5 + $0x770] sm:$0xf0] }
  0x7d   :  { %1859 = vmatpush.bf16.msra.mxu0 %v6202_v63  ;;  %v6446_v59 = vor.u32 %v8763_v51, %v6445_v50  ;;  %v8718_v63 = vld [vmem:[#allocation5 + $0x310] sm:$0xf0]  ;;  %v6205_v41 = vld [vmem:[#allocation5 + $0x288] sm:$0xf]  ;;  %v6027_v50 = vld [vmem:[#allocation5 + $0x134] sm:$0xf0]  ;;  %v6826_v54 = vor.u32 %v8858_v40, %v6825_v37 }
  0x7e   :  { %1872 = vmatpush.bf16.msra.mxu1 %v6362_v0  ;;  %v6425_v0 = vld [vmem:[#allocation5 + $0x440] sm:$0xf]  ;;  %v6266_v9 = vor.u32 %v8718_v63, %v6265_v60  ;;  %v6845_v51 = vld [vmem:[#allocation5 + $0x788] sm:$0xf]  ;;  %v6206_v57 = vor.u32 %v8703_v42, %v6205_v41  ;;  %v8853_v60 = vld [vmem:[#allocation5 + $0x748] sm:$0xf0] }
  0x7f   :  { %1897 = vmatpush.bf16.msrb.mxu2 %v6702_v58  ;;  %v6286_v58 = vor.u32 %v8723_v49, %v6285_v47  ;;  %v6426_v10 = vor.u32 %v8758_v1, %v6425_v0  ;;  %v8656_v47 = vld [vmem:[#allocation5 + $0x124] sm:$0xf]  ;;  %v6187_v1 = vld [vmem:[#allocation5 + $0x274] sm:$0xf0]  ;;  %v6745_v37 = vld [vmem:[#allocation5 + $0x6c0] sm:$0xf] }
  0x80   :  { %1885 = vmatpush.bf16.msra.mxu3 %v6522_v4  ;;  %1860 = vmatmul.bf16.vlgmr.msra.gmra.mxu0 %v9609_v53  ;;  %v8633_v4 = vld [vmem:[#allocation5 + $0x68] sm:$0xf0]  ;;  %v8696_v0 = vld [vmem:[#allocation5 + $0x264] sm:$0xf]  ;;  %v6127_v41 = vld [vmem:[#allocation5 + $0x1fc] sm:$0xf0] }
  0x81   :  { %1911 = vmatpush.bf16.msrb.mxu0 %v6842_v12  ;;  %1873 = vmatmul.bf16.vlgmr.msra.gmra.mxu1 %v9617_v7  ;;  %v5926_v12 = vor.u32 %v8633_v4, %v5925_v3  ;;  %v8651_v3 = vld [vmem:[#allocation5 + $0xfc] sm:$0xf]  ;;  %v6007_v4 = vld [vmem:[#allocation5 + $0x10c] sm:$0xf0]  ;;  %v8681_v40 = vld [vmem:[#allocation5 + $0x1ec] sm:$0xf] }
  0x82   :  { %1917 = vmatpush.bf16.msrb.mxu1 %v6026_v5  ;;  %v6085_v5 = vld [vmem:[#allocation5 + $0x198] sm:$0xf] }
  0x83   :  { %1898 = vmatpush.bf16.msrb.mxu2 %v6682_v15  ;;  %1886 = vmatmul.bf16.vlgmr.msra.gmra.mxu3 %v9625_v30  ;;  %v8753_v15 = vld [vmem:[#allocation5 + $0x428] sm:$0xf0]  ;;  %v6086_v16 = vor.u32 %v8673_v8, %v6085_v5  ;;  %v6625_v8 = vld [vmem:[#allocation5 + $0x5d0] sm:$0xf] }
  0x84   :  { %1930 = vmatpush.bf16.msrb.mxu3 %v6186_v11  ;;  %v6245_v11 = vld [vmem:[#allocation5 + $0x2d8] sm:$0xf]  ;;  %v6406_v22 = vor.u32 %v8753_v15, %v6405_v14  ;;  %v8691_v14 = vld [vmem:[#allocation5 + $0x23c] sm:$0xf]  ;;  %v6167_v15 = vld [vmem:[#allocation5 + $0x24c] sm:$0xf0] }
  0x85   :  { %1943 = vmatpush.bf16.msra.mxu0 %v6346_v18  ;;  %v8628_v18 = vld [vmem:[#allocation5 + $0x40] sm:$0xf0] }
  0x86   :  { %1918 = vmatpush.bf16.msrb.mxu1 %v6006_v21  ;;  %1899 = vmatmul.bf16.vlgmr.msrb.gmra.mxu2 %v9627_v35  ;;  %v6246_v21 = vor.u32 %v8713_v13, %v6245_v11  ;;  %v6785_v11 = vld [vmem:[#allocation5 + $0x710] sm:$0xf]  ;;  %v6010_v13 = vor.u32 %v8651_v3, %v6007_v4  ;;  %v8671_v3 = vld [vmem:[#allocation5 + $0x19c] sm:$0xf] }
  0x87   :  { %1956 = vmatpush.bf16.msra.mxu2 %v6506_v19  ;;  %v6065_v19 = vld [vmem:[#allocation5 + $0x170] sm:$0xf] }
  0x88   :  { %1931 = vmatpush.bf16.msrb.mxu3 %v6166_v25  ;;  %v5906_v25 = vor.u32 %v8628_v18, %v5905_v17  ;;  %v6066_v29 = vor.u32 %v8668_v20, %v6065_v19  ;;  %v8646_v17 = vld [vmem:[#allocation5 + $0xd4] sm:$0xf]  ;;  %v5987_v18 = vld [vmem:[#allocation5 + $0xe4] sm:$0xf0]  ;;  %v6087_v4 = vld [vmem:[#allocation5 + $0x1ac] sm:$0xf0] }
  0x89   :  { %1944 = vmatpush.bf16.msra.mxu0 %v6326_v31  ;;  %v8623_v31 = vld [vmem:[#allocation5 + $0x18] sm:$0xf0]  ;;  %v6605_v20 = vld [vmem:[#allocation5 + $0x5a8] sm:$0xf] }
  0x8a   :  { %1919 = vmatpush.bf16.msrb.mxu1 %v5986_v34  ;;  %v6665_v34 = vld [vmem:[#allocation5 + $0x620] sm:$0xf]  ;;  %v5886_v43 = vor.u32 %v8623_v31, %v5885_v28 }
  0x8b   :  { %1957 = vmatpush.bf16.msra.mxu2 %v6486_v32  ;;  %v6045_v32 = vld [vmem:[#allocation5 + $0x148] sm:$0xf]  ;;  %v6666_v49 = vor.u32 %v8818_v36, %v6665_v34  ;;  %v5967_v31 = vld [vmem:[#allocation5 + $0xbc] sm:$0xf0]  ;;  %v8798_v34 = vld [vmem:[#allocation5 + $0x590] sm:$0xf0] }
  0x8c   :  { %1932 = vmatpush.bf16.msrb.mxu3 %v6146_v39  ;;  %v6386_v39 = vor.u32 %v8748_v27, %v6385_v26  ;;  %v8686_v26 = vld [vmem:[#allocation5 + $0x214] sm:$0xf]  ;;  %v6147_v27 = vld [vmem:[#allocation5 + $0x224] sm:$0xf0] }
  0x8d   :  { %1945 = vmatpush.bf16.msra.mxu0 %v6306_v44  ;;  %v6365_v44 = vld [vmem:[#allocation5 + $0x3c8] sm:$0xf]  ;;  %v6150_v36 = vor.u32 %v8686_v26, %v6147_v27 }
  0x8e   :  { %1920 = vmatpush.bf16.msrb.mxu1 %v5966_v48  ;;  %v6046_v48 = vor.u32 %v8663_v33, %v6045_v32  ;;  %v6766_v32 = vor.u32 %v8843_v24, %v6765_v23  ;;  %v6585_v33 = vld [vmem:[#allocation5 + $0x580] sm:$0xf]  ;;  %v8621_v24 = vld [vmem:[#allocation5 + $0xc] sm:$0xf] }
  0x8f   :  { %1958 = vmatpush.bf16.msra.mxu2 %v6466_v46  ;;  %v8743_v46 = vld [vmem:[#allocation5 + $0x3d8] sm:$0xf0]  ;;  %v6586_v42 = vor.u32 %v8798_v34, %v6585_v33  ;;  %v6327_v34 = vld [vmem:[#allocation5 + $0x38c] sm:$0xf0] }
  0x90   :  { %1933 = vmatpush.bf16.msrb.mxu3 %v6126_v52  ;;  %6856 = vmatmul.msk.bf16.vlgmr.msrb.gmra.mxu0 %vm1731_vm0, %v9621_v45  ;;  %v8863_v52 = vld [vmem:[#allocation5 + $0x798] sm:$0xf0] }
  0x91   :  { %1946 = vmatpush.bf16.msra.mxu0 %v6286_v58  ;;  %v6366_v58 = vor.u32 %v8743_v46, %v6365_v44  ;;  %v6846_v63 = vor.u32 %v8863_v52, %v6845_v51  ;;  %v5947_v44 = vld [vmem:[#allocation5 + $0x94] sm:$0xf0]  ;;  %v8833_v51 = vld [vmem:[#allocation5 + $0x6a8] sm:$0xf0]  ;;  %v8731_v33 = vld [vmem:[#allocation5 + $0x37c] sm:$0xf] }
  0x92   :  { %1921 = vmatpush.bf16.msrb.mxu1 %v5946_v62  ;;  %v6030_v62 = vor.u32 %v8656_v47, %v6027_v50  ;;  %v6565_v47 = vld [vmem:[#allocation5 + $0x558] sm:$0xf] }
  0x93   :  { %1959 = vmatpush.bf16.msra.mxu2 %v6446_v59  ;;  %v6805_v59 = vld [vmem:[#allocation5 + $0x738] sm:$0xf] }
  0x94   :  { %1934 = vmatpush.bf16.msrb.mxu3 %v6106_v2  ;;  %v6646_v2 = vor.u32 %v8813_v56, %v6645_v55  ;;  %v6806_v5 = vor.u32 %v8853_v60, %v6805_v59  ;;  %v6725_v50 = vld [vmem:[#allocation5 + $0x698] sm:$0xf]  ;;  %v6545_v60 = vld [vmem:[#allocation5 + $0x530] sm:$0xf] }
  0x95   :  { %1947 = vmatpush.bf16.msra.mxu0 %v6266_v9  ;;  %v8808_v9 = vld [vmem:[#allocation5 + $0x5e0] sm:$0xf0]  ;;  %v6107_v55 = vld [vmem:[#allocation5 + $0x1d4] sm:$0xf0]  ;;  %v6726_v59 = vor.u32 %v8833_v51, %v6725_v50  ;;  %v8726_v50 = vld [vmem:[#allocation5 + $0x354] sm:$0xf] }
  0x96   :  { %1922 = vmatpush.bf16.msrb.mxu1 %v5926_v12  ;;  %v8848_v12 = vld [vmem:[#allocation5 + $0x720] sm:$0xf0]  ;;  %v6307_v51 = vld [vmem:[#allocation5 + $0x364] sm:$0xf0] }
  0x97   :  { %1960 = vmatpush.bf16.msra.mxu2 %v6426_v10  ;;  %v6190_v10 = vor.u32 %v8696_v0, %v6187_v1  ;;  %v6786_v19 = vor.u32 %v8848_v12, %v6785_v11  ;;  %v6705_v0 = vld [vmem:[#allocation5 + $0x670] sm:$0xf]  ;;  %v8828_v1 = vld [vmem:[#allocation5 + $0x680] sm:$0xf0]  ;;  %v8783_v12 = vld [vmem:[#allocation5 + $0x518] sm:$0xf0] }
  0x98   :  { %1935 = vmatpush.bf16.msrb.mxu3 %v6086_v16  ;;  %v6626_v16 = vor.u32 %v8808_v9, %v6625_v8  ;;  %v8626_v8 = vld [vmem:[#allocation5 + $0x34] sm:$0xf]  ;;  %v5907_v9 = vld [vmem:[#allocation5 + $0x44] sm:$0xf0]  ;;  %v6706_v11 = vor.u32 %v8828_v1, %v6705_v0  ;;  %v8721_v1 = vld [vmem:[#allocation5 + $0x32c] sm:$0xf] }
  0x99   :  { %1948 = vmatpush.bf16.msra.mxu0 %v6246_v21  ;;  %v8803_v21 = vld [vmem:[#allocation5 + $0x5b8] sm:$0xf0] }
  0x9a   :  { %1923 = vmatpush.bf16.msrb.mxu1 %v5906_v25  ;;  %v5990_v25 = vor.u32 %v8646_v17, %v5987_v18  ;;  %v6606_v28 = vor.u32 %v8803_v21, %v6605_v20  ;;  %v6347_v17 = vld [vmem:[#allocation5 + $0x3b4] sm:$0xf0]  ;;  %v8776_v18 = vld [vmem:[#allocation5 + $0x4e4] sm:$0xf]  ;;  %v8666_v21 = vld [vmem:[#allocation5 + $0x174] sm:$0xf] }
  0x9b   :  { %1961 = vmatpush.bf16.msra.mxu2 %v6406_v22  ;;  %v6170_v22 = vor.u32 %v8691_v14, %v6167_v15  ;;  %v8823_v14 = vld [vmem:[#allocation5 + $0x658] sm:$0xf0]  ;;  %v6090_v15 = vor.u32 %v8671_v3, %v6087_v4  ;;  %v6507_v20 = vld [vmem:[#allocation5 + $0x4f4] sm:$0xf0]  ;;  %v8761_v4 = vld [vmem:[#allocation5 + $0x46c] sm:$0xf] }
  0x9c   :  { %1936 = vmatpush.bf16.msrb.mxu3 %v6066_v29  ;;  %v8641_v29 = vld [vmem:[#allocation5 + $0xac] sm:$0xf] }
  0x9d   :  { %1949 = vmatpush.bf16.msra.mxu0 %v6226_v38  ;;  %v8838_v38 = vld [vmem:[#allocation5 + $0x6d0] sm:$0xf0] }
  0x9e   :  { %1924 = vmatpush.bf16.msrb.mxu1 %v5886_v43  ;;  %v8636_v43 = vld [vmem:[#allocation5 + $0x84] sm:$0xf]  ;;  %v6746_v46 = vor.u32 %v8838_v38, %v6745_v37  ;;  %v6487_v38 = vld [vmem:[#allocation5 + $0x4cc] sm:$0xf0] }
  0x9f   :  { %1962 = vmatpush.bf16.msra.mxu2 %v6386_v39  ;;  %v5970_v39 = vor.u32 %v8641_v29, %v5967_v31  ;;  %v5950_v52 = vor.u32 %v8636_v43, %v5947_v44  ;;  %v6667_v29 = vld [vmem:[#allocation5 + $0x634] sm:$0xf0]  ;;  %v6510_v31 = vor.u32 %v8776_v18, %v6507_v20  ;;  %v6330_v44 = vor.u32 %v8731_v33, %v6327_v34  ;;  %v8751_v34 = vld [vmem:[#allocation5 + $0x41c] sm:$0xf] }
  0xa0   :  { %1937 = vmatpush.bf16.msrb.mxu3 %v6046_v48  ;;  %v8793_v48 = vld [vmem:[#allocation5 + $0x568] sm:$0xf0]  ;;  %v6827_v43 = vld [vmem:[#allocation5 + $0x774] sm:$0xf0] }
  0xa1   :  { %1950 = vmatpush.bf16.msra.mxu0 %v6206_v57  ;;  %1925 = vmatmul.bf16.vlgmr.msrb.gmra.mxu1 %v9611_v61  ;;  %v6566_v56 = vor.u32 %v8793_v48, %v6565_v47  ;;  %v8631_v57 = vld [vmem:[#allocation5 + $0x5c] sm:$0xf]  ;;  %v6647_v47 = vld [vmem:[#allocation5 + $0x60c] sm:$0xf0]  ;;  %v6427_v20 = vld [vmem:[#allocation5 + $0x454] sm:$0xf0] }
  0xa2   :  { %1969 = vmatpush.bf16.msra.mxu1 %v6666_v49  ;;  %v6130_v49 = vor.u32 %v8681_v40, %v6127_v41  ;;  %v6047_v40 = vld [vmem:[#allocation5 + $0x15c] sm:$0xf0] }
  0xa3   :  { %1963 = vmatpush.bf16.msra.mxu2 %v6366_v58  ;;  %1938 = vmatmul.bf16.vlgmr.msrb.gmra.mxu3 %v9615_v6  ;;  %v5927_v58 = vld [vmem:[#allocation5 + $0x6c] sm:$0xf0] }
  0xa4   :  { %1982 = vmatpush.bf16.msra.mxu3 %v6826_v54  ;;  %1951 = vmatmul.bf16.vlgmr.msra.gmra.mxu0 %v9609_v53  ;;  %v8676_v54 = vld [vmem:[#allocation5 + $0x1c4] sm:$0xf] }
  0xa5   :  { %2002 = vmatpush.bf16.msrb.mxu0 %v6846_v63  ;;  %v6110_v63 = vor.u32 %v8676_v54, %v6107_v55  ;;  %v8766_v54 = vld [vmem:[#allocation5 + $0x494] sm:$0xf]  ;;  %v6467_v55 = vld [vmem:[#allocation5 + $0x4a4] sm:$0xf0] }
  0xa6   :  { %1970 = vmatpush.bf16.msra.mxu1 %v6646_v2  ;;  %1964 = vmatmul.bf16.vlgmr.msra.gmra.mxu2 %v9617_v7  ;;  %v5930_v2 = vor.u32 %v8631_v57, %v5927_v58  ;;  %v8851_v57 = vld [vmem:[#allocation5 + $0x73c] sm:$0xf]  ;;  %v6807_v58 = vld [vmem:[#allocation5 + $0x74c] sm:$0xf0]  ;;  %v6470_v0 = vor.u32 %v8766_v54, %v6467_v55 }
  0xa7   :  { %2008 = vmatpush.bf16.msrb.mxu2 %v6030_v62  ;;  %v8788_v62 = vld [vmem:[#allocation5 + $0x540] sm:$0xf0]  ;;  %v6810_v3 = vor.u32 %v8851_v57, %v6807_v58  ;;  %v8831_v57 = vld [vmem:[#allocation5 + $0x69c] sm:$0xf]  ;;  %v6727_v58 = vld [vmem:[#allocation5 + $0x6ac] sm:$0xf0] }
  0xa8   :  { %1983 = vmatpush.bf16.msra.mxu3 %v6806_v5  ;;  %v6546_v5 = vor.u32 %v8788_v62, %v6545_v60  ;;  %v8806_v60 = vld [vmem:[#allocation5 + $0x5d4] sm:$0xf]  ;;  %v6627_v62 = vld [vmem:[#allocation5 + $0x5e4] sm:$0xf0] }
  0xa9   :  { %2021 = vmatpush.bf16.msra.mxu0 %v6190_v10  ;;  %v6525_v10 = vld [vmem:[#allocation5 + $0x508] sm:$0xf] }
  0xaa   :  { %1971 = vmatpush.bf16.msra.mxu1 %v6626_v16  ;;  %v8736_v16 = vld [vmem:[#allocation5 + $0x3a4] sm:$0xf]  ;;  %v6526_v23 = vor.u32 %v8783_v12, %v6525_v10  ;;  %v6787_v10 = vld [vmem:[#allocation5 + $0x724] sm:$0xf0] }
  0xab   :  { %2009 = vmatpush.bf16.msrb.mxu2 %v6010_v13  ;;  %v6685_v13 = vld [vmem:[#allocation5 + $0x648] sm:$0xf]  ;;  %v6350_v27 = vor.u32 %v8736_v16, %v6347_v17  ;;  %v8716_v16 = vld [vmem:[#allocation5 + $0x304] sm:$0xf]  ;;  %v6267_v17 = vld [vmem:[#allocation5 + $0x314] sm:$0xf0] }
  0xac   :  { %1984 = vmatpush.bf16.msra.mxu3 %v6786_v19  ;;  %v5910_v19 = vor.u32 %v8626_v8, %v5907_v9  ;;  %v6686_v26 = vor.u32 %v8823_v14, %v6685_v13  ;;  %v6630_v8 = vor.u32 %v8806_v60, %v6627_v62  ;;  %v8846_v9 = vld [vmem:[#allocation5 + $0x714] sm:$0xf]  ;;  %v8801_v13 = vld [vmem:[#allocation5 + $0x5ac] sm:$0xf]  ;;  %v6607_v14 = vld [vmem:[#allocation5 + $0x5bc] sm:$0xf0] }
  0xad   :  { %2022 = vmatpush.bf16.msra.mxu0 %v6170_v22  ;;  %v6067_v22 = vld [vmem:[#allocation5 + $0x184] sm:$0xf0]  ;;  %v6790_v18 = vor.u32 %v8846_v9, %v6787_v10  ;;  %v8786_v60 = vld [vmem:[#allocation5 + $0x534] sm:$0xf]  ;;  %v8861_v10 = vld [vmem:[#allocation5 + $0x78c] sm:$0xf] }
  0xae   :  { %1972 = vmatpush.bf16.msra.mxu1 %v6606_v28  ;;  %v8816_v28 = vld [vmem:[#allocation5 + $0x624] sm:$0xf]  ;;  %v6547_v62 = vld [vmem:[#allocation5 + $0x544] sm:$0xf0] }
  0xaf   :  { %2010 = vmatpush.bf16.msrb.mxu2 %v5990_v25  ;;  %v5887_v25 = vld [vmem:[#allocation5 + $0x1c] sm:$0xf0]  ;;  %v6670_v41 = vor.u32 %v8816_v28, %v6667_v29  ;;  %v6587_v28 = vld [vmem:[#allocation5 + $0x594] sm:$0xf0]  ;;  %v6033_v9 = vld [vmem:[#allocation5 + $0x128] sm:$0xf] }
  0xb0   :  { %1985 = vmatpush.bf16.msra.mxu3 %v6766_v32  ;;  %v6070_v32 = vor.u32 %v8666_v21, %v6067_v22  ;;  %v5890_v37 = vor.u32 %v8621_v24, %v5887_v25  ;;  %v6610_v22 = vor.u32 %v8801_v13, %v6607_v14  ;;  %v6767_v24 = vld [vmem:[#allocation5 + $0x6fc] sm:$0xf0]  ;;  %v6550_v13 = vor.u32 %v8786_v60, %v6547_v62  ;;  %v8659_v14 = vld [vmem:[#allocation5 + $0x138] sm:$0xf0]  ;;  %v8729_v60 = vld [vmem:[#allocation5 + $0x368] sm:$0xf0] }
  0xb1   :  { %2023 = vmatpush.bf16.msra.mxu0 %v6150_v36  ;;  %v8771_v36 = vld [vmem:[#allocation5 + $0x4bc] sm:$0xf] }
  0xb2   :  { %1973 = vmatpush.bf16.msra.mxu1 %v6586_v42  ;;  %v8856_v42 = vld [vmem:[#allocation5 + $0x764] sm:$0xf]  ;;  %v6490_v48 = vor.u32 %v8771_v36, %v6487_v38  ;;  %v6407_v36 = vld [vmem:[#allocation5 + $0x42c] sm:$0xf0] }
  0xb3   :  { %2011 = vmatpush.bf16.msrb.mxu2 %v5970_v39  ;;  %v8661_v39 = vld [vmem:[#allocation5 + $0x14c] sm:$0xf] }
  0xb4   :  { %1986 = vmatpush.bf16.msra.mxu3 %v6746_v46  ;;  %6857 = vmatmul.msk.bf16.vlgmr.msrb.gmra.mxu0 %vm1731_vm0, %v9621_v45  ;;  %v8811_v46 = vld [vmem:[#allocation5 + $0x5fc] sm:$0xf] }
  0xb5   :  { %2024 = vmatpush.bf16.msra.mxu0 %v6130_v49  ;;  %v6050_v49 = vor.u32 %v8661_v39, %v6047_v40  ;;  %v8836_v39 = vld [vmem:[#allocation5 + $0x6c4] sm:$0xf]  ;;  %v6747_v40 = vld [vmem:[#allocation5 + $0x6d4] sm:$0xf0] }
  0xb6   :  { %1974 = vmatpush.bf16.msra.mxu1 %v6566_v56  ;;  %v6650_v56 = vor.u32 %v8811_v46, %v6647_v47  ;;  %v6410_v46 = vor.u32 %v8751_v34, %v6407_v36  ;;  %v6687_v34 = vld [vmem:[#allocation5 + $0x65c] sm:$0xf0] }
  0xb7   :  { %2012 = vmatpush.bf16.msrb.mxu2 %v5950_v52  ;;  %v6830_v52 = vor.u32 %v8856_v42, %v6827_v43  ;;  %v8791_v43 = vld [vmem:[#allocation5 + $0x55c] sm:$0xf] }
  0xb8   :  { %1987 = vmatpush.bf16.msra.mxu3 %v6726_v59  ;;  %v6310_v59 = vor.u32 %v8726_v50, %v6307_v51  ;;  %v6750_v50 = vor.u32 %v8836_v39, %v6747_v40  ;;  %v8746_v51 = vld [vmem:[#allocation5 + $0x3f4] sm:$0xf]  ;;  %v8779_v39 = vld [vmem:[#allocation5 + $0x4f8] sm:$0xf0]  ;;  %v6173_v40 = vld [vmem:[#allocation5 + $0x240] sm:$0xf] }
  0xb9   :  { %2025 = vmatpush.bf16.msra.mxu0 %v6110_v63  ;;  %v9647_v63 = vld [vmem:[#allocation7] sm:$0x1f] }
  0xba   :  { %1975 = vmatpush.bf16.msra.mxu1 %v6546_v5  ;;  %v6447_v5 = vld [vmem:[#allocation5 + $0x47c] sm:$0xf0] }
  0xbb   :  { %2013 = vmatpush.bf16.msrb.mxu2 %v5930_v2  ;;  %v6287_v2 = vld [vmem:[#allocation5 + $0x33c] sm:$0xf0] }
  0xbc   :  { %1988 = vmatpush.bf16.msra.mxu3 %v6706_v11  ;;  %v447_v11 = vperm.slane %v9647_v63, 0  ;;  %v6290_v12 = vor.u32 %v8721_v1, %v6287_v2 }
  0xbd   :  { %2026 = vmatpush.bf16.msra.mxu0 %v6090_v15  ;;  %v6450_v15 = vor.u32 %v8761_v4, %v6447_v5  ;;  %v1744_v21 = vpop.f32.mrf.mxu0  ;;  %v8741_v4 = vld [vmem:[#allocation5 + $0x3cc] sm:$0xf]  ;;  %v6367_v5 = vld [vmem:[#allocation5 + $0x3dc] sm:$0xf0] }
  0xbe   :  { %1976 = vmatpush.bf16.msra.mxu1 %v6526_v23  ;;  %v8841_v23 = vld [vmem:[#allocation5 + $0x6ec] sm:$0xf]  ;;  %v1745_v25 = vadd.f32 %v1744_v21, %v447_v11  ;;  %v6847_v11 = vld [vmem:[#allocation5 + $0x79c] sm:$0xf0]  ;;  %v6370_v21 = vor.u32 %v8741_v4, %v6367_v5  ;;  %v8644_v4 = vld [vmem:[#allocation5 + $0xc0] sm:$0xf0] }
  0xbf   :  { %2014 = vmatpush.bf16.msrb.mxu2 %v5910_v19  ;;  %v8756_v19 = vld [vmem:[#allocation5 + $0x444] sm:$0xf]  ;;  %v6770_v33 = vor.u32 %v8841_v23, %v6767_v24  ;;  %v8699_v24 = vld [vmem:[#allocation5 + $0x278] sm:$0xf0] }
  0xc0   :  { %1989 = vmatpush.bf16.msra.mxu3 %v6686_v26  ;;  %v6270_v26 = vor.u32 %v8716_v16, %v6267_v17  ;;  %v6430_v29 = vor.u32 %v8756_v19, %v6427_v20  ;;  %v6707_v16 = vld [vmem:[#allocation5 + $0x684] sm:$0xf0]  ;;  %v6527_v19 = vld [vmem:[#allocation5 + $0x51c] sm:$0xf0] }
  0xc1   :  { %2027 = vmatpush.bf16.msra.mxu0 %v6070_v32  ;;  %1977 = vmatmul.bf16.vlgmr.msra.gmra.mxu1 %v9625_v30  ;;  %v6247_v32 = vld [vmem:[#allocation5 + $0x2ec] sm:$0xf0]  ;;  %v6193_v20 = vld [vmem:[#allocation5 + $0x268] sm:$0xf] }
  0xc2   :  { %2034 = vmatpush.bf16.msrb.mxu1 %v6350_v27  ;;  %v8796_v27 = vld [vmem:[#allocation5 + $0x584] sm:$0xf]  ;;  %v6194_v36 = vor.u32 %v8699_v24, %v6193_v20 }
  0xc3   :  { %2015 = vmatpush.bf16.msrb.mxu2 %v5890_v37  ;;  %1990 = vmatmul.bf16.vlgmr.msra.gmra.mxu3 %v9627_v35  ;;  %v1757_v37 = vpop.f32.mrf.mxu1  ;;  %v6590_v38 = vor.u32 %v8796_v27, %v6587_v28  ;;  %v6034_v27 = vor.u32 %v8659_v14, %v6033_v9  ;;  %v6473_v9 = vld [vmem:[#allocation5 + $0x498] sm:$0xf]  ;;  %v8724_v14 = vld [vmem:[#allocation5 + $0x340] sm:$0xf0] }
  0xc4   :  { %2047 = vmatpush.bf16.msrb.mxu3 %v6510_v31  ;;  %v8711_v31 = vld [vmem:[#allocation5 + $0x2dc] sm:$0xf]  ;;  %v8764_v24 = vld [vmem:[#allocation5 + $0x480] sm:$0xf0] }
  0xc5   :  { %2028 = vmatpush.bf16.msra.mxu0 %v6050_v49  ;;  %v6250_v42 = vor.u32 %v8711_v31, %v6247_v32  ;;  %v1770_v47 = vpop.f32.mrf.mxu2  ;;  %v6227_v49 = vld [vmem:[#allocation5 + $0x2c4] sm:$0xf0]  ;;  %v1746_v54 = vpop.f32.mrf.mxu0  ;;  %v8654_v32 = vld [vmem:[#allocation5 + $0x110] sm:$0xf0] }
  0xc6   :  { %2035 = vmatpush.bf16.msrb.mxu1 %v6330_v44  ;;  %2016 = vmatmul.bf16.vlgmr.msrb.gmra.mxu2 %v9611_v61  ;;  %v6567_v44 = vld [vmem:[#allocation5 + $0x56c] sm:$0xf0]  ;;  %v9654_v1 = vpop.f32.mrf.mxu3  ;;  %v6493_v54 = vld [vmem:[#allocation5 + $0x4c0] sm:$0xf] }
  0xc7   :  { %2060 = vmatpush.bf16.msra.mxu2 %v6670_v41  ;;  %v1758_v41 = vadd.f32 %v1757_v37, %v1745_v25  ;;  %v6353_v25 = vld [vmem:[#allocation5 + $0x3a8] sm:$0xf] }
  0xc8   :  { %2048 = vmatpush.bf16.msrb.mxu3 %v6490_v48  ;;  %2029 = vmatmul.bf16.vlgmr.msra.gmra.mxu0 %v9615_v6  ;;  %v8706_v48 = vld [vmem:[#allocation5 + $0x2b4] sm:$0xf] }
  0xc9   :  { %2073 = vmatpush.bf16.msrb.mxu0 %v6830_v52  ;;  %v6387_v52 = vld [vmem:[#allocation5 + $0x404] sm:$0xf0]  ;;  %v9652_v55 = vadd.f32 %v1770_v47, %v1758_v41 }
  0xca   :  { %2036 = vmatpush.bf16.msrb.mxu1 %v6310_v59  ;;  %v6230_v59 = vor.u32 %v8706_v48, %v6227_v49  ;;  %v6390_v2 = vor.u32 %v8746_v51, %v6387_v52  ;;  %v5993_v49 = vld [vmem:[#allocation5 + $0xd8] sm:$0xf] }
  0xcb   :  { %2061 = vmatpush.bf16.msra.mxu2 %v6650_v56  ;;  %v6570_v56 = vor.u32 %v8791_v43, %v6567_v44  ;;  %v6333_v43 = vld [vmem:[#allocation5 + $0x380] sm:$0xf]  ;;  %v8734_v44 = vld [vmem:[#allocation5 + $0x390] sm:$0xf0] }
  0xcc   :  { %2049 = vmatpush.bf16.msrb.mxu3 %v6470_v0  ;;  %v8701_v0 = vld [vmem:[#allocation5 + $0x28c] sm:$0xf]  ;;  %v6334_v52 = vor.u32 %v8734_v44, %v6333_v43  ;;  %v8714_v43 = vld [vmem:[#allocation5 + $0x2f0] sm:$0xf0] }
  0xcd   :  { %2074 = vmatpush.bf16.msrb.mxu0 %v6810_v3  ;;  %v6207_v3 = vld [vmem:[#allocation5 + $0x29c] sm:$0xf0]  ;;  %v1772_v23 = vpop.f32.mrf.mxu2 }
  0xce   :  { %2037 = vmatpush.bf16.msrb.mxu1 %v6290_v12  ;;  %v1759_v12 = vpop.f32.mrf.mxu1  ;;  %v6210_v17 = vor.u32 %v8701_v0, %v6207_v3  ;;  %v1785_v41 = vpop.f32.mrf.mxu3  ;;  %v5973_v3 = vld [vmem:[#allocation5 + $0xb0] sm:$0xf] }
  0xcf   :  { %2062 = vmatpush.bf16.msra.mxu2 %v6630_v8  ;;  %v6730_v8 = vor.u32 %v8831_v57, %v6727_v58  ;;  %v6153_v57 = vld [vmem:[#allocation5 + $0x218] sm:$0xf]  ;;  %v8689_v58 = vld [vmem:[#allocation5 + $0x228] sm:$0xf0]  ;;  %v8684_v12 = vld [vmem:[#allocation5 + $0x200] sm:$0xf0] }
  0xd0   :  { %2050 = vmatpush.bf16.msrb.mxu3 %v6450_v15  ;;  %v8826_v15 = vld [vmem:[#allocation5 + $0x674] sm:$0xf]  ;;  %v6154_v5 = vor.u32 %v8689_v58, %v6153_v57  ;;  %v6453_v23 = vld [vmem:[#allocation5 + $0x470] sm:$0xf]  ;;  %v6073_v57 = vld [vmem:[#allocation5 + $0x178] sm:$0xf] }
  0xd1   :  { %2075 = vmatpush.bf16.msrb.mxu0 %v6790_v18  ;;  %v8781_v18 = vld [vmem:[#allocation5 + $0x50c] sm:$0xf]  ;;  %v6710_v28 = vor.u32 %v8826_v15, %v6707_v16  ;;  %v5974_v15 = vor.u32 %v8644_v4, %v5973_v3  ;;  %v8674_v41 = vld [vmem:[#allocation5 + $0x1b0] sm:$0xf0]  ;;  %v5893_v4 = vld [vmem:[#allocation5 + $0x10] sm:$0xf] }
  0xd2   :  { %2038 = vmatpush.bf16.msrb.mxu1 %v6270_v26  ;;  %v8739_v26 = vld [vmem:[#allocation5 + $0x3b8] sm:$0xf0]  ;;  %v6530_v31 = vor.u32 %v8781_v18, %v6527_v19  ;;  %v5953_v18 = vld [vmem:[#allocation5 + $0x88] sm:$0xf] }
  0xd3   :  { %2063 = vmatpush.bf16.msra.mxu2 %v6610_v22  ;;  %v6850_v22 = vor.u32 %v8861_v10, %v6847_v11  ;;  %v6354_v37 = vor.u32 %v8739_v26, %v6353_v25  ;;  %v8769_v10 = vld [vmem:[#allocation5 + $0x4a8] sm:$0xf0]  ;;  %v6133_v11 = vld [vmem:[#allocation5 + $0x1f0] sm:$0xf]  ;;  %v8639_v19 = vld [vmem:[#allocation5 + $0x98] sm:$0xf0] }
  0xd4   :  { %2051 = vmatpush.bf16.msrb.mxu3 %v6430_v29  ;;  %v6013_v29 = vld [vmem:[#allocation5 + $0x100] sm:$0xf]  ;;  %v6113_v25 = vld [vmem:[#allocation5 + $0x1c8] sm:$0xf]  ;;  %v8679_v26 = vld [vmem:[#allocation5 + $0x1d8] sm:$0xf0] }
  0xd5   :  { %2076 = vmatpush.bf16.msrb.mxu0 %v6770_v33  ;;  %v8821_v33 = vld [vmem:[#allocation5 + $0x64c] sm:$0xf]  ;;  %v9658_v62 = vpop.f32.mrf.mxu2 }
  0xd6   :  { %2039 = vmatpush.bf16.msrb.mxu1 %v6250_v42  ;;  %v8694_v42 = vld [vmem:[#allocation5 + $0x250] sm:$0xf0]  ;;  %v6690_v47 = vor.u32 %v8821_v33, %v6687_v34  ;;  %v5933_v33 = vld [vmem:[#allocation5 + $0x60] sm:$0xf] }
  0xd7   :  { %2064 = vmatpush.bf16.msra.mxu2 %v6590_v38  ;;  %v6513_v38 = vld [vmem:[#allocation5 + $0x4e8] sm:$0xf]  ;;  %v6174_v51 = vor.u32 %v8694_v42, %v6173_v40  ;;  %v8634_v34 = vld [vmem:[#allocation5 + $0x70] sm:$0xf0]  ;;  %v6093_v40 = vld [vmem:[#allocation5 + $0x1a0] sm:$0xf] }
  0xd8   :  { %2052 = vmatpush.bf16.msrb.mxu3 %v6410_v46  ;;  %v6014_v46 = vor.u32 %v8654_v32, %v6013_v29  ;;  %v6514_v48 = vor.u32 %v8779_v39, %v6513_v38  ;;  %v6454_v32 = vor.u32 %v8764_v24, %v6453_v23  ;;  %v6433_v38 = vld [vmem:[#allocation5 + $0x448] sm:$0xf]  ;;  %v8759_v39 = vld [vmem:[#allocation5 + $0x458] sm:$0xf0]  ;;  %v6253_v42 = vld [vmem:[#allocation5 + $0x2e0] sm:$0xf]  ;;  %v5934_v44 = vor.u32 %v8634_v34, %v5933_v33 }
  0xd9   :  { %2077 = vmatpush.bf16.msrb.mxu0 %v6750_v50  ;;  %v8649_v50 = vld [vmem:[#allocation5 + $0xe8] sm:$0xf0]  ;;  %v8859_v23 = vld [vmem:[#allocation5 + $0x778] sm:$0xf0]  ;;  %v6853_v24 = vld [vmem:[#allocation5 + $0x790] sm:$0xf] }
  0xda   :  { %2040 = vmatpush.bf16.msrb.mxu1 %v6230_v59  ;;  %v6313_v59 = vld [vmem:[#allocation5 + $0x358] sm:$0xf]  ;;  %v5994_v0 = vor.u32 %v8649_v50, %v5993_v49  ;;  %v6373_v34 = vld [vmem:[#allocation5 + $0x3d0] sm:$0xf] }
  0xdb   :  { %2065 = vmatpush.bf16.msra.mxu2 %v6570_v56  ;;  %v8774_v56 = vld [vmem:[#allocation5 + $0x4d0] sm:$0xf0] }
  0xdc   :  { %2053 = vmatpush.bf16.msrb.mxu3 %v6390_v2  ;;  %v6494_v2 = vor.u32 %v8774_v56, %v6493_v54  ;;  %v6413_v54 = vld [vmem:[#allocation5 + $0x420] sm:$0xf]  ;;  %v8754_v56 = vld [vmem:[#allocation5 + $0x430] sm:$0xf0] }
  0xdd   :  { %2078 = vmatpush.bf16.msrb.mxu0 %v6730_v8  ;;  %v6314_v8 = vor.u32 %v8729_v60, %v6313_v59  ;;  %v9662_v16 = vpop.f32.mrf.mxu0  ;;  %v1824_v29 = vpop.f32.mrf.mxu2  ;;  %v8669_v59 = vld [vmem:[#allocation5 + $0x188] sm:$0xf0]  ;;  %v6233_v60 = vld [vmem:[#allocation5 + $0x2b8] sm:$0xf] }
  0xde   :  { %2041 = vmatpush.bf16.msrb.mxu1 %v6210_v17  ;;  %v6474_v17 = vor.u32 %v8769_v10, %v6473_v9  ;;  %v9664_v20 = vpop.f32.mrf.mxu1  ;;  %v6673_v9 = vld [vmem:[#allocation5 + $0x628] sm:$0xf]  ;;  %v8819_v10 = vld [vmem:[#allocation5 + $0x638] sm:$0xf0]  ;;  %v8814_v29 = vld [vmem:[#allocation5 + $0x610] sm:$0xf0] }
  0xdf   :  { %2066 = vmatpush.bf16.msra.mxu2 %v6550_v13  ;;  %v6293_v13 = vld [vmem:[#allocation5 + $0x330] sm:$0xf] }
  0xe0   :  { %2054 = vmatpush.bf16.msrb.mxu3 %v6370_v21  ;;  %v6134_v21 = vor.u32 %v8684_v12, %v6133_v11  ;;  %v6393_v11 = vld [vmem:[#allocation5 + $0x3f8] sm:$0xf]  ;;  %v6074_v12 = vor.u32 %v8669_v59, %v6073_v57  ;;  %v7142_v59 = vld [vmem:[#allocation8 + $0x230] sm:$0xf] }
  0xe1   :  { %2079 = vmatpush.bf16.msrb.mxu0 %v6710_v28  ;;  %2042 = vmatmul.bf16.vlgmr.msrb.gmra.mxu1 %v9609_v53  ;;  %v8719_v28 = vld [vmem:[#allocation5 + $0x318] sm:$0xf0] }
  0xe2   :  { %2093 = vmatpush.bf16.msra.mxu1 %v6850_v22  ;;  %v6294_v22 = vor.u32 %v8724_v14, %v6293_v13  ;;  %v8749_v14 = vld [vmem:[#allocation5 + $0x408] sm:$0xf0] }
  0xe3   :  { %2067 = vmatpush.bf16.msra.mxu2 %v6530_v31  ;;  %2055 = vmatmul.bf16.vlgmr.msrb.gmra.mxu3 %v9617_v7  ;;  %v5954_v31 = vor.u32 %v8639_v19, %v5953_v18  ;;  %v6213_v18 = vld [vmem:[#allocation5 + $0x290] sm:$0xf]  ;;  %v8704_v19 = vld [vmem:[#allocation5 + $0x2a0] sm:$0xf0] }
  0xe4   :  { %2099 = vmatpush.bf16.msra.mxu3 %v6034_v27  ;;  %v6273_v27 = vld [vmem:[#allocation5 + $0x308] sm:$0xf]  ;;  %v6214_v33 = vor.u32 %v8704_v19, %v6213_v18  ;;  %v6773_v18 = vld [vmem:[#allocation5 + $0x6f0] sm:$0xf] }
  0xe5   :  { %2080 = vmatpush.bf16.msrb.mxu0 %v6690_v47  ;;  %v5913_v47 = vld [vmem:[#allocation5 + $0x38] sm:$0xf]  ;;  %v1798_v49 = vpop.f32.mrf.mxu0 }
  0xe6   :  { %2112 = vmatpush.bf16.msrb.mxu1 %v6194_v36  ;;  %2068 = vmatmul.bf16.vlgmr.msra.gmra.mxu2 %v9625_v30  ;;  %v6114_v36 = vor.u32 %v8679_v26, %v6113_v25  ;;  %v9668_v50 = vpop.f32.mrf.mxu3  ;;  %v1811_v58 = vpop.f32.mrf.mxu1  ;;  %v8864_v25 = vld [vmem:[#allocation5 + $0x7a0] sm:$0xf0]  ;;  %v6674_v26 = vor.u32 %v8819_v10, %v6673_v9  ;;  %v6613_v10 = vld [vmem:[#allocation5 + $0x5b0] sm:$0xf] }
  0xe7   :  { %2125 = vmatpush.bf16.msrb.mxu2 %v6354_v37  ;;  %v6274_v37 = vor.u32 %v8719_v28, %v6273_v27  ;;  %v6394_v27 = vor.u32 %v8749_v14, %v6393_v11  ;;  %v6653_v28 = vld [vmem:[#allocation5 + $0x600] sm:$0xf]  ;;  %v8804_v11 = vld [vmem:[#allocation5 + $0x5c0] sm:$0xf0]  ;;  %v6962_v14 = vld [vmem:[#allocation8 + $0xc8] sm:$0xf] }
  0xe8   :  { %2100 = vmatpush.bf16.msra.mxu3 %v6014_v46  ;;  %2081 = vmatmul.bf16.vlgmr.msrb.gmra.mxu0 %v9627_v35  ;;  %v6434_v46 = vor.u32 %v8759_v39, %v6433_v38  ;;  %v6854_v39 = vor.u32 %v8864_v25, %v6853_v24  ;;  %v6982_v58 = vld [vmem:[#allocation8 + $0xf0] sm:$0xf]  ;;  %v6614_v19 = vor.u32 %v8804_v11, %v6613_v10  ;;  %v6713_v10 = vld [vmem:[#allocation5 + $0x678] sm:$0xf]  ;;  %v6533_v11 = vld [vmem:[#allocation5 + $0x510] sm:$0xf] }
  0xe9   :  { %2138 = vmatpush.bf16.msra.mxu0 %v6514_v48  ;;  %v8629_v48 = vld [vmem:[#allocation5 + $0x48] sm:$0xf0] }
  0xea   :  { %2113 = vmatpush.bf16.msrb.mxu1 %v6174_v51  ;;  %v6094_v51 = vor.u32 %v8674_v41, %v6093_v40  ;;  %v5914_v3 = vor.u32 %v8629_v48, %v5913_v47  ;;  %v8902_v40 = vld [vmem:[#allocation8 + $0x128] sm:$0xf0]  ;;  %v7162_v41 = vld [vmem:[#allocation8 + $0x258] sm:$0xf]  ;;  %v8854_v47 = vld [vmem:[#allocation5 + $0x750] sm:$0xf0]  ;;  %v6654_v48 = vor.u32 %v8814_v29, %v6653_v28 }
  0xeb   :  { %2126 = vmatpush.bf16.msrb.mxu2 %v6334_v52  ;;  %v6254_v52 = vor.u32 %v8714_v43, %v6253_v42  ;;  %v8942_v42 = vld [vmem:[#allocation8 + $0x268] sm:$0xf0]  ;;  %v8927_v28 = vld [vmem:[#allocation8 + $0x1f0] sm:$0xf0] }
  0xec   :  { %2101 = vmatpush.bf16.msra.mxu3 %v5994_v0  ;;  %v8709_v0 = vld [vmem:[#allocation5 + $0x2c8] sm:$0xf0] }
  0xed   :  { %2139 = vmatpush.bf16.msra.mxu0 %v6494_v2  ;;  %v9670_v2 = vpop.f32.mrf.mxu2  ;;  %v6234_v13 = vor.u32 %v8709_v0, %v6233_v60  ;;  %v8937_v60 = vld [vmem:[#allocation8 + $0x240] sm:$0xf0] }
  0xee   :  { %2114 = vmatpush.bf16.msrb.mxu1 %v6154_v5  ;;  %v8624_v5 = vld [vmem:[#allocation5 + $0x20] sm:$0xf0]  ;;  %v7143_v9 = vor.u32 %v8937_v60, %v7142_v59  ;;  %v6902_v60 = vld [vmem:[#allocation8 + $0x50] sm:$0xf] }
  0xef   :  { %2127 = vmatpush.bf16.msrb.mxu2 %v6314_v8  ;;  %v6414_v8 = vor.u32 %v8754_v56, %v6413_v54  ;;  %v8809_v54 = vld [vmem:[#allocation5 + $0x5e8] sm:$0xf0] }
  0xf0   :  { %2102 = vmatpush.bf16.msra.mxu3 %v5974_v15  ;;  %v6053_v15 = vld [vmem:[#allocation5 + $0x150] sm:$0xf] }
  0xf1   :  { %2140 = vmatpush.bf16.msra.mxu0 %v6474_v17  ;;  %6858 = vmatmul.msk.bf16.vlgmr.msra.gmra.mxu1 %vm1731_vm0, %v9621_v45  ;;  %v8664_v17 = vld [vmem:[#allocation5 + $0x160] sm:$0xf0] }
  0xf2   :  { %2115 = vmatpush.bf16.msrb.mxu1 %v6134_v21  ;;  %v6833_v21 = vld [vmem:[#allocation5 + $0x768] sm:$0xf] }
  0xf3   :  { %2128 = vmatpush.bf16.msrb.mxu2 %v6294_v22  ;;  %v5894_v22 = vor.u32 %v8624_v5, %v5893_v4  ;;  %v6834_v38 = vor.u32 %v8859_v23, %v6833_v21  ;;  %v6793_v4 = vld [vmem:[#allocation5 + $0x718] sm:$0xf]  ;;  %v8849_v5 = vld [vmem:[#allocation5 + $0x728] sm:$0xf0]  ;;  %v8799_v23 = vld [vmem:[#allocation5 + $0x598] sm:$0xf0] }
  0xf4   :  { %2103 = vmatpush.bf16.msra.mxu3 %v5954_v31  ;;  %v1837_v31 = vpop.f32.mrf.mxu3 }
  0xf5   :  { %2141 = vmatpush.bf16.msra.mxu0 %v6454_v32  ;;  %v6054_v32 = vor.u32 %v8664_v17, %v6053_v15  ;;  %v1850_v43 = vpop.f32.mrf.mxu2  ;;  %v8932_v15 = vld [vmem:[#allocation8 + $0x218] sm:$0xf0] }
  0xf6   :  { %2116 = vmatpush.bf16.msrb.mxu1 %v6114_v36  ;;  %v8744_v36 = vld [vmem:[#allocation5 + $0x3e0] sm:$0xf0]  ;;  %v8892_v17 = vld [vmem:[#allocation8 + $0xd8] sm:$0xf0] }
  0xf7   :  { %2129 = vmatpush.bf16.msrb.mxu2 %v6274_v37  ;;  %v7002_v37 = vld [vmem:[#allocation8 + $0x118] sm:$0xf]  ;;  %v6374_v49 = vor.u32 %v8744_v36, %v6373_v34  ;;  %v6963_v25 = vor.u32 %v8892_v17, %v6962_v14  ;;  %v6573_v34 = vld [vmem:[#allocation5 + $0x560] sm:$0xf]  ;;  %v8794_v36 = vld [vmem:[#allocation5 + $0x570] sm:$0xf0] }
  0xf8   :  { %2104 = vmatpush.bf16.msra.mxu3 %v5934_v44  ;;  %v448_v44 = vperm.slane %v9647_v63, 1  ;;  %v7003_v56 = vor.u32 %v8902_v40, %v7002_v37  ;;  %v6753_v31 = vld [vmem:[#allocation5 + $0x6c8] sm:$0xf]  ;;  %v7042_v17 = vld [vmem:[#allocation8 + $0x168] sm:$0xf] }
  0xf9   :  { %2142 = vmatpush.bf16.msra.mxu0 %v6434_v46  ;;  %v6813_v46 = vld [vmem:[#allocation5 + $0x740] sm:$0xf]  ;;  %v6922_v40 = vld [vmem:[#allocation8 + $0x78] sm:$0xf] }
  0xfa   :  { %2117 = vmatpush.bf16.msrb.mxu1 %v6094_v51  ;;  %v7163_v51 = vor.u32 %v8942_v42, %v7162_v41  ;;  %v6814_v57 = vor.u32 %v8854_v47, %v6813_v46  ;;  %v1836_v0 = vadd.f32 %v9668_v50, %v448_v44  ;;  %v7122_v50 = vld [vmem:[#allocation8 + $0x208] sm:$0xf]  ;;  %v7082_v41 = vld [vmem:[#allocation8 + $0x1b8] sm:$0xf]  ;;  %v8922_v42 = vld [vmem:[#allocation8 + $0x1c8] sm:$0xf0] }
  0xfb   :  { %2130 = vmatpush.bf16.msrb.mxu2 %v6254_v52  ;;  %v6633_v52 = vld [vmem:[#allocation5 + $0x5d8] sm:$0xf]  ;;  %v7123_v21 = vor.u32 %v8932_v15, %v7122_v50  ;;  %v6733_v46 = vld [vmem:[#allocation5 + $0x6a0] sm:$0xf]  ;;  %v8834_v47 = vld [vmem:[#allocation5 + $0x6b0] sm:$0xf0] }
  0xfc   :  { %2105 = vmatpush.bf16.msra.mxu3 %v5914_v3  ;;  %v8897_v3 = vld [vmem:[#allocation8 + $0x100] sm:$0xf0]  ;;  %v8882_v44 = vld [vmem:[#allocation8 + $0x88] sm:$0xf0]  ;;  %v6734_v59 = vor.u32 %v8834_v47, %v6733_v46  ;;  %v7322_v14 = vld [vmem:[#allocation8 + $0x398] sm:$0xf] }
  0xfd   :  { %2143 = vmatpush.bf16.msra.mxu0 %v6414_v8  ;;  %v6634_v8 = vor.u32 %v8809_v54, %v6633_v52  ;;  %v1861_v24 = vpop.f32.mrf.mxu0  ;;  %v6553_v52 = vld [vmem:[#allocation5 + $0x538] sm:$0xf]  ;;  %v8789_v54 = vld [vmem:[#allocation5 + $0x548] sm:$0xf0] }
  0xfe   :  { %2118 = vmatpush.bf16.msrb.mxu1 %v6074_v12  ;;  %v6983_v12 = vor.u32 %v8897_v3, %v6982_v58  ;;  %v8917_v3 = vld [vmem:[#allocation8 + $0x1a0] sm:$0xf0]  ;;  %v8982_v50 = vld [vmem:[#allocation8 + $0x3a8] sm:$0xf0] }
  0xff   :  { %2131 = vmatpush.bf16.msrb.mxu2 %v6234_v13  ;;  %v6794_v13 = vor.u32 %v8849_v5, %v6793_v4 }
 0x100   :  { %2106 = vmatpush.bf16.msra.mxu3 %v5894_v22  ;;  %v6593_v22 = vld [vmem:[#allocation5 + $0x588] sm:$0xf] }
 0x101   :  { %2144 = vmatpush.bf16.msra.mxu0 %v6394_v27  ;;  %v6942_v27 = vld [vmem:[#allocation8 + $0xa0] sm:$0xf] }
 0x102   :  { %2119 = vmatpush.bf16.msrb.mxu1 %v6054_v32  ;;  %v8839_v32 = vld [vmem:[#allocation5 + $0x6d8] sm:$0xf0] }
 0x103   :  { %2132 = vmatpush.bf16.msrb.mxu2 %v6214_v33  ;;  %2107 = vmatmul.bf16.vlgmr.msra.gmra.mxu3 %v9611_v61  ;;  %v1849_v61 = vadd.f32 %v9670_v2, %v1836_v0  ;;  %v7102_v2 = vld [vmem:[#allocation8 + $0x1e0] sm:$0xf]  ;;  %v6594_v33 = vor.u32 %v8799_v23, %v6593_v22  ;;  %v7062_v0 = vld [vmem:[#allocation8 + $0x190] sm:$0xf]  ;;  %v8872_v22 = vld [vmem:[#allocation8 + $0x38] sm:$0xf0] }
 0x104   :  { %2151 = vmatpush.bf16.msrb.mxu3 %v6674_v26  ;;  %v8824_v23 = vld [vmem:[#allocation5 + $0x660] sm:$0xf0] }
 0x105   :  { %2145 = vmatpush.bf16.msra.mxu0 %v6374_v49  ;;  %2120 = vmatmul.bf16.vlgmr.msrb.gmra.mxu1 %v9615_v6  ;;  %v1862_v29 = vadd.f32 %v1861_v24, %v1849_v61  ;;  %v8887_v6 = vld [vmem:[#allocation8 + $0xb0] sm:$0xf0]  ;;  %v1784_v49 = vadd.f32 %v9654_v1, %v9652_v55  ;;  %v8829_v55 = vld [vmem:[#allocation5 + $0x688] sm:$0xf0]  ;;  %v6554_v1 = vor.u32 %v8789_v54, %v6553_v52  ;;  %v6882_v61 = vld [vmem:[#allocation8 + $0x28] sm:$0xf] }
 0x106   :  { %2164 = vmatpush.bf16.msra.mxu1 %v6834_v38  ;;  %2133 = vmatmul.bf16.vlgmr.msrb.gmra.mxu2 %v9609_v53  ;;  %v8844_v53 = vld [vmem:[#allocation5 + $0x700] sm:$0xf0]  ;;  %v6943_v37 = vor.u32 %v8887_v6, %v6942_v27  ;;  %v6754_v38 = vor.u32 %v8839_v32, %v6753_v31  ;;  %v1887_v58 = vpop.f32.mrf.mxu3  ;;  %v8977_v6 = vld [vmem:[#allocation8 + $0x380] sm:$0xf0]  ;;  %v6862_v31 = vld [vmem:[#allocation8] sm:$0xf] }
 0x107   :  { %2184 = vmatpush.bf16.msra.mxu2 %v6854_v39  ;;  %v6774_v26 = vor.u32 %v8844_v53, %v6773_v18  ;;  %v1874_v39 = vpop.f32.mrf.mxu1  ;;  %v1797_v4 = vadd.f32 %v9662_v16, %v1784_v49  ;;  %v6714_v16 = vor.u32 %v8829_v55, %v6713_v10  ;;  %v8912_v18 = vld [vmem:[#allocation8 + $0x178] sm:$0xf0]  ;;  %v7282_v49 = vld [vmem:[#allocation8 + $0x348] sm:$0xf]  ;;  %v8895_v52 = vld [vmem:[#allocation8 + $0xf4] sm:$0xf] }
 0x108   :  { %2152 = vmatpush.bf16.msrb.mxu3 %v6654_v48  ;;  %2146 = vmatmul.bf16.vlgmr.msra.gmra.mxu0 %v9617_v7  ;;  %v7103_v7 = vor.u32 %v8927_v28, %v7102_v2  ;;  %v1875_v43 = vadd.f32 %v1874_v39, %v1862_v29  ;;  %v6574_v48 = vor.u32 %v8794_v36, %v6573_v34  ;;  %v7302_v29 = vld [vmem:[#allocation8 + $0x370] sm:$0xf]  ;;  %v7022_v34 = vld [vmem:[#allocation8 + $0x140] sm:$0xf]  ;;  %v8907_v36 = vld [vmem:[#allocation8 + $0x150] sm:$0xf0] }
 0x109   :  { %3492 = vmatpush.bf16.msrb.mxu0 %v7003_v56  ;;  %v1863_v56 = vpop.f32.mrf.mxu0  ;;  %v6883_v2 = vor.u32 %v8872_v22, %v6882_v61  ;;  %v7004_v39 = vld [vmem:[#allocation8 + $0x12c] sm:$0xf0]  ;;  %v6984_v54 = vld [vmem:[#allocation8 + $0x104] sm:$0xf0]  ;;  %v9012_v10 = vld [vmem:[#allocation8 + $0x498] sm:$0xf0] }
 0x10a   :  { %2165 = vmatpush.bf16.msra.mxu1 %v6814_v57  ;;  %v6923_v57 = vor.u32 %v8882_v44, %v6922_v40  ;;  %v1888_v5 = vadd.f32 %v1887_v58, %v1875_v43  ;;  %v7303_v40 = vor.u32 %v8977_v6, %v7302_v29  ;;  %v7023_v44 = vor.u32 %v8907_v36, %v7022_v34  ;;  %v7462_v56 = vld [vmem:[#allocation8 + $0x4b0] sm:$0xf]  ;;  %v8952_v29 = vld [vmem:[#allocation8 + $0x2b8] sm:$0xf0] }
 0x10b   :  { %3505 = vmatpush.bf16.msrb.mxu2 %v7163_v51  ;;  %v7083_v51 = vor.u32 %v8922_v42, %v7082_v41  ;;  %v7482_v41 = vld [vmem:[#allocation8 + $0x4d8] sm:$0xf]  ;;  %v9022_v42 = vld [vmem:[#allocation8 + $0x4e8] sm:$0xf0]  ;;  %v449_v34 = vperm.slane %v9647_v63, 2 }
 0x10c   :  { %2153 = vmatpush.bf16.msrb.mxu3 %v6634_v8  ;;  %v1900_v8 = vpop.f32.mrf.mxu2  ;;  %v7483_v46 = vor.u32 %v9022_v42, %v7482_v41  ;;  %v8940_v41 = vld [vmem:[#allocation8 + $0x25c] sm:$0xf] }
 0x10d   :  { %3493 = vmatpush.bf16.msrb.mxu0 %v6983_v12  ;;  %v7063_v12 = vor.u32 %v8917_v3, %v7062_v0 }
 0x10e   :  { %2166 = vmatpush.bf16.msra.mxu1 %v6794_v13  ;;  %v8784_v13 = vld [vmem:[#allocation5 + $0x520] sm:$0xf0]  ;;  %v1889_v32 = vpop.f32.mrf.mxu3 }
 0x10f   :  { %3506 = vmatpush.bf16.msrb.mxu2 %v7143_v9  ;;  %v8877_v9 = vld [vmem:[#allocation8 + $0x60] sm:$0xf0]  ;;  %v1876_v53 = vpop.f32.mrf.mxu1  ;;  %v6534_v24 = vor.u32 %v8784_v13, %v6533_v11  ;;  %v8962_v13 = vld [vmem:[#allocation8 + $0x308] sm:$0xf0]  ;;  %v6904_v32 = vld [vmem:[#allocation8 + $0x64] sm:$0xf0] }
 0x110   :  { %2154 = vmatpush.bf16.msrb.mxu3 %v6614_v19  ;;  %v6903_v15 = vor.u32 %v8877_v9, %v6902_v60  ;;  %v1810_v19 = vadd.f32 %v9664_v20, %v1797_v4  ;;  %v7262_v4 = vld [vmem:[#allocation8 + $0x320] sm:$0xf] }
 0x111   :  { %3494 = vmatpush.bf16.msrb.mxu0 %v6963_v25  ;;  %v7323_v25 = vor.u32 %v8982_v50, %v7322_v14  ;;  %v1913_v27 = vpop.f32.mrf.mxu0  ;;  %v6964_v9 = vld [vmem:[#allocation8 + $0xdc] sm:$0xf0]  ;;  %v8885_v14 = vld [vmem:[#allocation8 + $0xa4] sm:$0xf]  ;;  %v6944_v50 = vld [vmem:[#allocation8 + $0xb4] sm:$0xf0] }
 0x112   :  { %2167 = vmatpush.bf16.msra.mxu1 %v6774_v26  ;;  %v7043_v26 = vor.u32 %v8912_v18, %v7042_v17  ;;  %v1823_v20 = vadd.f32 %v9658_v62, %v1810_v19  ;;  %v6947_v53 = vor.u32 %v8885_v14, %v6944_v50  ;;  %v7222_v19 = vld [vmem:[#allocation8 + $0x2d0] sm:$0xf]  ;;  %v7124_v14 = vld [vmem:[#allocation8 + $0x21c] sm:$0xf0]  ;;  %v8975_v50 = vld [vmem:[#allocation8 + $0x374] sm:$0xf] }
 0x113   :  { %3507 = vmatpush.bf16.msrb.mxu2 %v7123_v21  ;;  %v1901_v21 = vadd.f32 %v1900_v8, %v1888_v5  ;;  %v8967_v5 = vld [vmem:[#allocation8 + $0x330] sm:$0xf0]  ;;  %v8890_v8 = vld [vmem:[#allocation8 + $0xcc] sm:$0xf] }
 0x114   :  { %2155 = vmatpush.bf16.msrb.mxu3 %v6594_v33  ;;  %v2190_v47 = vmax.f32 %v1823_v20, 0.0  ;;  %v7263_v55 = vor.u32 %v8967_v5, %v7262_v4  ;;  %v6967_v11 = vor.u32 %v8890_v8, %v6964_v9  ;;  %v7382_v20 = vld [vmem:[#allocation8 + $0x410] sm:$0xf]  ;;  %v8987_v4 = vld [vmem:[#allocation8 + $0x3d0] sm:$0xf0] }
 0x115   :  { %3495 = vmatpush.bf16.msrb.mxu0 %v6943_v37  ;;  %v1914_v33 = vadd.f32 %v1913_v27, %v1901_v21  ;;  %v1902_v37 = vpop.f32.mrf.mxu2  ;;  %v8957_v21 = vld [vmem:[#allocation8 + $0x2e0] sm:$0xf0]  ;;  %v8980_v9 = vld [vmem:[#allocation8 + $0x39c] sm:$0xf] }
 0x116   :  { %2168 = vmatpush.bf16.msra.mxu1 %v6754_v38  ;;  %6859 = vmatmul.msk.bf16.vlgmr.msra.gmra.mxu2 %vm1731_vm0, %v9621_v45  ;;  %v6693_v45 = vld [vmem:[#allocation5 + $0x650] sm:$0xf]  ;;  %v8900_v38 = vld [vmem:[#allocation8 + $0x11c] sm:$0xf]  ;;  %v9688_v0 = vpack.c.bf16 %v2190_v47, %v2190_v47 }
 0x117   :  { %3508 = vmatpush.bf16.msrb.mxu2 %v7103_v7  ;;  %v6694_v28 = vor.u32 %v8824_v23, %v6693_v45  ;;  %v8867_v7 = vld [vmem:[#allocation8 + $0x10] sm:$0xf0]  ;;  %v2191_v62 = vmax.f32 %v1914_v33, 0.0  ;;  %v8880_v45 = vld [vmem:[#allocation8 + $0x7c] sm:$0xf] }
 0x118   :  { %2156 = vmatpush.bf16.msrb.mxu3 %v6574_v48  ;;  %v6863_v43 = vor.u32 %v8867_v7, %v6862_v31  ;;  %v7007_v48 = vor.u32 %v8900_v38, %v7004_v39  ;;  %v6924_v23 = vld [vmem:[#allocation8 + $0x8c] sm:$0xf0]  ;;  %v8875_v31 = vld [vmem:[#allocation8 + $0x54] sm:$0xf]  ;;  %v8997_v33 = vld [vmem:[#allocation8 + $0x420] sm:$0xf0] }
 0x119   :  { %3496 = vmatpush.bf16.msrb.mxu0 %v6923_v57  ;;  %v9017_v57 = vld [vmem:[#allocation8 + $0x4c0] sm:$0xf0]  ;;  %v9690_v3 = vpack.c.bf16 %v2191_v62, %v2191_v62  ;;  %v7383_v37 = vor.u32 %v8997_v33, %v7382_v20  ;;  %v6907_v38 = vor.u32 %v8875_v31, %v6904_v32  ;;  %v7182_v39 = vld [vmem:[#allocation8 + $0x280] sm:$0xf]  ;;  %v7362_v62 = vld [vmem:[#allocation8 + $0x3e8] sm:$0xf] }
 0x11a   :  { %2169 = vmatpush.bf16.msra.mxu1 %v6734_v59  ;;  %v1915_v59 = vpop.f32.mrf.mxu0  ;;  %v7463_v60 = vor.u32 %v9017_v57, %v7462_v56  ;;  %v6884_v47 = vld [vmem:[#allocation8 + $0x3c] sm:$0xf0]  ;;  %v7144_v56 = vld [vmem:[#allocation8 + $0x244] sm:$0xf0]  ;;  %v8865_v57 = vld [vmem:[#allocation8 + $0x4] sm:$0xf] }
 0x11b   :  { %3509 = vmatpush.bf16.msrb.mxu2 %v7083_v51  ;;  %v8972_v51 = vld [vmem:[#allocation8 + $0x358] sm:$0xf0]  ;;  %v8915_v32 = vld [vmem:[#allocation8 + $0x194] sm:$0xf]  ;;  %v7064_v20 = vld [vmem:[#allocation8 + $0x1a4] sm:$0xf0] }
 0x11c   :  { %2157 = vmatpush.bf16.msrb.mxu3 %v6554_v1  ;;  %v7283_v58 = vor.u32 %v8972_v51, %v7282_v49 }
 0x11d   :  { %3497 = vmatpush.bf16.msrb.mxu0 %v6903_v15  ;;  %v7422_v15 = vld [vmem:[#allocation8 + $0x460] sm:$0xf] }
 0x11e   :  { %2170 = vmatpush.bf16.msra.mxu1 %v6714_v16  ;;  %v9007_v16 = vld [vmem:[#allocation8 + $0x470] sm:$0xf0]  ;;  %v1926_v22 = vpop.f32.mrf.mxu1 }
 0x11f   :  { %3510 = vmatpush.bf16.msrb.mxu2 %v7063_v12  ;;  %v7242_v12 = vld [vmem:[#allocation8 + $0x2f8] sm:$0xf]  ;;  %v7423_v18 = vor.u32 %v9007_v16, %v7422_v15  ;;  %v1927_v59 = vadd.f32 %v1926_v22, %v449_v34  ;;  %v7304_v15 = vld [vmem:[#allocation8 + $0x384] sm:$0xf0]  ;;  %v8970_v22 = vld [vmem:[#allocation8 + $0x34c] sm:$0xf] }
 0x120   :  { %2158 = vmatpush.bf16.msrb.mxu3 %v6534_v24  ;;  %v7243_v61 = vor.u32 %v8962_v13, %v7242_v12  ;;  %v7402_v24 = vld [vmem:[#allocation8 + $0x438] sm:$0xf]  ;;  %v8930_v13 = vld [vmem:[#allocation8 + $0x20c] sm:$0xf]  ;;  %v7244_v34 = vld [vmem:[#allocation8 + $0x30c] sm:$0xf0] }
 0x121   :  { %3498 = vmatpush.bf16.msrb.mxu0 %v6883_v2  ;;  %v6927_v2 = vor.u32 %v8880_v45, %v6924_v23  ;;  %v7127_v16 = vor.u32 %v8930_v13, %v7124_v14  ;;  %v7284_v45 = vld [vmem:[#allocation8 + $0x35c] sm:$0xf0]  ;;  %v7622_v13 = vld [vmem:[#allocation8 + $0x5f0] sm:$0xf]  ;;  %v9057_v14 = vld [vmem:[#allocation8 + $0x600] sm:$0xf0] }
 0x122   :  { %2171 = vmatpush.bf16.msra.mxu1 %v6694_v28  ;;  %v9694_v17 = vpop.f32.mrf.mxu0  ;;  %v7202_v28 = vld [vmem:[#allocation8 + $0x2a8] sm:$0xf] }
 0x123   :  { %3511 = vmatpush.bf16.msrb.mxu2 %v7043_v26  ;;  %2159 = vmatmul.bf16.vlgmr.msrb.gmra.mxu3 %v9625_v30  ;;  %v6987_v30 = vor.u32 %v8895_v52, %v6984_v54  ;;  %v7223_v26 = vor.u32 %v8957_v21, %v7222_v19  ;;  %v7203_v7 = vor.u32 %v8952_v29, %v7202_v28  ;;  %v8935_v54 = vld [vmem:[#allocation8 + $0x234] sm:$0xf]  ;;  %v7104_v19 = vld [vmem:[#allocation8 + $0x1f4] sm:$0xf0]  ;;  %v8965_v28 = vld [vmem:[#allocation8 + $0x324] sm:$0xf] }
 0x124   :  { %3518 = vmatpush.bf16.msra.mxu3 %v7323_v25  ;;  %v9002_v25 = vld [vmem:[#allocation8 + $0x448] sm:$0xf0]  ;;  %v7264_v29 = vld [vmem:[#allocation8 + $0x334] sm:$0xf0] }
 0x125   :  { %2172 = vmatmul.bf16.vlgmr.msra.gmra.mxu1 %v9627_v35  ;;  %3499 = vmatpush.bf16.msrb.mxu0 %v6863_v43  ;;  %v7442_v35 = vld [vmem:[#allocation8 + $0x488] sm:$0xf]  ;;  %v7403_v27 = vor.u32 %v9002_v25, %v7402_v24  ;;  %v7287_v24 = vor.u32 %v8970_v22, %v7284_v45  ;;  %v6970_v45 = vld [vmem:[#allocation8 + $0xd0] sm:$0xf] }
 0x126   :  { %3531 = vmatpush.bf16.msrb.mxu1 %v7483_v46  ;;  %v7443_v1 = vor.u32 %v9012_v10, %v7442_v35  ;;  %v1939_v6 = vpop.f32.mrf.mxu3  ;;  %v1928_v42 = vpop.f32.mrf.mxu1  ;;  %v8870_v46 = vld [vmem:[#allocation8 + $0x2c] sm:$0xf]  ;;  %v7324_v35 = vld [vmem:[#allocation8 + $0x3ac] sm:$0xf0]  ;;  %v7147_v10 = vor.u32 %v8935_v54, %v7144_v56  ;;  %v8903_v54 = vld [vmem:[#allocation8 + $0x130] sm:$0xf0] }
 0x127   :  { %3512 = vmatpush.bf16.msrb.mxu2 %v7023_v44  ;;  %v7164_v44 = vld [vmem:[#allocation8 + $0x26c] sm:$0xf0]  ;;  %v6887_v52 = vor.u32 %v8870_v46, %v6884_v47  ;;  %v1940_v12 = vadd.f32 %v1939_v6, %v1927_v59  ;;  %v7267_v6 = vor.u32 %v8965_v28, %v7264_v29  ;;  %v8955_v46 = vld [vmem:[#allocation8 + $0x2d4] sm:$0xf]  ;;  %v7224_v47 = vld [vmem:[#allocation8 + $0x2e4] sm:$0xf0] }
 0x128   :  { %3519 = vmatpush.bf16.msra.mxu3 %v7303_v40  ;;  %3500 = vmatmul.bf16.vlgmr.msrb.gmra.mxu0 %v9688_v0  ;;  %v8947_v40 = vld [vmem:[#allocation8 + $0x290] sm:$0xf0]  ;;  %v7167_v63 = vor.u32 %v8940_v41, %v7164_v44  ;;  %v7044_v41 = vld [vmem:[#allocation8 + $0x17c] sm:$0xf0]  ;;  %v7642_v56 = vld [vmem:[#allocation8 + $0x618] sm:$0xf] }
 0x129   :  { %v1965_v43 = vpop.f32.mrf.mxu2  ;;  %v7183_v49 = vor.u32 %v8947_v40, %v7182_v39  ;;  %v8910_v40 = vld [vmem:[#allocation8 + $0x16c] sm:$0xf]  ;;  %v7604_v29 = vld [vmem:[#allocation8 + $0x5dc] sm:$0xf0] }
 0x12a   :  { %3532 = vmatpush.bf16.msrb.mxu1 %v7463_v60  ;;  %3513 = vmatmul.bf16.vlgmr.msrb.gmra.mxu2 %v9690_v3  ;;  %v1954_v36 = vpop.f32.mrf.mxu0  ;;  %v6864_v60 = vld [vmem:[#allocation8 + $0x14] sm:$0xf0] }
 0x12b   :  { %3557 = vmatpush.bf16.msra.mxu2 %v7007_v48  ;;  %v8992_v48 = vld [vmem:[#allocation8 + $0x3f8] sm:$0xf0] }
 0x12c   :  { %3520 = vmatpush.bf16.msra.mxu3 %v7283_v58  ;;  %v7363_v51 = vor.u32 %v8992_v48, %v7362_v62  ;;  %v7047_v62 = vor.u32 %v8910_v40, %v7044_v41  ;;  %v8905_v48 = vld [vmem:[#allocation8 + $0x144] sm:$0xf]  ;;  %v6930_v41 = vld [vmem:[#allocation8 + $0x80] sm:$0xf] }
 0x12e   :  { %3533 = vmatpush.bf16.msrb.mxu1 %v7443_v1  ;;  %v1941_v58 = vpop.f32.mrf.mxu3 }
 0x12f   :  { %3558 = vmatpush.bf16.msra.mxu2 %v6987_v30  ;;  %v7342_v30 = vld [vmem:[#allocation8 + $0x3c0] sm:$0xf]  ;;  %v9060_v58 = vld [vmem:[#allocation8 + $0x61c] sm:$0xf] }
 0x130   :  { %3521 = vmatpush.bf16.msra.mxu3 %v7263_v55  ;;  %v7343_v5 = vor.u32 %v8987_v4, %v7342_v30  ;;  %v6867_v55 = vor.u32 %v8865_v57, %v6864_v60  ;;  %v9062_v57 = vld [vmem:[#allocation8 + $0x628] sm:$0xf0]  ;;  %v7644_v4 = vld [vmem:[#allocation8 + $0x62c] sm:$0xf0] }
 0x131   :  { %v1967_v1 = vpop.f32.mrf.mxu2  ;;  %v7643_v30 = vor.u32 %v9062_v57, %v7642_v56  ;;  %v7542_v56 = vld [vmem:[#allocation8 + $0x550] sm:$0xf]  ;;  %v9037_v57 = vld [vmem:[#allocation8 + $0x560] sm:$0xf0] }
 0x132   :  { %3534 = vmatpush.bf16.msrb.mxu1 %v7423_v18  ;;  %v2004_v8 = vpop.f32.mrf.mxu0  ;;  %v1953_v18 = vadd.f32 %v9694_v17, %v1940_v12  ;;  %v6990_v1 = vld [vmem:[#allocation8 + $0xf8] sm:$0xf] }
 0x133   :  { %3559 = vmatpush.bf16.msra.mxu2 %v6967_v11  ;;  %v7327_v11 = vor.u32 %v8980_v9, %v7324_v35  ;;  %v7647_v9 = vor.u32 %v9060_v58, %v7644_v4  ;;  %v8950_v35 = vld [vmem:[#allocation8 + $0x2ac] sm:$0xf]  ;;  %3544 = vmatpush.bf16.msra.mxu0 %v7643_v30  ;;  %v9035_v58 = vld [vmem:[#allocation8 + $0x554] sm:$0xf]  ;;  %v7543_v30 = vor.u32 %v9037_v57, %v7542_v56  ;;  %v7544_v4 = vld [vmem:[#allocation8 + $0x564] sm:$0xf0] }
 0x134   :  { %3522 = vmatpush.bf16.msra.mxu3 %v7243_v61  ;;  %v7307_v61 = vor.u32 %v8975_v50, %v7304_v15  ;;  %v1966_v25 = vadd.f32 %v1965_v43, %v1953_v18  ;;  %v9055_v50 = vld [vmem:[#allocation8 + $0x5f4] sm:$0xf]  ;;  %v8945_v18 = vld [vmem:[#allocation8 + $0x284] sm:$0xf] }
 0x135   :  { %v9053_v57 = vld [vmem:[#allocation8 + $0x5e0] sm:$0xf0] }
 0x136   :  { %3535 = vmatpush.bf16.msrb.mxu1 %v7403_v27  ;;  %v8920_v27 = vld [vmem:[#allocation8 + $0x1bc] sm:$0xf] }
 0x137   :  { %3560 = vmatpush.bf16.msra.mxu2 %v6947_v53  ;;  %v8925_v53 = vld [vmem:[#allocation8 + $0x1e4] sm:$0xf] }
 0x138   :  { %3523 = vmatpush.bf16.msra.mxu3 %v7223_v26  ;;  %v7107_v23 = vor.u32 %v8925_v53, %v7104_v19  ;;  %v7184_v53 = vld [vmem:[#allocation8 + $0x294] sm:$0xf0] }
 0x13a   :  { %3536 = vmatpush.bf16.msrb.mxu1 %v7383_v37  ;;  %v2006_v21 = vpop.f32.mrf.mxu0  ;;  %v7067_v37 = vor.u32 %v8915_v32, %v7064_v20  ;;  %v8888_v32 = vld [vmem:[#allocation8 + $0xb8] sm:$0xf0]  ;;  %v7582_v20 = vld [vmem:[#allocation8 + $0x5a0] sm:$0xf] }
 0x13b   :  { %3561 = vmatpush.bf16.msra.mxu2 %v6927_v2  ;;  %v7084_v2 = vld [vmem:[#allocation8 + $0x1cc] sm:$0xf0]  ;;  %v7187_v21 = vor.u32 %v8945_v18, %v7184_v53 }
 0x13c   :  { %3524 = vmatpush.bf16.msra.mxu3 %v7203_v7  ;;  %v7087_v17 = vor.u32 %v8920_v27, %v7084_v2  ;;  %v8960_v7 = vld [vmem:[#allocation8 + $0x2fc] sm:$0xf] }
 0x13d   :  { %v9706_v27 = vld [vmem:[#allocation7] sm:$0x1f] }
 0x13e   :  { %3537 = vmatpush.bf16.msrb.mxu1 %v7363_v51  ;;  %v1978_v26 = vpop.f32.mrf.mxu1  ;;  %v7227_v51 = vor.u32 %v8955_v46, %v7224_v47  ;;  %v450_v2 = vperm.slane %v9706_v27, 3  ;;  %v7562_v46 = vld [vmem:[#allocation8 + $0x578] sm:$0xf]  ;;  %v9042_v47 = vld [vmem:[#allocation8 + $0x588] sm:$0xf0] }
 0x13f   :  { %3562 = vmatpush.bf16.msra.mxu2 %v6907_v38  ;;  %v1979_v31 = vadd.f32 %v1978_v26, %v1966_v25  ;;  %v7247_v38 = vor.u32 %v8960_v7, %v7244_v34  ;;  %v9052_v25 = vld [vmem:[#allocation8 + $0x5d8] sm:$0xf0]  ;;  %v9050_v26 = vld [vmem:[#allocation8 + $0x5cc] sm:$0xf]  ;;  %v9047_v7 = vld [vmem:[#allocation8 + $0x5b0] sm:$0xf0] }
 0x140   :  { %3525 = vmatpush.bf16.msra.mxu3 %v7183_v49  ;;  %v7024_v49 = vld [vmem:[#allocation8 + $0x154] sm:$0xf0]  ;;  %v9045_v34 = vld [vmem:[#allocation8 + $0x5a4] sm:$0xf] }
 0x142   :  { %3538 = vmatpush.bf16.msrb.mxu1 %v7343_v5  ;;  %v7027_v5 = vor.u32 %v8905_v48, %v7024_v49  ;;  %v7563_v49 = vor.u32 %v9042_v47, %v7562_v46  ;;  %v9015_v46 = vld [vmem:[#allocation8 + $0x4b4] sm:$0xf]  ;;  %v7464_v47 = vld [vmem:[#allocation8 + $0x4c4] sm:$0xf0] }
 0x143   :  { %3563 = vmatpush.bf16.msra.mxu2 %v6887_v52  ;;  %v7010_v52 = vld [vmem:[#allocation8 + $0x120] sm:$0xf] }
 0x144   :  { %3570 = vmatpush.bf16.msrb.mxu3 %v7167_v63 }
 0x145   :  { %v9699_v33 = vpop.f32.mrf.mxu0 }
 0x146   :  { %3583 = vmatpush.bf16.msra.mxu1 %v7327_v11  ;;  %v1991_v36 = vpop.f32.mrf.mxu3  ;;  %v1980_v42 = vpop.f32.mrf.mxu1  ;;  %v8898_v11 = vld [vmem:[#allocation8 + $0x108] sm:$0xf0] }
 0x147   :  { %3564 = vmatpush.bf16.msra.mxu2 %v6867_v55  ;;  %v1992_v39 = vadd.f32 %v1991_v36, %v1979_v31  ;;  %v7011_v55 = vor.u32 %v8903_v54, %v7010_v52  ;;  %v6991_v22 = vor.u32 %v8898_v11, %v6990_v1  ;;  %v6950_v31 = vld [vmem:[#allocation8 + $0xa8] sm:$0xf]  ;;  %v8883_v42 = vld [vmem:[#allocation8 + $0x90] sm:$0xf0]  ;;  %v6910_v52 = vld [vmem:[#allocation8 + $0x58] sm:$0xf] }
 0x148   :  { %3571 = vmatpush.bf16.msrb.mxu3 %v7147_v10  ;;  %v7204_v10 = vld [vmem:[#allocation8 + $0x2bc] sm:$0xf0]  ;;  %v6951_v40 = vor.u32 %v8888_v32, %v6950_v31  ;;  %v8878_v54 = vld [vmem:[#allocation8 + $0x68] sm:$0xf0]  ;;  %v7522_v1 = vld [vmem:[#allocation8 + $0x528] sm:$0xf] }
 0x149   :  { %v2005_v43 = vadd.f32 %v2004_v8, %v1992_v39  ;;  %v9701_v44 = vpop.f32.mrf.mxu2  ;;  %v7207_v12 = vor.u32 %v8950_v35, %v7204_v10  ;;  %v9032_v11 = vld [vmem:[#allocation8 + $0x538] sm:$0xf0]  ;;  %v7490_v31 = vld [vmem:[#allocation8 + $0x4e0] sm:$0xf]  ;;  %v9023_v32 = vld [vmem:[#allocation8 + $0x4f0] sm:$0xf0] }
 0x14a   :  { %3584 = vmatpush.bf16.msra.mxu1 %v7307_v61  ;;  %3565 = vmatmul.bf16.vlgmr.msra.gmra.mxu2 %v9688_v0  ;;  %v7624_v61 = vld [vmem:[#allocation8 + $0x604] sm:$0xf0]  ;;  %v2018_v36 = vadd.f32 %v9701_v44, %v450_v2  ;;  %v6931_v44 = vor.u32 %v8883_v42, %v6930_v41  ;;  %v9020_v2 = vld [vmem:[#allocation8 + $0x4dc] sm:$0xf]  ;;  %v8943_v41 = vld [vmem:[#allocation8 + $0x270] sm:$0xf0] }
 0x14b   :  { %v2192_v63 = vmax.f32 %v2005_v43, 0.0  ;;  %3609 = vmatpush.bf16.msrb.mxu2 %v7647_v9  ;;  %v7627_v19 = vor.u32 %v9055_v50, %v7624_v61  ;;  %v6890_v9 = vld [vmem:[#allocation8 + $0x30] sm:$0xf]  ;;  %v7524_v50 = vld [vmem:[#allocation8 + $0x53c] sm:$0xf0] }
 0x14c   :  { %3572 = vmatpush.bf16.msrb.mxu3 %v7127_v16  ;;  %v7623_v16 = vor.u32 %v9057_v14, %v7622_v13  ;;  %v2031_v48 = vadd.f32 %v9699_v33, %v2018_v36  ;;  %v6911_v33 = vor.u32 %v8878_v54, %v6910_v52  ;;  %v7523_v13 = vor.u32 %v9032_v11, %v7522_v1  ;;  %v9030_v14 = vld [vmem:[#allocation8 + $0x52c] sm:$0xf]  ;;  %v9048_v11 = vld [vmem:[#allocation8 + $0x5b8] sm:$0xf0] }
 0x14d   :  { %v9703_v59 = vpack.c.bf16 %v2192_v63, %v2192_v63  ;;  %v2032_v60 = vpop.f32.mrf.mxu0  ;;  %v7527_v61 = vor.u32 %v9030_v14, %v7524_v50  ;;  %v7491_v36 = vor.u32 %v9023_v32, %v7490_v31  ;;  %v9005_v50 = vld [vmem:[#allocation8 + $0x464] sm:$0xf]  ;;  %v7550_v32 = vld [vmem:[#allocation8 + $0x558] sm:$0xf] }
 0x14e   :  { %3585 = vmatpush.bf16.msra.mxu1 %v7287_v24  ;;  %v1993_v8 = vpop.f32.mrf.mxu3  ;;  %3545 = vmatpush.bf16.msra.mxu0 %v7623_v16  ;;  %v7602_v24 = vld [vmem:[#allocation8 + $0x5c8] sm:$0xf] }
 0x14f   :  { %3526 = vmatmul.bf16.vlgmr.msra.gmra.mxu3 %v9703_v59  ;;  %3610 = vmatpush.bf16.msrb.mxu2 %v7627_v19  ;;  %v7603_v28 = vor.u32 %v9052_v25, %v7602_v24  ;;  %v7547_v8 = vor.u32 %v9035_v58, %v7544_v4  ;;  %v6870_v16 = vld [vmem:[#allocation8 + $0x8] sm:$0xf]  ;;  %v8868_v19 = vld [vmem:[#allocation8 + $0x18] sm:$0xf0]  ;;  %v9025_v24 = vld [vmem:[#allocation8 + $0x504] sm:$0xf] }
 0x150   :  { %3573 = vmatpush.bf16.msrb.mxu3 %v7107_v23  ;;  %v8893_v23 = vld [vmem:[#allocation8 + $0xe0] sm:$0xf0]  ;;  %v7150_v58 = vld [vmem:[#allocation8 + $0x238] sm:$0xf]  ;;  %v9010_v4 = vld [vmem:[#allocation8 + $0x48c] sm:$0xf] }
 0x151   :  { %v2019_v15 = vpop.f32.mrf.mxu2 }
 0x152   :  { %3586 = vmatpush.bf16.msra.mxu1 %v7267_v6  ;;  %v6971_v6 = vor.u32 %v8893_v23, %v6970_v45  ;;  %3546 = vmatpush.bf16.msra.mxu0 %v7603_v28  ;;  %v7502_v45 = vld [vmem:[#allocation8 + $0x500] sm:$0xf]  ;;  %v9027_v23 = vld [vmem:[#allocation8 + $0x510] sm:$0xf0]  ;;  %v7484_v28 = vld [vmem:[#allocation8 + $0x4ec] sm:$0xf0] }
 0x153   :  { %v7503_v25 = vor.u32 %v9027_v23, %v7502_v45  ;;  %v9043_v45 = vld [vmem:[#allocation8 + $0x590] sm:$0xf0]  ;;  %v7110_v23 = vld [vmem:[#allocation8 + $0x1e8] sm:$0xf] }
 0x154   :  { %3574 = vmatpush.bf16.msrb.mxu3 %v7087_v17  ;;  %v7607_v17 = vor.u32 %v9050_v26, %v7604_v29  ;;  %v7504_v26 = vld [vmem:[#allocation8 + $0x514] sm:$0xf0] }
 0x156   :  { %3587 = vmatpush.bf16.msra.mxu1 %v7247_v38  ;;  %3611 = vmatpush.bf16.msrb.mxu2 %v7607_v17  ;;  %v7584_v38 = vld [vmem:[#allocation8 + $0x5b4] sm:$0xf0]  ;;  %v7507_v17 = vor.u32 %v9025_v24, %v7504_v26  ;;  %v8928_v24 = vld [vmem:[#allocation8 + $0x1f8] sm:$0xf0]  ;;  %v7404_v26 = vld [vmem:[#allocation8 + $0x44c] sm:$0xf0] }
 0x157   :  { %v7587_v39 = vor.u32 %v9045_v34, %v7584_v38  ;;  %v7630_v34 = vld [vmem:[#allocation8 + $0x5f8] sm:$0xf]  ;;  %v7111_v31 = vor.u32 %v8928_v24, %v7110_v23  ;;  %v7472_v24 = vld [vmem:[#allocation8 + $0x4cc] sm:$0xf0] }
 0x158   :  { %3575 = vmatpush.bf16.msrb.mxu3 %v7067_v37  ;;  %v7583_v37 = vor.u32 %v9047_v7, %v7582_v20  ;;  %v6871_v7 = vor.u32 %v8868_v19, %v6870_v16  ;;  %v7430_v16 = vld [vmem:[#allocation8 + $0x468] sm:$0xf] }
 0x15a   :  { %3588 = vmatpush.bf16.msra.mxu1 %v7227_v51  ;;  %3547 = vmatpush.bf16.msra.mxu0 %v7583_v37  ;;  %v7564_v51 = vld [vmem:[#allocation8 + $0x58c] sm:$0xf0] }
 0x15b   :  { %3612 = vmatpush.bf16.msrb.mxu2 %v7587_v39  ;;  %v9058_v39 = vld [vmem:[#allocation8 + $0x608] sm:$0xf0] }
 0x15c   :  { %3576 = vmatpush.bf16.msrb.mxu3 %v7047_v62  ;;  %v9040_v62 = vld [vmem:[#allocation8 + $0x57c] sm:$0xf]  ;;  %v7631_v54 = vor.u32 %v9058_v39, %v7630_v34  ;;  %v8923_v34 = vld [vmem:[#allocation8 + $0x1d0] sm:$0xf0]  ;;  %v7390_v39 = vld [vmem:[#allocation8 + $0x418] sm:$0xf] }
 0x15d   :  { %v7567_v63 = vor.u32 %v9040_v62, %v7564_v51  ;;  %v7470_v62 = vld [vmem:[#allocation8 + $0x4b8] sm:$0xf]  ;;  %v9018_v51 = vld [vmem:[#allocation8 + $0x4c8] sm:$0xf0] }
 0x15e   :  { %3589 = vmatpush.bf16.msra.mxu1 %v7207_v12  ;;  %v2043_v43 = vpop.f32.mrf.mxu1  ;;  %3548 = vmatpush.bf16.msra.mxu0 %v7563_v49  ;;  %v7467_v49 = vor.u32 %v9015_v46, %v7464_v47  ;;  %v7471_v52 = vor.u32 %v9018_v51, %v7470_v62  ;;  %v9033_v62 = vld [vmem:[#allocation8 + $0x540] sm:$0xf0] }
 0x15f   :  { %3613 = vmatpush.bf16.msrb.mxu2 %v7567_v63  ;;  %v2044_v60 = vadd.f32 %v2043_v43, %v2031_v48 }
 0x160   :  { %3577 = vmatpush.bf16.msrb.mxu3 %v7027_v5 }
 0x162   :  { %3590 = vmatpush.bf16.msra.mxu1 %v7187_v21  ;;  %3549 = vmatpush.bf16.msra.mxu0 %v7543_v30  ;;  %v7650_v21 = vld [vmem:[#allocation8 + $0x620] sm:$0xf] }
 0x163   :  { %3578 = vmatmul.bf16.vlgmr.msrb.gmra.mxu3 %v9690_v3  ;;  %3614 = vmatpush.bf16.msrb.mxu2 %v7547_v8  ;;  %v7450_v8 = vld [vmem:[#allocation8 + $0x490] sm:$0xf] }
 0x164   :  { %3622 = vmatpush.bf16.msra.mxu3 %v7011_v55  ;;  %v8873_v55 = vld [vmem:[#allocation8 + $0x40] sm:$0xf0] }
 0x165   :  { %v2082_v5 = vpop.f32.mrf.mxu0  ;;  %v6891_v53 = vor.u32 %v8873_v55, %v6890_v9  ;;  %v9013_v9 = vld [vmem:[#allocation8 + $0x4a0] sm:$0xf0] }
 0x166   :  { %v2045_v35 = vpop.f32.mrf.mxu1  ;;  %v2056_v10 = vpop.f32.mrf.mxu3  ;;  %3550 = vmatpush.bf16.msra.mxu0 %v7523_v13  ;;  %v8933_v13 = vld [vmem:[#allocation8 + $0x220] sm:$0xf0] }
 0x167   :  { %v2057_v12 = vadd.f32 %v2056_v10, %v2044_v60  ;;  %3615 = vmatpush.bf16.msrb.mxu2 %v7527_v61  ;;  %v8938_v60 = vld [vmem:[#allocation8 + $0x248] sm:$0xf0]  ;;  %v7590_v35 = vld [vmem:[#allocation8 + $0x5a8] sm:$0xf]  ;;  %v7451_v10 = vor.u32 %v9013_v9, %v7450_v8  ;;  %v7050_v9 = vld [vmem:[#allocation8 + $0x170] sm:$0xf] }
 0x168   :  { %3623 = vmatpush.bf16.msra.mxu3 %v6991_v22  ;;  %v9063_v22 = vld [vmem:[#allocation8 + $0x630] sm:$0xf0]  ;;  %v7151_v1 = vor.u32 %v8938_v60, %v7150_v58  ;;  %v8993_v58 = vld [vmem:[#allocation8 + $0x400] sm:$0xf0]  ;;  %v7510_v60 = vld [vmem:[#allocation8 + $0x508] sm:$0xf] }
 0x169   :  { %v2069_v15 = vpop.f32.mrf.mxu2  ;;  %v7651_v38 = vor.u32 %v9063_v22, %v7650_v21  ;;  %v7591_v21 = vor.u32 %v9048_v11, %v7590_v35  ;;  %v8913_v35 = vld [vmem:[#allocation8 + $0x180] sm:$0xf0] }
 0x16a   :  { %v2070_v18 = vadd.f32 %v2069_v15, %v2057_v12  ;;  %3551 = vmatpush.bf16.msra.mxu0 %v7503_v25  ;;  %v7130_v12 = vld [vmem:[#allocation8 + $0x210] sm:$0xf]  ;;  %v7424_v15 = vld [vmem:[#allocation8 + $0x474] sm:$0xf0]  ;;  %v9000_v25 = vld [vmem:[#allocation8 + $0x43c] sm:$0xf] }
 0x16b   :  { %3616 = vmatpush.bf16.msrb.mxu2 %v7507_v17  ;;  %v7427_v61 = vor.u32 %v9005_v50, %v7424_v15  ;;  %v7131_v22 = vor.u32 %v8933_v13, %v7130_v12  ;;  %v9021_v11 = vld [vmem:[#allocation8 + $0x4e4] sm:$0xf]  ;;  %v7492_v12 = vld [vmem:[#allocation8 + $0x4f4] sm:$0xf0] }
 0x16c   :  { %3624 = vmatpush.bf16.msra.mxu3 %v6971_v6  ;;  %v7487_v6 = vor.u32 %v9020_v2, %v7484_v28  ;;  %v2083_v20 = vadd.f32 %v2082_v5, %v2070_v18  ;;  %v7444_v5 = vld [vmem:[#allocation8 + $0x49c] sm:$0xf0]  ;;  %v9008_v18 = vld [vmem:[#allocation8 + $0x478] sm:$0xf0]  ;;  %v7407_v28 = vor.u32 %v9000_v25, %v7404_v26  ;;  %v8901_v25 = vld [vmem:[#allocation8 + $0x124] sm:$0xf] }
 0x16d   :  { %v2084_v29 = vpop.f32.mrf.mxu0  ;;  %v7431_v19 = vor.u32 %v9008_v18, %v7430_v16  ;;  %v7410_v2 = vld [vmem:[#allocation8 + $0x440] sm:$0xf]  ;;  %v7012_v26 = vld [vmem:[#allocation8 + $0x134] sm:$0xf0] }
 0x16e   :  { %v2095_v37 = vpop.f32.mrf.mxu1  ;;  %v2058_v42 = vpop.f32.mrf.mxu3  ;;  %3596 = vmatpush.bf16.msrb.mxu0 %v7487_v6  ;;  %v9003_v29 = vld [vmem:[#allocation8 + $0x450] sm:$0xf0] }
 0x16f   :  { %v2096_v43 = vadd.f32 %v2095_v37, %v2083_v20  ;;  %3661 = vmatpush.bf16.msra.mxu2 %v7491_v36  ;;  %v7411_v17 = vor.u32 %v9003_v29, %v7410_v2  ;;  %v9038_v20 = vld [vmem:[#allocation8 + $0x568] sm:$0xf0]  ;;  %v8995_v36 = vld [vmem:[#allocation8 + $0x414] sm:$0xf]  ;;  %v7384_v37 = vld [vmem:[#allocation8 + $0x424] sm:$0xf0] }
 0x170   :  { %3625 = vmatpush.bf16.msra.mxu3 %v6951_v40  ;;  %v7170_v40 = vld [vmem:[#allocation8 + $0x260] sm:$0xf]  ;;  %v7530_v42 = vld [vmem:[#allocation8 + $0x530] sm:$0xf]  ;;  %v7551_v46 = vor.u32 %v9038_v20, %v7550_v32  ;;  %v451_v2 = vperm.slane %v9706_v27, 4 }
 0x171   :  { %v2071_v48 = vpop.f32.mrf.mxu2  ;;  %v2193_v63 = vmax.f32 %v2096_v43, 0.0  ;;  %v7171_v56 = vor.u32 %v8943_v41, %v7170_v40  ;;  %v8998_v40 = vld [vmem:[#allocation8 + $0x428] sm:$0xf0]  ;;  %v8896_v32 = vld [vmem:[#allocation8 + $0xfc] sm:$0xf] }
 0x172   :  { %3597 = vmatpush.bf16.msrb.mxu0 %v7467_v49  ;;  %v7391_v43 = vor.u32 %v8998_v40, %v7390_v39  ;;  %v7070_v48 = vld [vmem:[#allocation8 + $0x198] sm:$0xf]  ;;  %v8918_v49 = vld [vmem:[#allocation8 + $0x1a8] sm:$0xf0]  ;;  %v6992_v20 = vld [vmem:[#allocation8 + $0x10c] sm:$0xf0] }
 0x173   :  { %v9712_v30 = vpack.c.bf16 %v2193_v63, %v2193_v63  ;;  %3662 = vmatpush.bf16.msra.mxu2 %v7471_v52  ;;  %v7364_v52 = vld [vmem:[#allocation8 + $0x3fc] sm:$0xf0]  ;;  %v7071_v8 = vor.u32 %v8918_v49, %v7070_v48  ;;  %v8891_v27 = vld [vmem:[#allocation8 + $0xd4] sm:$0xf]  ;;  %v6972_v40 = vld [vmem:[#allocation8 + $0xe4] sm:$0xf0] }
 0x174   :  { %3626 = vmatpush.bf16.msra.mxu3 %v6931_v44  ;;  %v7610_v44 = vld [vmem:[#allocation8 + $0x5d0] sm:$0xf]  ;;  %v7432_v39 = vld [vmem:[#allocation8 + $0x47c] sm:$0xf0]  ;;  %v8886_v48 = vld [vmem:[#allocation8 + $0xac] sm:$0xf] }
 0x175   :  { %3539 = vmatmul.bf16.vlgmr.msrb.gmra.mxu1 %v9712_v30  ;;  %v7611_v55 = vor.u32 %v9053_v57, %v7610_v44  ;;  %v8990_v44 = vld [vmem:[#allocation8 + $0x3ec] sm:$0xf]  ;;  %v6952_v49 = vld [vmem:[#allocation8 + $0xbc] sm:$0xf0] }
 0x176   :  { %3635 = vmatpush.bf16.msrb.mxu1 %v7171_v56  ;;  %v2097_v14 = vpop.f32.mrf.mxu1  ;;  %v7367_v57 = vor.u32 %v8990_v44, %v7364_v52 }
 0x177   :  { %3663 = vmatpush.bf16.msra.mxu2 %v7451_v10  ;;  %v8985_v10 = vld [vmem:[#allocation8 + $0x3c4] sm:$0xf]  ;;  %v8988_v14 = vld [vmem:[#allocation8 + $0x3d8] sm:$0xf0] }
 0x178   :  { %3627 = vmatpush.bf16.msra.mxu3 %v6911_v33  ;;  %v7447_v33 = vor.u32 %v9010_v4, %v7444_v5  ;;  %v7531_v5 = vor.u32 %v9033_v62, %v7530_v42  ;;  %v7412_v62 = vld [vmem:[#allocation8 + $0x454] sm:$0xf0] }
 0x17a   :  { %3598 = vmatpush.bf16.msrb.mxu0 %v7447_v33  ;;  %3636 = vmatpush.bf16.msrb.mxu1 %v7151_v1  ;;  %v9028_v33 = vld [vmem:[#allocation8 + $0x518] sm:$0xf0]  ;;  %v7350_v1 = vld [vmem:[#allocation8 + $0x3c8] sm:$0xf] }
 0x17b   :  { %3664 = vmatpush.bf16.msra.mxu2 %v7431_v19  ;;  %v7351_v15 = vor.u32 %v8988_v14, %v7350_v1  ;;  %v7511_v16 = vor.u32 %v9028_v33, %v7510_v60 }
 0x17c   :  { %3628 = vmatpush.bf16.msra.mxu3 %v6891_v53  ;;  %v7570_v53 = vld [vmem:[#allocation8 + $0x580] sm:$0xf] }
 0x17d   :  { %v7571_v6 = vor.u32 %v9043_v45, %v7570_v53  ;;  %v7495_v53 = vor.u32 %v9021_v11, %v7492_v12  ;;  %v9016_v45 = vld [vmem:[#allocation8 + $0x4bc] sm:$0xf]  ;;  %v7372_v11 = vld [vmem:[#allocation8 + $0x404] sm:$0xf0] }
 0x17e   :  { %3599 = vmatpush.bf16.msrb.mxu0 %v7427_v61  ;;  %3637 = vmatpush.bf16.msrb.mxu1 %v7131_v22  ;;  %v7051_v61 = vor.u32 %v8913_v35, %v7050_v9  ;;  %v8908_v22 = vld [vmem:[#allocation8 + $0x158] sm:$0xf0]  ;;  %v7475_v29 = vor.u32 %v9016_v45, %v7472_v24  ;;  %v8871_v24 = vld [vmem:[#allocation8 + $0x34] sm:$0xf] }
 0x17f   :  { %3665 = vmatpush.bf16.msra.mxu2 %v7411_v17  ;;  %v7015_v17 = vor.u32 %v8901_v25, %v7012_v26  ;;  %v8876_v12 = vld [vmem:[#allocation8 + $0x5c] sm:$0xf]  ;;  %v6892_v25 = vld [vmem:[#allocation8 + $0x44] sm:$0xf0] }
 0x180   :  { %3629 = vmatpush.bf16.msra.mxu3 %v6871_v7  ;;  %v7090_v7 = vld [vmem:[#allocation8 + $0x1c0] sm:$0xf] }
 0x181   :  { %v7091_v47 = vor.u32 %v8923_v34, %v7090_v7 }
 0x182   :  { %3600 = vmatpush.bf16.msrb.mxu0 %v7407_v28  ;;  %v9716_v41 = vpop.f32.mrf.mxu1  ;;  %3638 = vmatpush.bf16.msrb.mxu1 %v7111_v31  ;;  %v7452_v31 = vld [vmem:[#allocation8 + $0x4a4] sm:$0xf0] }
 0x183   :  { %3630 = vmatmul.bf16.vlgmr.msra.gmra.mxu3 %v9688_v0  ;;  %3666 = vmatpush.bf16.msra.mxu2 %v7391_v43 }
 0x184   :  { %3674 = vmatpush.bf16.msrb.mxu3 %v7651_v38  ;;  %v7387_v38 = vor.u32 %v8995_v36, %v7384_v37  ;;  %v6995_v36 = vor.u32 %v8896_v32, %v6992_v20  ;;  %v9006_v37 = vld [vmem:[#allocation8 + $0x46c] sm:$0xf] }
 0x185   :  { %v9718_v51 = vpop.f32.mrf.mxu0  ;;  %3591 = vmatmul.bf16.vlgmr.msra.gmra.mxu1 %v9703_v59  ;;  %v7435_v43 = vor.u32 %v9006_v37, %v7432_v39  ;;  %v6895_v37 = vor.u32 %v8871_v24, %v6892_v25  ;;  %v8976_v39 = vld [vmem:[#allocation8 + $0x37c] sm:$0xf] }
 0x186   :  { %v2108_v63 = vpop.f32.mrf.mxu3  ;;  %3601 = vmatpush.bf16.msrb.mxu0 %v7387_v38  ;;  %3639 = vmatpush.bf16.msrb.mxu1 %v7091_v47  ;;  %v9001_v47 = vld [vmem:[#allocation8 + $0x444] sm:$0xf]  ;;  %v8964_v24 = vld [vmem:[#allocation8 + $0x318] sm:$0xf0] }
 0x187   :  { %v2109_v7 = vadd.f32 %v2108_v63, %v451_v2  ;;  %v7415_v52 = vor.u32 %v9001_v47, %v7412_v62  ;;  %v9061_v62 = vld [vmem:[#allocation8 + $0x624] sm:$0xf] }
 0x188   :  { %3675 = vmatpush.bf16.msrb.mxu3 %v7631_v54  ;;  %v7370_v54 = vld [vmem:[#allocation8 + $0x3f0] sm:$0xf] }
 0x189   :  { %v9720_v56 = vpop.f32.mrf.mxu2  ;;  %v7371_v4 = vor.u32 %v8993_v58, %v7370_v54  ;;  %v2122_v42 = vadd.f32 %v9716_v41, %v2109_v7  ;;  %v9727_v54 = vld [vmem:[#allocation10] sm:$0x1f]  ;;  %v8996_v58 = vld [vmem:[#allocation8 + $0x41c] sm:$0xf]  ;;  %v7392_v41 = vld [vmem:[#allocation8 + $0x42c] sm:$0xf0] }
 0x18a   :  { %3602 = vmatpush.bf16.msrb.mxu0 %v7367_v57  ;;  %v2123_v50 = vpop.f32.mrf.mxu1  ;;  %3640 = vmatpush.bf16.msrb.mxu1 %v7071_v8  ;;  %v6955_v57 = vor.u32 %v8886_v48, %v6952_v49  ;;  %v2442_v9 = vperm.slane %v9727_v54, 0  ;;  %v7652_v48 = vld [vmem:[#allocation8 + $0x634] sm:$0xf0] }
 0x18b   :  { %3667 = vmatpush.bf16.msra.mxu2 %v7371_v4  ;;  %v2135_v63 = vadd.f32 %v9720_v56, %v2122_v42  ;;  %v8881_v4 = vld [vmem:[#allocation8 + $0x84] sm:$0xf]  ;;  %v7395_v56 = vor.u32 %v8996_v58, %v7392_v41  ;;  %v6872_v42 = vld [vmem:[#allocation8 + $0x1c] sm:$0xf0]  ;;  %v7292_v41 = vld [vmem:[#allocation8 + $0x364] sm:$0xf0] }
 0x18c   :  { %3676 = vmatpush.bf16.msrb.mxu3 %v7611_v55  ;;  %v7344_v55 = vld [vmem:[#allocation8 + $0x3d4] sm:$0xf0] }
 0x18d   :  { %v7347_v13 = vor.u32 %v8985_v10, %v7344_v55  ;;  %v2149_v18 = vpop.f32.mrf.mxu0  ;;  %v2148_v8 = vadd.f32 %v9718_v51, %v2135_v63  ;;  %v8991_v55 = vld [vmem:[#allocation8 + $0x3f4] sm:$0xf]  ;;  %v7330_v51 = vld [vmem:[#allocation8 + $0x3a0] sm:$0xf]  ;;  %v7290_v63 = vld [vmem:[#allocation8 + $0x350] sm:$0xf] }
 0x18e   :  { %v2110_v19 = vpop.f32.mrf.mxu3  ;;  %3641 = vmatpush.bf16.msrb.mxu1 %v7051_v61  ;;  %v8983_v61 = vld [vmem:[#allocation8 + $0x3b0] sm:$0xf0] }
 0x18f   :  { %3603 = vmatpush.bf16.msrb.mxu0 %v7347_v13  ;;  %3668 = vmatpush.bf16.msra.mxu2 %v7351_v15  ;;  %v6912_v13 = vld [vmem:[#allocation8 + $0x6c] sm:$0xf0]  ;;  %v7375_v15 = vor.u32 %v8991_v55, %v7372_v11  ;;  %v8981_v19 = vld [vmem:[#allocation8 + $0x3a4] sm:$0xf]  ;;  %v8968_v55 = vld [vmem:[#allocation8 + $0x338] sm:$0xf0] }
 0x190   :  { %3677 = vmatpush.bf16.msrb.mxu3 %v7591_v21  ;;  %v7030_v21 = vld [vmem:[#allocation8 + $0x148] sm:$0xf]  ;;  %v8966_v11 = vld [vmem:[#allocation8 + $0x32c] sm:$0xf] }
 0x191   :  { %v2136_v23 = vpop.f32.mrf.mxu2  ;;  %v7031_v28 = vor.u32 %v8908_v22, %v7030_v21  ;;  %v7332_v21 = vld [vmem:[#allocation8 + $0x3b4] sm:$0xf0]  ;;  %v8986_v22 = vld [vmem:[#allocation8 + $0x3cc] sm:$0xf] }
 0x192   :  { %v7352_v23 = vld [vmem:[#allocation8 + $0x3dc] sm:$0xf0]  ;;  %v7335_v20 = vor.u32 %v8981_v19, %v7332_v21  ;;  %v8961_v21 = vld [vmem:[#allocation8 + $0x304] sm:$0xf] }
 0x193   :  { %3642 = vmatpush.bf16.msrb.mxu1 %v7031_v28  ;;  %v7338_v28 = vld [vmem:[#allocation8 + $0x3a8] sm:$0xf]  ;;  %v7355_v7 = vor.u32 %v8986_v22, %v7352_v23  ;;  %v7252_v22 = vld [vmem:[#allocation8 + $0x314] sm:$0xf0] }
 0x194   :  { %3678 = vmatpush.bf16.msrb.mxu3 %v7571_v6  ;;  %v9011_v6 = vld [vmem:[#allocation8 + $0x494] sm:$0xf]  ;;  %v7258_v23 = vld [vmem:[#allocation8 + $0x308] sm:$0xf] }
 0x195   :  { %v7455_v34 = vor.u32 %v9011_v6, %v7452_v31  ;;  %v7331_v31 = vor.u32 %v8983_v61, %v7330_v51  ;;  %v7612_v51 = vld [vmem:[#allocation8 + $0x5e4] sm:$0xf0] }
 0x196   :  { %3643 = vmatmul.bf16.vlgmr.msrb.gmra.mxu1 %v9690_v3 }
 0x197   :  { %3687 = vmatpush.bf16.msra.mxu1 %v7015_v17 }
 0x198   :  { %3679 = vmatpush.bf16.msrb.mxu3 %v7551_v46  ;;  %v6975_v46 = vor.u32 %v8891_v27, %v6972_v40  ;;  %v7312_v27 = vld [vmem:[#allocation8 + $0x38c] sm:$0xf0]  ;;  %v8866_v40 = vld [vmem:[#allocation8 + $0xc] sm:$0xf] }
 0x199   :  { %v2186_v38 = vpop.f32.mrf.mxu2  ;;  %v7315_v49 = vor.u32 %v8976_v39, %v7312_v27  ;;  %v9041_v39 = vld [vmem:[#allocation8 + $0x584] sm:$0xf]  ;;  %v7572_v27 = vld [vmem:[#allocation8 + $0x594] sm:$0xf0] }
 0x19b   :  { %3688 = vmatpush.bf16.msra.mxu1 %v6995_v36  ;;  %v8978_v36 = vld [vmem:[#allocation8 + $0x388] sm:$0xf0] }
 0x19c   :  { %3680 = vmatpush.bf16.msrb.mxu3 %v7531_v5  ;;  %v6932_v5 = vld [vmem:[#allocation8 + $0x94] sm:$0xf0] }
 0x19d   :  { %v6935_v10 = vor.u32 %v8881_v4, %v6932_v5  ;;  %v7655_v4 = vor.u32 %v9061_v62, %v7652_v48  ;;  %v7298_v5 = vld [vmem:[#allocation8 + $0x358] sm:$0xf]  ;;  %v7212_v62 = vld [vmem:[#allocation8 + $0x2c4] sm:$0xf0]  ;;  %v7575_v48 = vor.u32 %v9041_v39, %v7572_v27  ;;  %v8926_v39 = vld [vmem:[#allocation8 + $0x1ec] sm:$0xf] }
 0x19e   :  { %v7112_v27 = vld [vmem:[#allocation8 + $0x1fc] sm:$0xf0] }
 0x19f   :  { %3689 = vmatpush.bf16.msra.mxu1 %v6975_v46  ;;  %v8979_v46 = vld [vmem:[#allocation8 + $0x390] sm:$0xf0] }
 0x1a0   :  { %3681 = vmatpush.bf16.msrb.mxu3 %v7511_v16  ;;  %v6915_v16 = vor.u32 %v8876_v12, %v6912_v13  ;;  %v7272_v12 = vld [vmem:[#allocation8 + $0x33c] sm:$0xf0] }
 0x1a1   :  { %v2188_v60 = vpop.f32.mrf.mxu2  ;;  %v7275_v61 = vor.u32 %v8966_v11, %v7272_v12  ;;  %v8949_v11 = vld [vmem:[#allocation8 + $0x2a0] sm:$0xf0] }
 0x1a2   :  { %v2173_v44 = vpop.f32.mrf.mxu1  ;;  %v8971_v60 = vld [vmem:[#allocation8 + $0x354] sm:$0xf] }
 0x1a3   :  { %3690 = vmatpush.bf16.msra.mxu1 %v6955_v57  ;;  %v6875_v57 = vor.u32 %v8866_v40, %v6872_v42  ;;  %v7210_v42 = vld [vmem:[#allocation8 + $0x2b0] sm:$0xf] }
 0x1a4   :  { %3726 = vmatpush.bf16.msra.mxu3 %v7495_v53 }
 0x1a5   :  { %v3501_v35 = vpop.f32.mrf.mxu0 }
 0x1a6   :  { %v2160_v33 = vpop.f32.mrf.mxu3  ;;  %v3502_v53 = vadd.f32 %v3501_v35, %v2442_v9  ;;  %v9056_v9 = vld [vmem:[#allocation8 + $0x5fc] sm:$0xf]  ;;  %v7632_v35 = vld [vmem:[#allocation8 + $0x60c] sm:$0xf0] }
 0x1a7   :  { %v2161_v1 = vadd.f32 %v2160_v33, %v2148_v8  ;;  %3691 = vmatpush.bf16.msra.mxu1 %v6935_v10  ;;  %v8974_v8 = vld [vmem:[#allocation8 + $0x368] sm:$0xf0]  ;;  %v7270_v10 = vld [vmem:[#allocation8 + $0x328] sm:$0xf]  ;;  %v7635_v13 = vor.u32 %v9056_v9, %v7632_v35  ;;  %v7172_v9 = vld [vmem:[#allocation8 + $0x274] sm:$0xf0] }
 0x1a8   :  { %3727 = vmatpush.bf16.msra.mxu3 %v7475_v29  ;;  %v8984_v29 = vld [vmem:[#allocation8 + $0x3b8] sm:$0xf0]  ;;  %v7178_v35 = vld [vmem:[#allocation8 + $0x268] sm:$0xf] }
 0x1a9   :  { %v2174_v14 = vadd.f32 %v2173_v44, %v2161_v1  ;;  %v8973_v44 = vld [vmem:[#allocation8 + $0x360] sm:$0xf0]  ;;  %v7299_v1 = vor.u32 %v8974_v8, %v7298_v5  ;;  %v7192_v5 = vld [vmem:[#allocation8 + $0x29c] sm:$0xf0] }
 0x1aa   :  { %v2175_v50 = vpop.f32.mrf.mxu1  ;;  %v7291_v33 = vor.u32 %v8973_v44, %v7290_v63  ;;  %v8954_v63 = vld [vmem:[#allocation8 + $0x2c8] sm:$0xf0] }
 0x1ab   :  { %v2187_v18 = vadd.f32 %v2186_v38, %v2174_v14  ;;  %3692 = vmatpush.bf16.msra.mxu1 %v6915_v16  ;;  %v7339_v38 = vor.u32 %v8984_v29, %v7338_v28  ;;  %v7278_v14 = vld [vmem:[#allocation8 + $0x330] sm:$0xf]  ;;  %v8969_v50 = vld [vmem:[#allocation8 + $0x340] sm:$0xf0]  ;;  %v9051_v16 = vld [vmem:[#allocation8 + $0x5d4] sm:$0xf]  ;;  %v7255_v29 = vor.u32 %v8961_v21, %v7252_v22 }
 0x1ac   :  { %3728 = vmatpush.bf16.msra.mxu3 %v7455_v34  ;;  %v7310_v34 = vld [vmem:[#allocation8 + $0x378] sm:$0xf]  ;;  %v7279_v19 = vor.u32 %v8969_v50, %v7278_v14  ;;  %v7592_v28 = vld [vmem:[#allocation8 + $0x5bc] sm:$0xf0]  ;;  %v7532_v14 = vld [vmem:[#allocation8 + $0x544] sm:$0xf0] }
 0x1ad   :  { %v3514_v45 = vpop.f32.mrf.mxu2  ;;  %v2194_v26 = vmax.f32 %v2187_v18, 0.0  ;;  %v3503_v6 = vpop.f32.mrf.mxu0  ;;  %v7311_v47 = vor.u32 %v8978_v36, %v7310_v34  ;;  %v7250_v18 = vld [vmem:[#allocation8 + $0x300] sm:$0xf]  ;;  %v8939_v21 = vld [vmem:[#allocation8 + $0x250] sm:$0xf0] }
 0x1ae   :  { %v9731_v2 = vadd.f32 %v3514_v45, %v3502_v53  ;;  %v2162_v17 = vpop.f32.mrf.mxu3  ;;  %v8963_v53 = vld [vmem:[#allocation8 + $0x310] sm:$0xf0]  ;;  %v7615_v45 = vor.u32 %v9051_v16, %v7612_v51  ;;  %v8958_v6 = vld [vmem:[#allocation8 + $0x2e8] sm:$0xf0]  ;;  %v7238_v36 = vld [vmem:[#allocation8 + $0x2e0] sm:$0xf] }
 0x1af   :  { %v9733_v32 = vpack.c.bf16 %v2194_v26, %v2194_v26  ;;  %3693 = vmatpush.bf16.msra.mxu1 %v6895_v37  ;;  %v7251_v25 = vor.u32 %v8963_v53, %v7250_v18  ;;  %v9046_v26 = vld [vmem:[#allocation8 + $0x5ac] sm:$0xf]  ;;  %v7230_v17 = vld [vmem:[#allocation8 + $0x2d8] sm:$0xf]  ;;  %v8959_v37 = vld [vmem:[#allocation8 + $0x2f0] sm:$0xf0] }
 0x1b0   :  { %3729 = vmatpush.bf16.msra.mxu3 %v7435_v43  ;;  %v7318_v43 = vld [vmem:[#allocation8 + $0x380] sm:$0xf]  ;;  %v7595_v34 = vor.u32 %v9046_v26, %v7592_v28  ;;  %v7152_v18 = vld [vmem:[#allocation8 + $0x24c] sm:$0xf0]  ;;  %v9026_v22 = vld [vmem:[#allocation8 + $0x50c] sm:$0xf] }
 0x1b1   :  { %3552 = vmatmul.bf16.vlgmr.msra.gmra.mxu0 %v9733_v32  ;;  %3617 = vmatmul.bf16.vlgmr.msrb.gmra.mxu2 %v9733_v32  ;;  %v7319_v58 = vor.u32 %v8979_v46, %v7318_v43  ;;  %v8953_v43 = vld [vmem:[#allocation8 + $0x2c0] sm:$0xf0]  ;;  %v7239_v46 = vor.u32 %v8959_v37, %v7238_v36  ;;  %v8931_v28 = vld [vmem:[#allocation8 + $0x214] sm:$0xf]  ;;  %v7478_v36 = vld [vmem:[#allocation8 + $0x4c0] sm:$0xf] }
 0x1b2   :  { %3648 = vmatpush.bf16.msra.mxu0 %v7331_v31  ;;  %3682 = vmatmul.bf16.vlgmr.msrb.gmra.mxu3 %v9733_v32  ;;  %v7259_v31 = vor.u32 %v8964_v24, %v7258_v23  ;;  %v7211_v44 = vor.u32 %v8953_v43, %v7210_v42  ;;  %v7498_v24 = vld [vmem:[#allocation8 + $0x4e8] sm:$0xf]  ;;  %v9019_v37 = vld [vmem:[#allocation8 + $0x4d0] sm:$0xf0]  ;;  %v8929_v42 = vld [vmem:[#allocation8 + $0x200] sm:$0xf0] }
 0x1b3   :  { %3713 = vmatpush.bf16.msrb.mxu2 %v7335_v20  ;;  %3694 = vmatpush.bf16.msra.mxu1 %v6875_v57  ;;  %v8956_v20 = vld [vmem:[#allocation8 + $0x2dc] sm:$0xf]  ;;  %v7552_v57 = vld [vmem:[#allocation8 + $0x56c] sm:$0xf0]  ;;  %v7479_v43 = vor.u32 %v9019_v37, %v7478_v36 }
 0x1b4   :  { %3730 = vmatpush.bf16.msra.mxu3 %v7415_v52  ;;  %v7358_v37 = vld [vmem:[#allocation8 + $0x3d0] sm:$0xf] }
 0x1b5   :  { %v3516_v52 = vpop.f32.mrf.mxu2 }
 0x1b6   :  { %3649 = vmatpush.bf16.msra.mxu0 %v7311_v47  ;;  %3695 = vmatmul.bf16.vlgmr.msra.gmra.mxu1 %v9688_v0  ;;  %v8951_v47 = vld [vmem:[#allocation8 + $0x2b4] sm:$0xf]  ;;  %v9036_v52 = vld [vmem:[#allocation8 + $0x55c] sm:$0xf] }
 0x1b7   :  { %3714 = vmatpush.bf16.msrb.mxu2 %v7315_v49  ;;  %3739 = vmatpush.bf16.msrb.mxu1 %v7655_v4  ;;  %v7218_v49 = vld [vmem:[#allocation8 + $0x2b8] sm:$0xf]  ;;  %v8946_v4 = vld [vmem:[#allocation8 + $0x28c] sm:$0xf] }
 0x1b8   :  { %3731 = vmatpush.bf16.msra.mxu3 %v7395_v56  ;;  %v7295_v56 = vor.u32 %v8971_v60, %v7292_v41  ;;  %v7215_v60 = vor.u32 %v8951_v47, %v7212_v62  ;;  %v8948_v41 = vld [vmem:[#allocation8 + $0x298] sm:$0xf0]  ;;  %v7219_v8 = vor.u32 %v8954_v63, %v7218_v49  ;;  %v7195_v50 = vor.u32 %v8946_v4, %v7192_v5  ;;  %v7458_v47 = vld [vmem:[#allocation8 + $0x498] sm:$0xf]  ;;  %v9014_v62 = vld [vmem:[#allocation8 + $0x4a8] sm:$0xf0] }
 0x1b9   :  { %v7092_v49 = vld [vmem:[#allocation8 + $0x1d4] sm:$0xf0]  ;;  %v7098_v63 = vld [vmem:[#allocation8 + $0x1c8] sm:$0xf] }
 0x1ba   :  { %3650 = vmatpush.bf16.msra.mxu0 %v7291_v33  ;;  %v8941_v33 = vld [vmem:[#allocation8 + $0x264] sm:$0xf] }
 0x1bb   :  { %3715 = vmatpush.bf16.msrb.mxu2 %v7295_v56  ;;  %3740 = vmatpush.bf16.msrb.mxu1 %v7635_v13  ;;  %v9031_v13 = vld [vmem:[#allocation8 + $0x534] sm:$0xf] }
 0x1bc   :  { %3732 = vmatpush.bf16.msra.mxu3 %v7375_v15  ;;  %v7271_v15 = vor.u32 %v8968_v55, %v7270_v10  ;;  %v7555_v10 = vor.u32 %v9036_v52, %v7552_v57  ;;  %v8944_v55 = vld [vmem:[#allocation8 + $0x278] sm:$0xf0]  ;;  %v7535_v53 = vor.u32 %v9031_v13, %v7532_v14  ;;  %v7459_v52 = vor.u32 %v9014_v62, %v7458_v47  ;;  %v8911_v13 = vld [vmem:[#allocation8 + $0x174] sm:$0xf]  ;;  %v7052_v14 = vld [vmem:[#allocation8 + $0x184] sm:$0xf0] }
 0x1bd   :  { %v7179_v16 = vor.u32 %v8944_v55, %v7178_v35  ;;  %v8919_v35 = vld [vmem:[#allocation8 + $0x1b0] sm:$0xf0]  ;;  %v8889_v47 = vld [vmem:[#allocation8 + $0xc0] sm:$0xf0] }
 0x1be   :  { %3651 = vmatpush.bf16.msra.mxu0 %v7271_v15  ;;  %v7175_v15 = vor.u32 %v8941_v33, %v7172_v9  ;;  %v7072_v33 = vld [vmem:[#allocation8 + $0x1ac] sm:$0xf0]  ;;  %v7078_v9 = vld [vmem:[#allocation8 + $0x1a0] sm:$0xf] }
 0x1bf   :  { %3716 = vmatpush.bf16.msrb.mxu2 %v7275_v61  ;;  %3741 = vmatpush.bf16.msrb.mxu1 %v7615_v45  ;;  %v8936_v61 = vld [vmem:[#allocation8 + $0x23c] sm:$0xf]  ;;  %v7512_v45 = vld [vmem:[#allocation8 + $0x51c] sm:$0xf0] }
 0x1c0   :  { %3733 = vmatpush.bf16.msra.mxu3 %v7355_v7  ;;  %v7232_v7 = vld [vmem:[#allocation8 + $0x2ec] sm:$0xf0]  ;;  %v7155_v23 = vor.u32 %v8936_v61, %v7152_v18  ;;  %v7398_v61 = vld [vmem:[#allocation8 + $0x420] sm:$0xf]  ;;  %v8999_v18 = vld [vmem:[#allocation8 + $0x430] sm:$0xf0] }
 0x1c1   :  { %3604 = vmatmul.bf16.vlgmr.msrb.gmra.mxu0 %v9712_v30  ;;  %3669 = vmatmul.bf16.vlgmr.msra.gmra.mxu2 %v9712_v30  ;;  %v7235_v40 = vor.u32 %v8956_v20, %v7232_v7  ;;  %v8934_v20 = vld [vmem:[#allocation8 + $0x228] sm:$0xf0] }
 0x1c2   :  { %3652 = vmatpush.bf16.msra.mxu0 %v7251_v25  ;;  %v9024_v25 = vld [vmem:[#allocation8 + $0x4f8] sm:$0xf0] }
 0x1c3   :  { %3717 = vmatpush.bf16.msrb.mxu2 %v7255_v29  ;;  %3734 = vmatmul.bf16.vlgmr.msra.gmra.mxu3 %v9712_v30  ;;  %v7132_v29 = vld [vmem:[#allocation8 + $0x224] sm:$0xf0]  ;;  %v7499_v7 = vor.u32 %v9024_v25, %v7498_v24  ;;  %v8904_v24 = vld [vmem:[#allocation8 + $0x138] sm:$0xf0]  ;;  %v7399_v25 = vor.u32 %v8999_v18, %v7398_v61 }
 0x1c4   :  { %3778 = vmatpush.bf16.msrb.mxu3 %v7339_v38  ;;  %v7231_v38 = vor.u32 %v8958_v6, %v7230_v17  ;;  %3742 = vmatpush.bf16.msrb.mxu1 %v7595_v34  ;;  %v7515_v6 = vor.u32 %v9026_v22, %v7512_v45  ;;  %v7135_v34 = vor.u32 %v8931_v28, %v7132_v29  ;;  %v7038_v22 = vld [vmem:[#allocation8 + $0x150] sm:$0xf]  ;;  %v8909_v45 = vld [vmem:[#allocation8 + $0x160] sm:$0xf0]  ;;  %v7378_v29 = vld [vmem:[#allocation8 + $0x3f8] sm:$0xf] }
 0x1c6   :  { %3653 = vmatpush.bf16.msra.mxu0 %v7231_v38 }
 0x1c7   :  { %3718 = vmatpush.bf16.msrb.mxu2 %v7235_v40  ;;  %v7118_v40 = vld [vmem:[#allocation8 + $0x1f0] sm:$0xf] }
 0x1c8   :  { %3779 = vmatpush.bf16.msrb.mxu3 %v7319_v58  ;;  %v7190_v58 = vld [vmem:[#allocation8 + $0x288] sm:$0xf]  ;;  %3743 = vmatpush.bf16.msrb.mxu1 %v7575_v48  ;;  %v8921_v48 = vld [vmem:[#allocation8 + $0x1c4] sm:$0xf] }
 0x1c9   :  { %v7191_v12 = vor.u32 %v8948_v41, %v7190_v58  ;;  %v7095_v58 = vor.u32 %v8921_v48, %v7092_v49  ;;  %v9009_v41 = vld [vmem:[#allocation8 + $0x480] sm:$0xf0]  ;;  %v6938_v48 = vld [vmem:[#allocation8 + $0x88] sm:$0xf]  ;;  %v8884_v49 = vld [vmem:[#allocation8 + $0x98] sm:$0xf0] }
 0x1ca   :  { %3654 = vmatpush.bf16.msra.mxu0 %v7211_v44  ;;  %v8924_v44 = vld [vmem:[#allocation8 + $0x1d8] sm:$0xf0] }
 0x1cb   :  { %3719 = vmatpush.bf16.msrb.mxu2 %v7215_v60  ;;  %v7438_v60 = vld [vmem:[#allocation8 + $0x470] sm:$0xf]  ;;  %v7099_v5 = vor.u32 %v8924_v44, %v7098_v63  ;;  %v7802_v63 = vld [vmem:[#allocation11 + $0x118] sm:$0xf] }
 0x1cc   :  { %3780 = vmatpush.bf16.msrb.mxu3 %v7299_v1  ;;  %v7198_v1 = vld [vmem:[#allocation8 + $0x290] sm:$0xf]  ;;  %3744 = vmatpush.bf16.msrb.mxu1 %v7555_v10  ;;  %v7439_v10 = vor.u32 %v9009_v41, %v7438_v60  ;;  %v8879_v60 = vld [vmem:[#allocation8 + $0x70] sm:$0xf0] }
 0x1cd   :  { %v9742_v56 = vpop.f32.mrf.mxu2  ;;  %v7199_v51 = vor.u32 %v8949_v11, %v7198_v1  ;;  %v7418_v1 = vld [vmem:[#allocation8 + $0x448] sm:$0xf]  ;;  %v9004_v11 = vld [vmem:[#allocation8 + $0x458] sm:$0xf0]  ;;  %v9102_v44 = vld [vmem:[#allocation11 + $0x128] sm:$0xf0] }
 0x1ce   :  { %3655 = vmatpush.bf16.msra.mxu0 %v7191_v12  ;;  %v7079_v12 = vor.u32 %v8919_v35, %v7078_v9  ;;  %v7782_v41 = vld [vmem:[#allocation11 + $0xf0] sm:$0xf]  ;;  %v9142_v9 = vld [vmem:[#allocation11 + $0x268] sm:$0xf0] }
 0x1cf   :  { %3720 = vmatpush.bf16.msrb.mxu2 %v7195_v50  ;;  %v7058_v50 = vld [vmem:[#allocation8 + $0x178] sm:$0xf] }
 0x1d0   :  { %3781 = vmatpush.bf16.msrb.mxu3 %v7279_v19  ;;  %v7158_v19 = vld [vmem:[#allocation8 + $0x240] sm:$0xf]  ;;  %3745 = vmatpush.bf16.msrb.mxu1 %v7535_v53 }
 0x1d1   :  { %v7159_v26 = vor.u32 %v8939_v21, %v7158_v19  ;;  %3656 = vmatmul.bf16.vlgmr.msra.gmra.mxu0 %v9703_v59  ;;  %v8906_v19 = vld [vmem:[#allocation8 + $0x14c] sm:$0xf]  ;;  %v7032_v21 = vld [vmem:[#allocation8 + $0x15c] sm:$0xf0] }
 0x1d2   :  { %3700 = vmatpush.bf16.msrb.mxu0 %v7175_v15  ;;  %3721 = vmatmul.bf16.vlgmr.msrb.gmra.mxu2 %v9703_v59  ;;  %v3527_v57 = vpop.f32.mrf.mxu3  ;;  %v8914_v15 = vld [vmem:[#allocation8 + $0x188] sm:$0xf0]  ;;  %v7035_v28 = vor.u32 %v8906_v19, %v7032_v21  ;;  %v7658_v19 = vld [vmem:[#allocation8 + $0x628] sm:$0xf]  ;;  %v9064_v21 = vld [vmem:[#allocation8 + $0x638] sm:$0xf0] }
 0x1d3   :  { %3765 = vmatpush.bf16.msra.mxu2 %v7179_v16  ;;  %v9749_v4 = vadd.f32 %v3527_v57, %v9731_v2  ;;  %v7419_v2 = vor.u32 %v9004_v11, %v7418_v1  ;;  %v7059_v53 = vor.u32 %v8914_v15, %v7058_v50  ;;  %v6939_v57 = vor.u32 %v8884_v49, %v6938_v48  ;;  %v7762_v1 = vld [vmem:[#allocation11 + $0xc8] sm:$0xf]  ;;  %v9092_v11 = vld [vmem:[#allocation11 + $0xd8] sm:$0xf0]  ;;  %v9137_v50 = vld [vmem:[#allocation11 + $0x240] sm:$0xf0] }
 0x1d4   :  { %3782 = vmatpush.bf16.msrb.mxu3 %v7259_v31  ;;  %v7138_v31 = vld [vmem:[#allocation8 + $0x218] sm:$0xf]  ;;  %3746 = vmatpush.bf16.msrb.mxu1 %v7515_v6  ;;  %v7039_v6 = vor.u32 %v8909_v45, %v7038_v22  ;;  %v8122_v15 = vld [vmem:[#allocation11 + $0x398] sm:$0xf]  ;;  %v7742_v45 = vld [vmem:[#allocation11 + $0xa0] sm:$0xf] }
 0x1d5   :  { %v3568_v17 = vpop.f32.mrf.mxu2  ;;  %v7139_v38 = vor.u32 %v8934_v20, %v7138_v31  ;;  %v6998_v20 = vld [vmem:[#allocation8 + $0x100] sm:$0xf] }
 0x1d6   :  { %3701 = vmatpush.bf16.msrb.mxu0 %v7155_v23  ;;  %v7018_v23 = vld [vmem:[#allocation8 + $0x128] sm:$0xf]  ;;  %v8994_v17 = vld [vmem:[#allocation8 + $0x408] sm:$0xf0] }
 0x1d7   :  { %3766 = vmatpush.bf16.msra.mxu2 %v7159_v26  ;;  %3747 = vmatmul.bf16.vlgmr.msrb.gmra.mxu1 %v9733_v32  ;;  %v2443_v26 = vperm.slane %v9727_v54, 1  ;;  %v7019_v31 = vor.u32 %v8904_v24, %v7018_v23  ;;  %v9087_v23 = vld [vmem:[#allocation11 + $0xb0] sm:$0xf0]  ;;  %v7922_v24 = vld [vmem:[#allocation11 + $0x208] sm:$0xf] }
 0x1d8   :  { %3783 = vmatpush.bf16.msrb.mxu3 %v7239_v46  ;;  %3791 = vmatpush.bf16.msra.mxu1 %v7499_v7  ;;  %v7115_v46 = vor.u32 %v8926_v39, %v7112_v27  ;;  %v8899_v7 = vld [vmem:[#allocation8 + $0x110] sm:$0xf0] }
 0x1d9   :  { %v3567_v36 = vadd.f32 %v9742_v56, %v2443_v26  ;;  %v6999_v54 = vor.u32 %v8899_v7, %v6998_v20  ;;  %v6958_v56 = vld [vmem:[#allocation8 + $0xb0] sm:$0xf]  ;;  %v9132_v26 = vld [vmem:[#allocation11 + $0x218] sm:$0xf0]  ;;  %v7659_v7 = vor.u32 %v9064_v21, %v7658_v19  ;;  %v8022_v21 = vld [vmem:[#allocation11 + $0x2d0] sm:$0xf] }
 0x1da   :  { %3702 = vmatpush.bf16.msrb.mxu0 %v7135_v34  ;;  %v3529_v16 = vpop.f32.mrf.mxu3  ;;  %v7379_v34 = vor.u32 %v8994_v17, %v7378_v29  ;;  %v9177_v29 = vld [vmem:[#allocation11 + $0x380] sm:$0xf0]  ;;  %v7923_v17 = vor.u32 %v9132_v26, %v7922_v24  ;;  %v7638_v20 = vld [vmem:[#allocation8 + $0x600] sm:$0xf]  ;;  %v9039_v26 = vld [vmem:[#allocation8 + $0x570] sm:$0xf0] }
 0x1db   :  { %3767 = vmatpush.bf16.msra.mxu2 %v7139_v38  ;;  %v8989_v38 = vld [vmem:[#allocation8 + $0x3e0] sm:$0xf0]  ;;  %v6878_v16 = vld [vmem:[#allocation8 + $0x10] sm:$0xf] }
 0x1dc   :  { %3784 = vmatpush.bf16.msrb.mxu3 %v7219_v8  ;;  %3792 = vmatpush.bf16.msra.mxu1 %v7479_v43  ;;  %v8916_v8 = vld [vmem:[#allocation8 + $0x19c] sm:$0xf]  ;;  %v7359_v43 = vor.u32 %v8989_v38, %v7358_v37  ;;  %v9082_v37 = vld [vmem:[#allocation11 + $0x88] sm:$0xf0]  ;;  %v9112_v19 = vld [vmem:[#allocation11 + $0x178] sm:$0xf0] }
 0x1dd   :  { %v7075_v55 = vor.u32 %v8916_v8, %v7072_v33  ;;  %v7962_v33 = vld [vmem:[#allocation11 + $0x258] sm:$0xf] }
 0x1de   :  { %3703 = vmatpush.bf16.msrb.mxu0 %v7115_v46  ;;  %v7963_v35 = vor.u32 %v9142_v9, %v7962_v33  ;;  %v9049_v9 = vld [vmem:[#allocation8 + $0x5c0] sm:$0xf0] }
 0x1e0   :  { %3785 = vmatpush.bf16.msrb.mxu3 %v7199_v51  ;;  %3793 = vmatpush.bf16.msra.mxu1 %v7459_v52  ;;  %v7055_v51 = vor.u32 %v8911_v13, %v7052_v14  ;;  %v7803_v52 = vor.u32 %v9102_v44, %v7802_v63  ;;  %v7763_v14 = vor.u32 %v9092_v11, %v7762_v1  ;;  %v9122_v44 = vld [vmem:[#allocation11 + $0x1c8] sm:$0xf0]  ;;  %v9117_v1 = vld [vmem:[#allocation11 + $0x1a0] sm:$0xf0]  ;;  %v8042_v11 = vld [vmem:[#allocation11 + $0x2f8] sm:$0xf] }
 0x1e2   :  { %3704 = vmatpush.bf16.msrb.mxu0 %v7095_v58  ;;  %v6918_v58 = vld [vmem:[#allocation8 + $0x60] sm:$0xf] }
 0x1e3   :  { %3786 = vmatmul.bf16.vlgmr.msrb.gmra.mxu3 %v9703_v59  ;;  %v7119_v59 = vor.u32 %v8929_v42, %v7118_v40  ;;  %v6978_v40 = vld [vmem:[#allocation8 + $0xd8] sm:$0xf]  ;;  %v8894_v42 = vld [vmem:[#allocation8 + $0xe8] sm:$0xf0] }
 0x1e4   :  { %3794 = vmatpush.bf16.msra.mxu1 %v7439_v10  ;;  %v6979_v46 = vor.u32 %v8894_v42, %v6978_v40  ;;  %v6919_v10 = vor.u32 %v8879_v60, %v6918_v58  ;;  %5132 = vmatpush.bf16.msra.mxu3 %v7963_v35  ;;  %v9127_v40 = vld [vmem:[#allocation11 + $0x1f0] sm:$0xf0]  ;;  %v8082_v42 = vld [vmem:[#allocation11 + $0x348] sm:$0xf] }
 0x1e5   :  { %3768 = vmatpush.bf16.msra.mxu2 %v7119_v59  ;;  %v6959_v59 = vor.u32 %v8889_v47, %v6958_v56  ;;  %v7702_v47 = vld [vmem:[#allocation11 + $0x50] sm:$0xf]  ;;  %v9054_v60 = vld [vmem:[#allocation8 + $0x5e8] sm:$0xf0] }
 0x1e6   :  { %3705 = vmatpush.bf16.msrb.mxu0 %v7075_v55  ;;  %v3579_v39 = vpop.f32.mrf.mxu3  ;;  %v8874_v55 = vld [vmem:[#allocation8 + $0x48] sm:$0xf0]  ;;  %v7618_v58 = vld [vmem:[#allocation8 + $0x5d8] sm:$0xf] }
 0x1e7   :  { %v9753_v27 = vadd.f32 %v3579_v39, %v3567_v36  ;;  %v7722_v36 = vld [vmem:[#allocation11 + $0x78] sm:$0xf]  ;;  %v7619_v33 = vor.u32 %v9054_v60, %v7618_v58  ;;  %v7682_v35 = vld [vmem:[#allocation11 + $0x28] sm:$0xf]  ;;  %v9222_v58 = vld [vmem:[#allocation11 + $0x4e8] sm:$0xf0] }
 0x1e8   :  { %3795 = vmatpush.bf16.msra.mxu1 %v7419_v2  ;;  %v9182_v2 = vld [vmem:[#allocation11 + $0x3a8] sm:$0xf0]  ;;  %v7723_v39 = vor.u32 %v9082_v37, %v7722_v36 }
 0x1e9   :  { %3769 = vmatpush.bf16.msra.mxu2 %v7099_v5  ;;  %v9097_v5 = vld [vmem:[#allocation11 + $0x100] sm:$0xf0]  ;;  %v8123_v61 = vor.u32 %v9182_v2, %v8122_v15  ;;  %v9090_v60 = vld [vmem:[#allocation11 + $0xcc] sm:$0xf] }
 0x1ea   :  { %3706 = vmatpush.bf16.msrb.mxu0 %v7055_v51  ;;  %v7783_v8 = vor.u32 %v9097_v5, %v7782_v41 }
 0x1ec   :  { %3796 = vmatpush.bf16.msra.mxu1 %v7399_v25  ;;  %v7743_v25 = vor.u32 %v9087_v23, %v7742_v45  ;;  %v9157_v45 = vld [vmem:[#allocation11 + $0x2e0] sm:$0xf0] }
 0x1ed   :  { %3770 = vmatpush.bf16.msra.mxu2 %v7079_v12  ;;  %v7942_v12 = vld [vmem:[#allocation11 + $0x230] sm:$0xf]  ;;  %v8023_v23 = vor.u32 %v9157_v45, %v8022_v21  ;;  %v7904_v21 = vld [vmem:[#allocation11 + $0x1f4] sm:$0xf0] }
 0x1ee   :  { %3707 = vmatpush.bf16.msrb.mxu0 %v7035_v28  ;;  %v3581_v62 = vpop.f32.mrf.mxu3  ;;  %v7943_v51 = vor.u32 %v9137_v50, %v7942_v12  ;;  %v8102_v28 = vld [vmem:[#allocation11 + $0x370] sm:$0xf]  ;;  %v7578_v50 = vld [vmem:[#allocation8 + $0x588] sm:$0xf] }
 0x1ef   :  { %v9077_v62 = vld [vmem:[#allocation11 + $0x60] sm:$0xf0] }
 0x1f0   :  { %3797 = vmatpush.bf16.msra.mxu1 %v7379_v34  ;;  %5133 = vmatpush.bf16.msra.mxu3 %v7943_v51  ;;  %v9059_v34 = vld [vmem:[#allocation8 + $0x610] sm:$0xf0]  ;;  %v7703_v63 = vor.u32 %v9077_v62, %v7702_v47  ;;  %v7662_v51 = vld [vmem:[#allocation11] sm:$0xf]  ;;  %v9140_v47 = vld [vmem:[#allocation11 + $0x25c] sm:$0xf] }
 0x1f1   :  { %3771 = vmatpush.bf16.msra.mxu2 %v7059_v53  ;;  %3708 = vmatmul.bf16.vlgmr.msrb.gmra.mxu0 %v9690_v3  ;;  %v8869_v53 = vld [vmem:[#allocation8 + $0x20] sm:$0xf0]  ;;  %v7639_v49 = vor.u32 %v9059_v34, %v7638_v20  ;;  %v7804_v34 = vld [vmem:[#allocation11 + $0x12c] sm:$0xf0] }
 0x1f2   :  { %3752 = vmatpush.bf16.msra.mxu0 %v7019_v31  ;;  %v6879_v31 = vor.u32 %v8869_v53, %v6878_v16  ;;  %v9044_v16 = vld [vmem:[#allocation8 + $0x598] sm:$0xf0]  ;;  %v7842_v53 = vld [vmem:[#allocation11 + $0x168] sm:$0xf]  ;;  %v9100_v20 = vld [vmem:[#allocation11 + $0x11c] sm:$0xf] }
 0x1f3   :  { %v7579_v24 = vor.u32 %v9044_v16, %v7578_v50  ;;  %v8242_v16 = vld [vmem:[#allocation11 + $0x488] sm:$0xf] }
 0x1f4   :  { %3798 = vmatpush.bf16.msra.mxu1 %v7359_v43  ;;  %5134 = vmatpush.bf16.msra.mxu3 %v7923_v17 }
 0x1f5   :  { %3772 = vmatpush.bf16.msra.mxu2 %v7039_v6  ;;  %v8103_v6 = vor.u32 %v9177_v29, %v8102_v28  ;;  %v7822_v28 = vld [vmem:[#allocation11 + $0x140] sm:$0xf]  ;;  %v9107_v29 = vld [vmem:[#allocation11 + $0x150] sm:$0xf0] }
 0x1f6   :  { %3753 = vmatpush.bf16.msra.mxu0 %v6999_v54  ;;  %v7902_v54 = vld [vmem:[#allocation11 + $0x1e0] sm:$0xf]  ;;  %v7823_v17 = vor.u32 %v9107_v29, %v7822_v28  ;;  %v9120_v28 = vld [vmem:[#allocation11 + $0x1bc] sm:$0xf] }
 0x1f7   :  { %3799 = vmatmul.bf16.vlgmr.msra.gmra.mxu1 %v9712_v30  ;;  %v6898_v30 = vld [vmem:[#allocation8 + $0x38] sm:$0xf]  ;;  %v7903_v43 = vor.u32 %v9127_v40, %v7902_v54 }
 0x1f8   :  { %3773 = vmatmul.bf16.vlgmr.msra.gmra.mxu2 %v9690_v3  ;;  %v9758_v3 = vpop.f32.mrf.mxu1  ;;  %v6899_v18 = vor.u32 %v8874_v55, %v6898_v30  ;;  %5145 = vmatpush.bf16.msrb.mxu1 %v8123_v61  ;;  %v7862_v55 = vld [vmem:[#allocation11 + $0x190] sm:$0xf]  ;;  %v9067_v61 = vld [vmem:[#allocation11 + $0x10] sm:$0xf0] }
 0x1f9   :  { %5119 = vmatpush.bf16.msrb.mxu2 %v7803_v52  ;;  %5135 = vmatpush.bf16.msra.mxu3 %v7903_v43  ;;  %v8062_v52 = vld [vmem:[#allocation11 + $0x320] sm:$0xf]  ;;  %v7863_v12 = vor.u32 %v9117_v1, %v7862_v55  ;;  %v9147_v54 = vld [vmem:[#allocation11 + $0x290] sm:$0xf0]  ;;  %v8262_v55 = vld [vmem:[#allocation11 + $0x4b0] sm:$0xf] }
 0x1fa   :  { %3754 = vmatpush.bf16.msra.mxu0 %v6979_v46  ;;  %v9172_v46 = vld [vmem:[#allocation11 + $0x358] sm:$0xf0]  ;;  %v7538_v40 = vld [vmem:[#allocation8 + $0x538] sm:$0xf]  ;;  %v9217_v1 = vld [vmem:[#allocation11 + $0x4c0] sm:$0xf0] }
 0x1fb   :  { %v8083_v56 = vor.u32 %v9172_v46, %v8082_v42  ;;  %v9034_v42 = vld [vmem:[#allocation8 + $0x548] sm:$0xf0]  ;;  %v9095_v46 = vld [vmem:[#allocation11 + $0xf4] sm:$0xf] }
 0x1fc   :  { %5146 = vmatpush.bf16.msrb.mxu1 %v8103_v6  ;;  %v8002_v6 = vld [vmem:[#allocation11 + $0x2a8] sm:$0xf] }
 0x1fd   :  { %5120 = vmatpush.bf16.msrb.mxu2 %v7783_v8  ;;  %v7598_v8 = vld [vmem:[#allocation8 + $0x5b0] sm:$0xf] }
 0x1fe   :  { %3755 = vmatpush.bf16.msra.mxu0 %v6959_v59  ;;  %v7882_v59 = vld [vmem:[#allocation11 + $0x1b8] sm:$0xf]  ;;  %v7599_v2 = vor.u32 %v9049_v9, %v7598_v8 }
 0x1ff   :  { %v7883_v41 = vor.u32 %v9122_v44, %v7882_v59  ;;  %v7964_v59 = vld [vmem:[#allocation11 + $0x26c] sm:$0xf0] }
 0x200   :  { %v3542_v22 = vpop.f32.mrf.mxu1  ;;  %5147 = vmatpush.bf16.msrb.mxu1 %v8083_v56  ;;  %v7784_v56 = vld [vmem:[#allocation11 + $0x104] sm:$0xf0]  ;;  %v7967_v44 = vor.u32 %v9140_v47, %v7964_v59  ;;  %v8182_v47 = vld [vmem:[#allocation11 + $0x410] sm:$0xf]  ;;  %v7664_v59 = vld [vmem:[#allocation11 + $0x14] sm:$0xf0] }
 0x201   :  { %5121 = vmatpush.bf16.msrb.mxu2 %v7763_v14  ;;  %5136 = vmatpush.bf16.msra.mxu3 %v7883_v41  ;;  %v9162_v14 = vld [vmem:[#allocation11 + $0x308] sm:$0xf0]  ;;  %v7843_v22 = vor.u32 %v9112_v19, %v7842_v53  ;;  %v7787_v62 = vor.u32 %v9095_v46, %v7784_v56  ;;  %v7764_v41 = vld [vmem:[#allocation11 + $0xdc] sm:$0xf0]  ;;  %v9125_v53 = vld [vmem:[#allocation11 + $0x1e4] sm:$0xf] }
 0x202   :  { %3756 = vmatpush.bf16.msra.mxu0 %v6939_v57  ;;  %v9167_v57 = vld [vmem:[#allocation11 + $0x330] sm:$0xf0]  ;;  %v8043_v15 = vor.u32 %v9162_v14, %v8042_v11  ;;  %v7767_v8 = vor.u32 %v9090_v60, %v7764_v41  ;;  %v9085_v11 = vld [vmem:[#allocation11 + $0xa4] sm:$0xf]  ;;  %v9130_v14 = vld [vmem:[#allocation11 + $0x20c] sm:$0xf] }
 0x203   :  { %v8063_v5 = vor.u32 %v9167_v57, %v8062_v52  ;;  %v9029_v52 = vld [vmem:[#allocation8 + $0x520] sm:$0xf0]  ;;  %v8282_v57 = vld [vmem:[#allocation11 + $0x4d8] sm:$0xf] }
 0x205   :  { %5122 = vmatpush.bf16.msrb.mxu2 %v7743_v25  ;;  %5148 = vmatpush.bf16.msrb.mxu1 %v8063_v5  ;;  %v7558_v25 = vld [vmem:[#allocation8 + $0x560] sm:$0xf]  ;;  %v9135_v5 = vld [vmem:[#allocation11 + $0x234] sm:$0xf] }
 0x206   :  { %v9760_v13 = vpop.f32.mrf.mxu3  ;;  %3757 = vmatpush.bf16.msra.mxu0 %v6919_v10  ;;  %v9072_v10 = vld [vmem:[#allocation11 + $0x38] sm:$0xf0]  ;;  %5137 = vmatpush.bf16.msra.mxu3 %v7863_v12  ;;  %v7559_v37 = vor.u32 %v9039_v26, %v7558_v25  ;;  %v7744_v12 = vld [vmem:[#allocation11 + $0xb4] sm:$0xf0]  ;;  %v9075_v25 = vld [vmem:[#allocation11 + $0x54] sm:$0xf] }
 0x207   :  { %v7683_v30 = vor.u32 %v9072_v10, %v7682_v35  ;;  %v7747_v50 = vor.u32 %v9085_v11, %v7744_v12  ;;  %v7704_v26 = vld [vmem:[#allocation11 + $0x64] sm:$0xf0]  ;;  %v9180_v12 = vld [vmem:[#allocation11 + $0x39c] sm:$0xf] }
 0x208   :  { %v9762_v48 = vpop.f32.mrf.mxu1  ;;  %v7707_v29 = vor.u32 %v9075_v25, %v7704_v26  ;;  %v9783_v26 = vld [vmem:[#allocation10] sm:$0x1f] }
 0x209   :  { %5123 = vmatpush.bf16.msrb.mxu2 %v7723_v39  ;;  %5149 = vmatpush.bf16.msrb.mxu1 %v8043_v15  ;;  %v7982_v39 = vld [vmem:[#allocation11 + $0x280] sm:$0xf] }
 0x20a   :  { %3758 = vmatpush.bf16.msra.mxu0 %v6899_v18  ;;  %v7663_v18 = vor.u32 %v9067_v61, %v7662_v51  ;;  %5138 = vmatpush.bf16.msra.mxu3 %v7843_v22  ;;  %v7983_v43 = vor.u32 %v9147_v54, %v7982_v39  ;;  %v7924_v15 = vld [vmem:[#allocation11 + $0x21c] sm:$0xf0]  ;;  %v9212_v51 = vld [vmem:[#allocation11 + $0x498] sm:$0xf0]  ;;  %v7907_v22 = vor.u32 %v9125_v53, %v7904_v21  ;;  %v9115_v54 = vld [vmem:[#allocation11 + $0x194] sm:$0xf] }
 0x20b   :  { %v9080_v61 = vld [vmem:[#allocation11 + $0x7c] sm:$0xf]  ;;  %v8243_v45 = vor.u32 %v9212_v51, %v8242_v16  ;;  %v7684_v39 = vld [vmem:[#allocation11 + $0x3c] sm:$0xf0]  ;;  %v8104_v53 = vld [vmem:[#allocation11 + $0x384] sm:$0xf0] }
 0x20d   :  { %5124 = vmatpush.bf16.msrb.mxu2 %v7703_v63  ;;  %5150 = vmatpush.bf16.msrb.mxu1 %v8023_v23  ;;  %v7518_v63 = vld [vmem:[#allocation8 + $0x510] sm:$0xf]  ;;  %v8222_v23 = vld [vmem:[#allocation11 + $0x460] sm:$0xf] }
 0x20e   :  { %v3633_v38 = vpop.f32.mrf.mxu3  ;;  %3759 = vmatpush.bf16.msra.mxu0 %v6879_v31  ;;  %v9152_v31 = vld [vmem:[#allocation11 + $0x2b8] sm:$0xf0]  ;;  %5139 = vmatpush.bf16.msra.mxu3 %v7823_v17  ;;  %v7519_v35 = vor.u32 %v9029_v52, %v7518_v63  ;;  %v7884_v17 = vld [vmem:[#allocation11 + $0x1cc] sm:$0xf0]  ;;  %v7844_v52 = vld [vmem:[#allocation11 + $0x17c] sm:$0xf0] }
 0x20f   :  { %v7807_v38 = vor.u32 %v9100_v20, %v7804_v34  ;;  %v9202_v34 = vld [vmem:[#allocation11 + $0x448] sm:$0xf0] }
 0x211   :  { %3760 = vmatmul.bf16.vlgmr.msra.gmra.mxu0 %v9688_v0  ;;  %5125 = vmatpush.bf16.msrb.mxu2 %v7683_v30  ;;  %v3594_v0 = vpop.f32.mrf.mxu1  ;;  %v8283_v30 = vor.u32 %v9222_v58, %v8282_v57 }
 0x212   :  { %3804 = vmatpush.bf16.msrb.mxu0 %v7659_v7  ;;  %v8003_v7 = vor.u32 %v9152_v31, %v8002_v6  ;;  %5184 = vmatpush.bf16.msrb.mxu3 %v7807_v38  ;;  %v7927_v0 = vor.u32 %v9130_v14, %v7924_v15  ;;  %v3541_v6 = vadd.f32 %v9758_v3, %v9749_v4  ;;  %v9070_v38 = vld [vmem:[#allocation11 + $0x2c] sm:$0xf]  ;;  %v9197_v4 = vld [vmem:[#allocation11 + $0x420] sm:$0xf0]  ;;  %v8124_v14 = vld [vmem:[#allocation11 + $0x3ac] sm:$0xf0] }
 0x213   :  { %v7887_v31 = vor.u32 %v9120_v28, %v7884_v17  ;;  %v8183_v41 = vor.u32 %v9197_v4, %v8182_v47  ;;  %v8127_v51 = vor.u32 %v9180_v12, %v8124_v14  ;;  %v2444_v28 = vperm.slane %v9783_v26, 2  ;;  %v9165_v17 = vld [vmem:[#allocation11 + $0x324] sm:$0xf]  ;;  %v9260_v47 = vld [vmem:[#allocation11 + $0x61c] sm:$0xf] }
 0x214   :  { %5151 = vmatpush.bf16.msrb.mxu1 %v8003_v7  ;;  %v8202_v7 = vld [vmem:[#allocation11 + $0x438] sm:$0xf] }
 0x215   :  { %5126 = vmatpush.bf16.msrb.mxu2 %v7663_v18  ;;  %v7724_v18 = vld [vmem:[#allocation11 + $0x8c] sm:$0xf0]  ;;  %v8203_v56 = vor.u32 %v9202_v34, %v8202_v7  ;;  %v7790_v14 = vld [vmem:[#allocation11 + $0xf8] sm:$0xf] }
 0x216   :  { %3805 = vmatpush.bf16.msrb.mxu0 %v7639_v49  ;;  %v7539_v49 = vor.u32 %v9034_v42, %v7538_v40  ;;  %5185 = vmatpush.bf16.msrb.mxu3 %v7787_v62  ;;  %v7727_v19 = vor.u32 %v9080_v61, %v7724_v18  ;;  %v7687_v40 = vor.u32 %v9070_v38, %v7684_v39  ;;  %v7864_v42 = vld [vmem:[#allocation11 + $0x1a4] sm:$0xf0]  ;;  %v9065_v62 = vld [vmem:[#allocation11 + $0x4] sm:$0xf]  ;;  %v9175_v18 = vld [vmem:[#allocation11 + $0x374] sm:$0xf] }
 0x217   :  { %v7867_v46 = vor.u32 %v9115_v54, %v7864_v42  ;;  %v8044_v7 = vld [vmem:[#allocation11 + $0x30c] sm:$0xf0]  ;;  %v9155_v42 = vld [vmem:[#allocation11 + $0x2d4] sm:$0xf] }
 0x218   :  { %5152 = vmatpush.bf16.msrb.mxu1 %v7983_v43 }
 0x219   :  { %v9765_v36 = vpop.f32.mrf.mxu1 }
 0x21a   :  { %3806 = vmatpush.bf16.msrb.mxu0 %v7619_v33  ;;  %v7944_v33 = vld [vmem:[#allocation11 + $0x244] sm:$0xf0]  ;;  %5186 = vmatpush.bf16.msrb.mxu3 %v7767_v8  ;;  %v9192_v8 = vld [vmem:[#allocation11 + $0x3f8] sm:$0xf0] }
 0x21b   :  { %v7947_v10 = vor.u32 %v9135_v5, %v7944_v33  ;;  %v8162_v5 = vld [vmem:[#allocation11 + $0x3e8] sm:$0xf]  ;;  %v9105_v33 = vld [vmem:[#allocation11 + $0x144] sm:$0xf] }
 0x21c   :  { %5197 = vmatpush.bf16.msra.mxu1 %v7967_v44  ;;  %v7667_v44 = vor.u32 %v9065_v62, %v7664_v59  ;;  %v7810_v59 = vld [vmem:[#allocation11 + $0x120] sm:$0xf] }
 0x21e   :  { %3807 = vmatpush.bf16.msrb.mxu0 %v7599_v2  ;;  %v8263_v2 = vor.u32 %v9217_v1, %v8262_v55  ;;  %5187 = vmatpush.bf16.msrb.mxu3 %v7747_v50  ;;  %v8142_v55 = vld [vmem:[#allocation11 + $0x3c0] sm:$0xf]  ;;  %v9187_v1 = vld [vmem:[#allocation11 + $0x3d0] sm:$0xf0]  ;;  %v3593_v50 = vadd.f32 %v9762_v48, %v9753_v27 }
 0x220   :  { %5198 = vmatpush.bf16.msra.mxu1 %v7947_v10 }
 0x221   :  { %v3646_v9 = vpop.f32.mrf.mxu1 }
 0x222   :  { %3808 = vmatpush.bf16.msrb.mxu0 %v7579_v24  ;;  %v9207_v24 = vld [vmem:[#allocation11 + $0x470] sm:$0xf0]  ;;  %5188 = vmatpush.bf16.msrb.mxu3 %v7727_v19  ;;  %v7824_v9 = vld [vmem:[#allocation11 + $0x154] sm:$0xf0] }
 0x223   :  { %v7827_v10 = vor.u32 %v9105_v33, %v7824_v9 }
 0x224   :  { %5199 = vmatpush.bf16.msra.mxu1 %v7927_v0 }
 0x226   :  { %3809 = vmatpush.bf16.msrb.mxu0 %v7559_v37  ;;  %5189 = vmatpush.bf16.msrb.mxu3 %v7707_v29 }
 0x228   :  { %5200 = vmatpush.bf16.msra.mxu1 %v7907_v22  ;;  %v8107_v22 = vor.u32 %v9175_v18, %v8104_v53  ;;  %v9250_v18 = vld [vmem:[#allocation11 + $0x5cc] sm:$0xf]  ;;  %v8404_v53 = vld [vmem:[#allocation11 + $0x5dc] sm:$0xf0] }
 0x22a   :  { %3810 = vmatpush.bf16.msrb.mxu0 %v7539_v49  ;;  %5190 = vmatpush.bf16.msrb.mxu3 %v7687_v40  ;;  %v9110_v49 = vld [vmem:[#allocation11 + $0x16c] sm:$0xf] }
 0x22b   :  { %v7847_v58 = vor.u32 %v9110_v49, %v7844_v52  ;;  %v9150_v52 = vld [vmem:[#allocation11 + $0x2ac] sm:$0xf] }
 0x22c   :  { %5201 = vmatpush.bf16.msra.mxu1 %v7887_v31  ;;  %v3632_v31 = vadd.f32 %v9760_v13, %v2444_v28  ;;  %v8444_v13 = vld [vmem:[#allocation11 + $0x62c] sm:$0xf0]  ;;  %v9245_v28 = vld [vmem:[#allocation11 + $0x5a4] sm:$0xf] }
 0x22d   :  { %v8447_v49 = vor.u32 %v9260_v47, %v8444_v13  ;;  %v9083_v47 = vld [vmem:[#allocation11 + $0x90] sm:$0xf0] }
 0x22e   :  { %3811 = vmatpush.bf16.msrb.mxu0 %v7519_v35  ;;  %v3553_v20 = vpop.f32.mrf.mxu0  ;;  %5191 = vmatpush.bf16.msrb.mxu3 %v7667_v44  ;;  %v3645_v34 = vadd.f32 %v9765_v36, %v3632_v31  ;;  %v9103_v44 = vld [vmem:[#allocation11 + $0x130] sm:$0xf0]  ;;  %v8384_v31 = vld [vmem:[#allocation11 + $0x5b4] sm:$0xf0] }
 0x22f   :  { %v3554_v37 = vadd.f32 %v3553_v20, %v3541_v6  ;;  %v8064_v6 = vld [vmem:[#allocation11 + $0x334] sm:$0xf0]  ;;  %v9235_v13 = vld [vmem:[#allocation11 + $0x554] sm:$0xf] }
 0x230   :  { %5202 = vmatpush.bf16.msra.mxu1 %v7867_v46  ;;  %v8067_v20 = vor.u32 %v9165_v17, %v8064_v6  ;;  %v8442_v46 = vld [vmem:[#allocation11 + $0x618] sm:$0xf] }
 0x231   :  { %3812 = vmatmul.bf16.vlgmr.msrb.gmra.mxu0 %v9733_v32  ;;  %v8223_v32 = vor.u32 %v9207_v24, %v8222_v23  ;;  %v3817_v43 = vmax.f32 %v3554_v37, 0.0  ;;  %v8084_v23 = vld [vmem:[#allocation11 + $0x35c] sm:$0xf0] }
 0x232   :  { %5158 = vmatpush.bf16.msra.mxu0 %v8283_v30  ;;  %v8163_v30 = vor.u32 %v9192_v8, %v8162_v5  ;;  %v9255_v5 = vld [vmem:[#allocation11 + $0x5f4] sm:$0xf] }
 0x233   :  { %v9770_v3 = vpack.c.bf16 %v3817_v43, %v3817_v43  ;;  %v9775_v35 = vpop.f32.mrf.mxu1  ;;  %v8024_v43 = vld [vmem:[#allocation11 + $0x2e4] sm:$0xf0] }
 0x234   :  { %v3618_v63 = vpop.f32.mrf.mxu2  ;;  %5203 = vmatpush.bf16.msra.mxu1 %v7847_v58  ;;  %v8027_v36 = vor.u32 %v9155_v42, %v8024_v43  ;;  %v8004_v58 = vld [vmem:[#allocation11 + $0x2bc] sm:$0xf0]  ;;  %v8364_v42 = vld [vmem:[#allocation11 + $0x58c] sm:$0xf0] }
 0x235   :  { %v9772_v57 = vpop.f32.mrf.mxu3  ;;  %5127 = vmatmul.bf16.vlgmr.msrb.gmra.mxu2 %v9770_v3 }
 0x236   :  { %5159 = vmatpush.bf16.msra.mxu0 %v8263_v2  ;;  %v3555_v60 = vpop.f32.mrf.mxu0  ;;  %v8143_v2 = vor.u32 %v9187_v1, %v8142_v55  ;;  %v7811_v1 = vor.u32 %v9103_v44, %v7810_v59 }
 0x237   :  { %v8422_v60 = vld [vmem:[#allocation11 + $0x5f0] sm:$0xf] }
 0x238   :  { %5204 = vmatpush.bf16.msra.mxu1 %v7827_v10 }
 0x23a   :  { %5160 = vmatpush.bf16.msra.mxu0 %v8243_v45  ;;  %v9170_v45 = vld [vmem:[#allocation11 + $0x34c] sm:$0xf] }
 0x23b   :  { %v3698_v61 = vpop.f32.mrf.mxu1  ;;  %v8087_v29 = vor.u32 %v9170_v45, %v8084_v23  ;;  %v9093_v45 = vld [vmem:[#allocation11 + $0xe0] sm:$0xf0] }
 0x23c   :  { %v3620_v11 = vpop.f32.mrf.mxu2 }
 0x23d   :  { %v3685_v15 = vpop.f32.mrf.mxu3 }
 0x23e   :  { %5161 = vmatpush.bf16.msra.mxu0 %v8223_v32  ;;  %v3605_v0 = vpop.f32.mrf.mxu0  ;;  %v9160_v32 = vld [vmem:[#allocation11 + $0x2fc] sm:$0xf]  ;;  %v8007_v15 = vor.u32 %v9150_v52, %v8004_v58  ;;  %v7710_v52 = vld [vmem:[#allocation11 + $0x58] sm:$0xf]  ;;  %v9078_v58 = vld [vmem:[#allocation11 + $0x68] sm:$0xf0] }
 0x23f   :  { %v3606_v16 = vadd.f32 %v3605_v0, %v3593_v50  ;;  %v8047_v40 = vor.u32 %v9160_v32, %v8044_v7  ;;  %v9098_v50 = vld [vmem:[#allocation11 + $0x108] sm:$0xf0]  ;;  %v9145_v0 = vld [vmem:[#allocation11 + $0x284] sm:$0xf]  ;;  %v8387_v7 = vor.u32 %v9245_v28, %v8384_v31  ;;  %v9215_v31 = vld [vmem:[#allocation11 + $0x4b4] sm:$0xf] }
 0x241   :  { %v3619_v19 = vadd.f32 %v3618_v63, %v3606_v16  ;;  %v8402_v16 = vld [vmem:[#allocation11 + $0x5c8] sm:$0xf] }
 0x242   :  { %5162 = vmatpush.bf16.msra.mxu0 %v8203_v56  ;;  %v9262_v56 = vld [vmem:[#allocation11 + $0x628] sm:$0xf0] }
 0x243   :  { %v3818_v21 = vmax.f32 %v3619_v19, 0.0  ;;  %v8443_v62 = vor.u32 %v9262_v56, %v8442_v46  ;;  %v7791_v19 = vor.u32 %v9098_v50, %v7790_v14  ;;  %v7730_v56 = vld [vmem:[#allocation11 + $0x80] sm:$0xf]  ;;  %v7690_v14 = vld [vmem:[#allocation11 + $0x30] sm:$0xf] }
 0x244   :  { %v3670_v25 = vpop.f32.mrf.mxu2  ;;  %v7731_v44 = vor.u32 %v9083_v47, %v7730_v56  ;;  %v9073_v50 = vld [vmem:[#allocation11 + $0x40] sm:$0xf0]  ;;  %v8430_v56 = vld [vmem:[#allocation11 + $0x5f8] sm:$0xf]  ;;  %v9258_v47 = vld [vmem:[#allocation11 + $0x608] sm:$0xf0] }
 0x245   :  { %v9779_v24 = vpack.c.bf16 %v3818_v21, %v3818_v21  ;;  %5171 = vmatpush.bf16.msra.mxu2 %v8443_v62  ;;  %v8407_v21 = vor.u32 %v9250_v18, %v8404_v53  ;;  %v9237_v62 = vld [vmem:[#allocation11 + $0x560] sm:$0xf0]  ;;  %v9220_v18 = vld [vmem:[#allocation11 + $0x4dc] sm:$0xf]  ;;  %v8284_v53 = vld [vmem:[#allocation11 + $0x4ec] sm:$0xf0] }
 0x246   :  { %5163 = vmatpush.bf16.msra.mxu0 %v8183_v41  ;;  %v9781_v27 = vpop.f32.mrf.mxu3  ;;  %v3607_v48 = vpop.f32.mrf.mxu0  ;;  %v9257_v41 = vld [vmem:[#allocation11 + $0x600] sm:$0xf0] }
 0x247   :  { %5140 = vmatmul.bf16.vlgmr.msra.gmra.mxu3 %v9779_v24  ;;  %v8423_v10 = vor.u32 %v9257_v41, %v8422_v60  ;;  %v9247_v48 = vld [vmem:[#allocation11 + $0x5b0] sm:$0xf0]  ;;  %v8322_v60 = vld [vmem:[#allocation11 + $0x528] sm:$0xf]  ;;  %v9232_v41 = vld [vmem:[#allocation11 + $0x538] sm:$0xf0] }
 0x248   :  { %5236 = vmatpush.bf16.msra.mxu3 %v8447_v49  ;;  %v8344_v49 = vld [vmem:[#allocation11 + $0x564] sm:$0xf0] }
 0x249   :  { %5172 = vmatpush.bf16.msra.mxu2 %v8423_v10  ;;  %v8324_v10 = vld [vmem:[#allocation11 + $0x53c] sm:$0xf0] }
 0x24a   :  { %5164 = vmatpush.bf16.msra.mxu0 %v8163_v30  ;;  %v8424_v30 = vld [vmem:[#allocation11 + $0x604] sm:$0xf0] }
 0x24b   :  { %v8427_v11 = vor.u32 %v9255_v5, %v8424_v30  ;;  %v9230_v5 = vld [vmem:[#allocation11 + $0x52c] sm:$0xf] }
 0x24c   :  { %v3672_v37 = vpop.f32.mrf.mxu2 }
 0x24d   :  { %5237 = vmatpush.bf16.msra.mxu3 %v8427_v11  ;;  %v9088_v37 = vld [vmem:[#allocation11 + $0xb8] sm:$0xf0] }
 0x24e   :  { %5165 = vmatpush.bf16.msra.mxu0 %v8143_v2  ;;  %v3737_v38 = vpop.f32.mrf.mxu3  ;;  %v3657_v39 = vpop.f32.mrf.mxu0  ;;  %v7984_v2 = vld [vmem:[#allocation11 + $0x294] sm:$0xf0] }
 0x24f   :  { %v3658_v54 = vadd.f32 %v3657_v39, %v3645_v34  ;;  %v7987_v23 = vor.u32 %v9145_v0, %v7984_v2  ;;  %v7750_v34 = vld [vmem:[#allocation11 + $0xa8] sm:$0xf]  ;;  %v8362_v38 = vld [vmem:[#allocation11 + $0x578] sm:$0xf]  ;;  %v9242_v39 = vld [vmem:[#allocation11 + $0x588] sm:$0xf0] }
 0x250   :  { %v7751_v43 = vor.u32 %v9088_v37, %v7750_v34  ;;  %v8302_v0 = vld [vmem:[#allocation11 + $0x500] sm:$0xf]  ;;  %v9227_v2 = vld [vmem:[#allocation11 + $0x510] sm:$0xf0] }
 0x251   :  { %v3671_v4 = vadd.f32 %v3670_v25, %v3658_v54  ;;  %5238 = vmatpush.bf16.msra.mxu3 %v8407_v21  ;;  %v8382_v25 = vld [vmem:[#allocation11 + $0x5a0] sm:$0xf]  ;;  %v9240_v54 = vld [vmem:[#allocation11 + $0x57c] sm:$0xf] }
 0x252   :  { %5210 = vmatpush.bf16.msrb.mxu0 %v8127_v51  ;;  %v9252_v51 = vld [vmem:[#allocation11 + $0x5d8] sm:$0xf0]  ;;  %v8383_v6 = vor.u32 %v9247_v48, %v8382_v25  ;;  %v8367_v46 = vor.u32 %v9240_v54, %v8364_v42  ;;  %v7670_v25 = vld [vmem:[#allocation11 + $0x8] sm:$0xf]  ;;  %v9218_v54 = vld [vmem:[#allocation11 + $0x4c8] sm:$0xf0] }
 0x253   :  { %v3684_v63 = vadd.f32 %v9772_v57, %v3671_v4  ;;  %v8403_v61 = vor.u32 %v9252_v51, %v8402_v16  ;;  %v8342_v4 = vld [vmem:[#allocation11 + $0x550] sm:$0xf]  ;;  %v9225_v16 = vld [vmem:[#allocation11 + $0x504] sm:$0xf]  ;;  %v8303_v51 = vor.u32 %v9227_v2, %v8302_v0  ;;  %v9068_v48 = vld [vmem:[#allocation11 + $0x18] sm:$0xf0] }
 0x254   :  { %v9790_v33 = vpop.f32.mrf.mxu1  ;;  %v8343_v59 = vor.u32 %v9237_v62, %v8342_v4  ;;  %v7671_v37 = vor.u32 %v9068_v48, %v7670_v25  ;;  %v7950_v62 = vld [vmem:[#allocation11 + $0x238] sm:$0xf]  ;;  %v8370_v48 = vld [vmem:[#allocation11 + $0x580] sm:$0xf] }
 0x255   :  { %v3819_v8 = vmax.f32 %v3684_v63, 0.0  ;;  %v9792_v9 = vpop.f32.mrf.mxu2  ;;  %5173 = vmatpush.bf16.msra.mxu2 %v8403_v61  ;;  %5239 = vmatpush.bf16.msra.mxu3 %v8387_v7  ;;  %v2445_v63 = vperm.slane %v9783_v26, 3  ;;  %v8304_v61 = vld [vmem:[#allocation11 + $0x514] sm:$0xf0] }
 0x256   :  { %5211 = vmatpush.bf16.msrb.mxu0 %v8107_v22  ;;  %v3659_v57 = vpop.f32.mrf.mxu0  ;;  %v7770_v22 = vld [vmem:[#allocation11 + $0xd0] sm:$0xf]  ;;  %v8307_v21 = vor.u32 %v9225_v16, %v8304_v61  ;;  %v8390_v16 = vld [vmem:[#allocation11 + $0x5a8] sm:$0xf] }
 0x257   :  { %v9796_v12 = vpack.c.bf16 %v3819_v8, %v3819_v8  ;;  %5192 = vmatmul.bf16.vlgmr.msrb.gmra.mxu3 %v9770_v3  ;;  %v7771_v32 = vor.u32 %v9093_v45, %v7770_v22  ;;  %v8323_v8 = vor.u32 %v9232_v41, %v8322_v60  ;;  %v3697_v30 = vadd.f32 %v9775_v35, %v2445_v63  ;;  %v8290_v45 = vld [vmem:[#allocation11 + $0x4e0] sm:$0xf]  ;;  %v8410_v60 = vld [vmem:[#allocation11 + $0x5d0] sm:$0xf]  ;;  %v9253_v41 = vld [vmem:[#allocation11 + $0x5e0] sm:$0xf0] }
 0x258   :  { %v7711_v57 = vor.u32 %v9078_v58, %v7710_v52  ;;  %v7691_v35 = vor.u32 %v9073_v50, %v7690_v14  ;;  %v8287_v22 = vor.u32 %v9220_v18, %v8284_v53  ;;  %v8431_v52 = vor.u32 %v9258_v47, %v8430_v56  ;;  %v9133_v14 = vld [vmem:[#allocation11 + $0x220] sm:$0xf0]  ;;  %v9200_v18 = vld [vmem:[#allocation11 + $0x43c] sm:$0xf]  ;;  %v8204_v53 = vld [vmem:[#allocation11 + $0x44c] sm:$0xf0] }
 0x259   :  { %5153 = vmatmul.bf16.vlgmr.msrb.gmra.mxu1 %v9796_v12  ;;  %5174 = vmatpush.bf16.msra.mxu2 %v8383_v6  ;;  %v9263_v6 = vld [vmem:[#allocation11 + $0x630] sm:$0xf0]  ;;  %v8411_v0 = vor.u32 %v9253_v41, %v8410_v60  ;;  %v7870_v56 = vld [vmem:[#allocation11 + $0x198] sm:$0xf]  ;;  %v9118_v47 = vld [vmem:[#allocation11 + $0x1a8] sm:$0xf0] }
 0x25a   :  { %5212 = vmatpush.bf16.msrb.mxu0 %v8087_v29  ;;  %5249 = vmatpush.bf16.msrb.mxu1 %v7811_v1  ;;  %v8327_v1 = vor.u32 %v9230_v5, %v8324_v10  ;;  %v8224_v10 = vld [vmem:[#allocation11 + $0x474] sm:$0xf0]  ;;  %v8150_v60 = vld [vmem:[#allocation11 + $0x3c8] sm:$0xf]  ;;  %v7850_v41 = vld [vmem:[#allocation11 + $0x170] sm:$0xf] }
 0x25b   :  { %5240 = vmatpush.bf16.msra.mxu3 %v8367_v46 }
 0x25c   :  { %v3750_v29 = vpop.f32.mrf.mxu1 }
 0x25d   :  { %v3724_v17 = vpop.f32.mrf.mxu2 }
 0x25e   :  { %5213 = vmatpush.bf16.msrb.mxu0 %v8067_v20  ;;  %5250 = vmatpush.bf16.msrb.mxu1 %v7791_v19  ;;  %v8450_v17 = vld [vmem:[#allocation11 + $0x620] sm:$0xf] }
 0x25f   :  { %v8451_v42 = vor.u32 %v9263_v6, %v8450_v17  ;;  %v9195_v17 = vld [vmem:[#allocation11 + $0x414] sm:$0xf]  ;;  %v8184_v6 = vld [vmem:[#allocation11 + $0x424] sm:$0xf0] }
 0x262   :  { %5214 = vmatpush.bf16.msrb.mxu0 %v8047_v40  ;;  %v8363_v40 = vor.u32 %v9242_v39, %v8362_v38  ;;  %5251 = vmatpush.bf16.msrb.mxu1 %v7771_v32  ;;  %v7970_v38 = vld [vmem:[#allocation11 + $0x260] sm:$0xf]  ;;  %v9143_v39 = vld [vmem:[#allocation11 + $0x270] sm:$0xf0] }
 0x263   :  { %v7971_v4 = vor.u32 %v9143_v39, %v7970_v38 }
 0x264   :  { %5175 = vmatpush.bf16.msra.mxu2 %v8363_v40 }
 0x266   :  { %v9794_v55 = vpop.f32.mrf.mxu3  ;;  %5215 = vmatpush.bf16.msrb.mxu0 %v8027_v36  ;;  %5252 = vmatpush.bf16.msrb.mxu1 %v7751_v43  ;;  %v8347_v36 = vor.u32 %v9235_v13, %v8344_v49  ;;  %v8244_v13 = vld [vmem:[#allocation11 + $0x49c] sm:$0xf0]  ;;  %v9138_v49 = vld [vmem:[#allocation11 + $0x248] sm:$0xf0] }
 0x267   :  { %v7951_v5 = vor.u32 %v9138_v49, %v7950_v62  ;;  %v9193_v62 = vld [vmem:[#allocation11 + $0x400] sm:$0xf0] }
 0x268   :  { %5176 = vmatpush.bf16.msra.mxu2 %v8343_v59  ;;  %5241 = vmatpush.bf16.msra.mxu3 %v8347_v36  ;;  %v9213_v36 = vld [vmem:[#allocation11 + $0x4a0] sm:$0xf0] }
 0x269   :  { %5205 = vmatmul.bf16.vlgmr.msra.gmra.mxu1 %v9779_v24 }
 0x26a   :  { %5216 = vmatpush.bf16.msrb.mxu0 %v8007_v15  ;;  %5253 = vmatpush.bf16.msrb.mxu1 %v7731_v44  ;;  %v8250_v44 = vld [vmem:[#allocation11 + $0x490] sm:$0xf] }
 0x26b   :  { %v8251_v58 = vor.u32 %v9213_v36, %v8250_v44  ;;  %v9233_v44 = vld [vmem:[#allocation11 + $0x540] sm:$0xf0]  ;;  %v7871_v36 = vor.u32 %v9118_v47, %v7870_v56  ;;  %v7732_v56 = vld [vmem:[#allocation11 + $0x94] sm:$0xf0] }
 0x26c   :  { %5177 = vmatpush.bf16.msra.mxu2 %v8323_v8  ;;  %5242 = vmatpush.bf16.msra.mxu3 %v8327_v1  ;;  %v9205_v8 = vld [vmem:[#allocation11 + $0x464] sm:$0xf] }
 0x26d   :  { %v8227_v50 = vor.u32 %v9205_v8, %v8224_v10  ;;  %v9188_v10 = vld [vmem:[#allocation11 + $0x3d8] sm:$0xf0] }
 0x26e   :  { %v3789_v20 = vpop.f32.mrf.mxu3  ;;  %5217 = vmatpush.bf16.msrb.mxu0 %v7987_v23  ;;  %v3709_v11 = vpop.f32.mrf.mxu0  ;;  %5254 = vmatpush.bf16.msrb.mxu1 %v7711_v57  ;;  %v9223_v23 = vld [vmem:[#allocation11 + $0x4f0] sm:$0xf0] }
 0x26f   :  { %v3710_v15 = vadd.f32 %v3709_v11, %v3697_v30  ;;  %v8291_v28 = vor.u32 %v9223_v23, %v8290_v45  ;;  %v8264_v20 = vld [vmem:[#allocation11 + $0x4c4] sm:$0xf0]  ;;  %v7930_v11 = vld [vmem:[#allocation11 + $0x210] sm:$0xf]  ;;  %v9203_v45 = vld [vmem:[#allocation11 + $0x450] sm:$0xf0] }
 0x270   :  { %5178 = vmatpush.bf16.msra.mxu2 %v8303_v51  ;;  %5243 = vmatpush.bf16.msra.mxu3 %v8307_v21  ;;  %v8230_v30 = vld [vmem:[#allocation11 + $0x468] sm:$0xf]  ;;  %v9248_v51 = vld [vmem:[#allocation11 + $0x5b8] sm:$0xf0]  ;;  %v7931_v61 = vor.u32 %v9133_v14, %v7930_v11 }
 0x271   :  { %v3723_v19 = vadd.f32 %v9792_v9, %v3710_v15  ;;  %v8270_v9 = vld [vmem:[#allocation11 + $0x4b8] sm:$0xf]  ;;  %v9208_v15 = vld [vmem:[#allocation11 + $0x478] sm:$0xf0]  ;;  %v8391_v23 = vor.u32 %v9248_v51, %v8390_v16  ;;  %v9101_v51 = vld [vmem:[#allocation11 + $0x124] sm:$0xf] }
 0x272   :  { %5255 = vmatpush.bf16.msrb.mxu1 %v7691_v35  ;;  %v8271_v43 = vor.u32 %v9218_v54, %v8270_v9  ;;  %v8231_v2 = vor.u32 %v9208_v15, %v8230_v30  ;;  %v7910_v35 = vld [vmem:[#allocation11 + $0x1e8] sm:$0xf]  ;;  %v9128_v21 = vld [vmem:[#allocation11 + $0x1f8] sm:$0xf0]  ;;  %v9123_v9 = vld [vmem:[#allocation11 + $0x1d0] sm:$0xf0] }
 0x273   :  { %v3736_v29 = vadd.f32 %v9781_v27, %v3723_v19  ;;  %v8267_v27 = vor.u32 %v9215_v31, %v8264_v20  ;;  %v8210_v19 = vld [vmem:[#allocation11 + $0x440] sm:$0xf]  ;;  %v8190_v31 = vld [vmem:[#allocation11 + $0x418] sm:$0xf]  ;;  %v9238_v54 = vld [vmem:[#allocation11 + $0x568] sm:$0xf0] }
 0x274   :  { %5223 = vmatpush.bf16.msrb.mxu2 %v8287_v22  ;;  %5288 = vmatpush.bf16.msrb.mxu3 %v8291_v28  ;;  %v9808_v34 = vpop.f32.mrf.mxu1  ;;  %v8207_v22 = vor.u32 %v9200_v18, %v8204_v53  ;;  %v8211_v25 = vor.u32 %v9203_v45, %v8210_v19  ;;  %v9243_v28 = vld [vmem:[#allocation11 + $0x590] sm:$0xf0]  ;;  %v7890_v20 = vld [vmem:[#allocation11 + $0x1c0] sm:$0xf]  ;;  %v9228_v11 = vld [vmem:[#allocation11 + $0x518] sm:$0xf0] }
 0x275   :  { %v3749_v32 = vadd.f32 %v9790_v33, %v3736_v29  ;;  %v9210_v33 = vld [vmem:[#allocation11 + $0x48c] sm:$0xf]  ;;  %v7911_v29 = vor.u32 %v9128_v21, %v7910_v35  ;;  %v8371_v38 = vor.u32 %v9243_v28, %v8370_v48  ;;  %v8292_v15 = vld [vmem:[#allocation11 + $0x4f4] sm:$0xf0]  ;;  %v9216_v35 = vld [vmem:[#allocation11 + $0x4bc] sm:$0xf] }
 0x276   :  { %v3711_v40 = vpop.f32.mrf.mxu0  ;;  %5256 = vmatpush.bf16.msrb.mxu1 %v7671_v37  ;;  %v8247_v63 = vor.u32 %v9210_v33, %v8244_v13  ;;  %v9198_v37 = vld [vmem:[#allocation11 + $0x428] sm:$0xf0]  ;;  %v8272_v21 = vld [vmem:[#allocation11 + $0x4cc] sm:$0xf0]  ;;  %v9096_v45 = vld [vmem:[#allocation11 + $0xfc] sm:$0xf] }
 0x277   :  { %v3820_v46 = vmax.f32 %v3749_v32, 0.0  ;;  %v8187_v32 = vor.u32 %v9195_v17, %v8184_v6  ;;  %v8191_v39 = vor.u32 %v9198_v37, %v8190_v31  ;;  %v7891_v40 = vor.u32 %v9123_v9, %v7890_v20  ;;  %v9211_v28 = vld [vmem:[#allocation11 + $0x494] sm:$0xf]  ;;  %v7772_v31 = vld [vmem:[#allocation11 + $0xe4] sm:$0xf0] }
 0x278   :  { %5224 = vmatpush.bf16.msrb.mxu2 %v8267_v27  ;;  %5289 = vmatpush.bf16.msrb.mxu3 %v8271_v43  ;;  %v8350_v27 = vld [vmem:[#allocation11 + $0x558] sm:$0xf]  ;;  %v8164_v43 = vld [vmem:[#allocation11 + $0x3fc] sm:$0xf0]  ;;  %v8275_v48 = vor.u32 %v9216_v35, %v8272_v21  ;;  %v9091_v6 = vld [vmem:[#allocation11 + $0xd4] sm:$0xf] }
 0x279   :  { %v9810_v59 = vpack.c.bf16 %v3820_v46, %v3820_v46  ;;  %5257 = vmatmul.bf16.vlgmr.msrb.gmra.mxu1 %v9770_v3  ;;  %v8170_v46 = vld [vmem:[#allocation11 + $0x3f0] sm:$0xf]  ;;  %v8351_v33 = vor.u32 %v9238_v54, %v8350_v27  ;;  %v8232_v37 = vld [vmem:[#allocation11 + $0x47c] sm:$0xf0]  ;;  %v8138_v35 = vld [vmem:[#allocation11 + $0x3a8] sm:$0xf] }
 0x27a   :  { %5301 = vmatpush.bf16.msra.mxu1 %v8451_v42  ;;  %v9190_v42 = vld [vmem:[#allocation11 + $0x3ec] sm:$0xf]  ;;  %v8171_v13 = vor.u32 %v9193_v62, %v8170_v46  ;;  %v9081_v46 = vld [vmem:[#allocation11 + $0x84] sm:$0xf]  ;;  %v9196_v62 = vld [vmem:[#allocation11 + $0x41c] sm:$0xf] }
 0x27b   :  { %v9806_v7 = vpop.f32.mrf.mxu2  ;;  %5166 = vmatmul.bf16.vlgmr.msra.gmra.mxu0 %v9810_v59  ;;  %v9184_v21 = vld [vmem:[#allocation11 + $0x3b8] sm:$0xf0] }
 0x27c   :  { %5262 = vmatpush.bf16.msra.mxu0 %v7971_v4  ;;  %v3802_v1 = vpop.f32.mrf.mxu1  ;;  %5225 = vmatpush.bf16.msrb.mxu2 %v8247_v63  ;;  %v8167_v4 = vor.u32 %v9190_v42, %v8164_v43  ;;  %v8330_v63 = vld [vmem:[#allocation11 + $0x530] sm:$0xf]  ;;  %v8212_v42 = vld [vmem:[#allocation11 + $0x454] sm:$0xf0] }
 0x27d   :  { %5290 = vmatpush.bf16.msrb.mxu3 %v8251_v58  ;;  %v8144_v58 = vld [vmem:[#allocation11 + $0x3d4] sm:$0xf0]  ;;  %v8331_v30 = vor.u32 %v9233_v44, %v8330_v63  ;;  %v8310_v1 = vld [vmem:[#allocation11 + $0x508] sm:$0xf]  ;;  %v7712_v63 = vld [vmem:[#allocation11 + $0x6c] sm:$0xf0] }
 0x27e   :  { %5302 = vmatpush.bf16.msra.mxu1 %v8431_v52  ;;  %v9185_v52 = vld [vmem:[#allocation11 + $0x3c4] sm:$0xf]  ;;  %v8311_v16 = vor.u32 %v9228_v11, %v8310_v1  ;;  %v7692_v1 = vld [vmem:[#allocation11 + $0x44] sm:$0xf0] }
 0x27f   :  { %v8147_v8 = vor.u32 %v9185_v52, %v8144_v58 }
 0x280   :  { %5263 = vmatpush.bf16.msra.mxu0 %v7951_v5  ;;  %5226 = vmatpush.bf16.msrb.mxu2 %v8227_v50  ;;  %v9113_v5 = vld [vmem:[#allocation11 + $0x180] sm:$0xf0] }
 0x281   :  { %5291 = vmatpush.bf16.msrb.mxu3 %v8231_v2  ;;  %v7851_v14 = vor.u32 %v9113_v5, %v7850_v41  ;;  %v9221_v50 = vld [vmem:[#allocation11 + $0x4e4] sm:$0xf]  ;;  %v9108_v2 = vld [vmem:[#allocation11 + $0x158] sm:$0xf0]  ;;  %v9183_v41 = vld [vmem:[#allocation11 + $0x3b0] sm:$0xf0] }
 0x282   :  { %5303 = vmatpush.bf16.msra.mxu1 %v8411_v0  ;;  %v7830_v0 = vld [vmem:[#allocation11 + $0x148] sm:$0xf]  ;;  %v8295_v53 = vor.u32 %v9221_v50, %v8292_v15  ;;  %v9181_v5 = vld [vmem:[#allocation11 + $0x3a4] sm:$0xf] }
 0x283   :  { %v3776_v57 = vpop.f32.mrf.mxu2  ;;  %v7831_v19 = vor.u32 %v9108_v2, %v7830_v0  ;;  %v9178_v0 = vld [vmem:[#allocation11 + $0x388] sm:$0xf0]  ;;  %v9176_v2 = vld [vmem:[#allocation11 + $0x37c] sm:$0xf] }
 0x284   :  { %5264 = vmatpush.bf16.msra.mxu0 %v7931_v61  ;;  %5227 = vmatpush.bf16.msrb.mxu2 %v8207_v22  ;;  %v8151_v57 = vor.u32 %v9188_v10, %v8150_v60  ;;  %v7812_v61 = vld [vmem:[#allocation11 + $0x134] sm:$0xf0]  ;;  %v8130_v60 = vld [vmem:[#allocation11 + $0x3a0] sm:$0xf]  ;;  %v9191_v10 = vld [vmem:[#allocation11 + $0x3f4] sm:$0xf] }
 0x285   :  { %5292 = vmatpush.bf16.msrb.mxu3 %v8211_v25  ;;  %v7815_v22 = vor.u32 %v9101_v51, %v7812_v61  ;;  %v2446_v25 = vperm.slane %v9783_v26, 4  ;;  %v7752_v26 = vld [vmem:[#allocation11 + $0xbc] sm:$0xf0]  ;;  %v8131_v11 = vor.u32 %v9183_v41, %v8130_v60  ;;  %v9186_v61 = vld [vmem:[#allocation11 + $0x3cc] sm:$0xf] }
 0x286   :  { %5304 = vmatpush.bf16.msra.mxu1 %v8391_v23  ;;  %v7792_v23 = vld [vmem:[#allocation11 + $0x10c] sm:$0xf0] }
 0x287   :  { %v7795_v17 = vor.u32 %v9096_v45, %v7792_v23  ;;  %v9261_v23 = vld [vmem:[#allocation11 + $0x624] sm:$0xf] }
 0x288   :  { %5265 = vmatpush.bf16.msra.mxu0 %v7911_v29  ;;  %5228 = vmatpush.bf16.msrb.mxu2 %v8187_v32  ;;  %v8252_v29 = vld [vmem:[#allocation11 + $0x4a4] sm:$0xf0]  ;;  %v9206_v32 = vld [vmem:[#allocation11 + $0x46c] sm:$0xf] }
 0x289   :  { %5293 = vmatpush.bf16.msrb.mxu3 %v8191_v39  ;;  %v8255_v9 = vor.u32 %v9211_v28, %v8252_v29  ;;  %v9086_v39 = vld [vmem:[#allocation11 + $0xac] sm:$0xf]  ;;  %v8235_v54 = vor.u32 %v9206_v32, %v8232_v37  ;;  %v8090_v29 = vld [vmem:[#allocation11 + $0x350] sm:$0xf]  ;;  %v8118_v37 = vld [vmem:[#allocation11 + $0x380] sm:$0xf] }
 0x28a   :  { %5305 = vmatpush.bf16.msra.mxu1 %v8371_v38  ;;  %v7775_v38 = vor.u32 %v9091_v6, %v7772_v31  ;;  %v7755_v43 = vor.u32 %v9086_v39, %v7752_v26  ;;  %v8139_v31 = vor.u32 %v9184_v21, %v8138_v35  ;;  %v9256_v26 = vld [vmem:[#allocation11 + $0x5fc] sm:$0xf]  ;;  %v9153_v35 = vld [vmem:[#allocation11 + $0x2c0] sm:$0xf0] }
 0x28b   :  { %5218 = vmatmul.bf16.vlgmr.msrb.gmra.mxu0 %v9796_v12 }
 0x28c   :  { %5266 = vmatpush.bf16.msra.mxu0 %v7891_v40  ;;  %5229 = vmatpush.bf16.msrb.mxu2 %v8167_v4  ;;  %v9201_v40 = vld [vmem:[#allocation11 + $0x444] sm:$0xf] }
 0x28d   :  { %5294 = vmatpush.bf16.msrb.mxu3 %v8171_v13  ;;  %v8215_v47 = vor.u32 %v9201_v40, %v8212_v42  ;;  %v7735_v13 = vor.u32 %v9081_v46, %v7732_v56  ;;  %v8070_v40 = vld [vmem:[#allocation11 + $0x328] sm:$0xf]  ;;  %v9168_v42 = vld [vmem:[#allocation11 + $0x338] sm:$0xf0]  ;;  %v9166_v46 = vld [vmem:[#allocation11 + $0x32c] sm:$0xf] }
 0x28e   :  { %v3761_v49 = vpop.f32.mrf.mxu0  ;;  %5306 = vmatpush.bf16.msra.mxu1 %v8351_v33  ;;  %v8192_v33 = vld [vmem:[#allocation11 + $0x42c] sm:$0xf0]  ;;  %v8072_v56 = vld [vmem:[#allocation11 + $0x33c] sm:$0xf0] }
 0x28f   :  { %v3762_v20 = vadd.f32 %v3761_v49, %v2446_v25  ;;  %v9076_v49 = vld [vmem:[#allocation11 + $0x5c] sm:$0xf]  ;;  %v8195_v44 = vor.u32 %v9196_v62, %v8192_v33  ;;  %v8452_v25 = vld [vmem:[#allocation11 + $0x634] sm:$0xf0]  ;;  %v9174_v62 = vld [vmem:[#allocation11 + $0x368] sm:$0xf0]  ;;  %v8071_v33 = vor.u32 %v9168_v42, %v8070_v40 }
 0x290   :  { %5267 = vmatpush.bf16.msra.mxu0 %v7871_v36  ;;  %5230 = vmatpush.bf16.msrb.mxu2 %v8147_v8  ;;  %v7715_v58 = vor.u32 %v9076_v49, %v7712_v63  ;;  %v8132_v8 = vld [vmem:[#allocation11 + $0x3b4] sm:$0xf0]  ;;  %v8455_v32 = vor.u32 %v9261_v23, %v8452_v25  ;;  %v8412_v49 = vld [vmem:[#allocation11 + $0x5e4] sm:$0xf0]  ;;  %v8075_v63 = vor.u32 %v9166_v46, %v8072_v56  ;;  %v9144_v42 = vld [vmem:[#allocation11 + $0x278] sm:$0xf0] }
 0x291   :  { %5295 = vmatpush.bf16.msrb.mxu3 %v8151_v57  ;;  %v3775_v27 = vadd.f32 %v9806_v7, %v3762_v20  ;;  %v9071_v57 = vld [vmem:[#allocation11 + $0x34] sm:$0xf]  ;;  %v9154_v46 = vld [vmem:[#allocation11 + $0x2c8] sm:$0xf0] }
 0x292   :  { %5307 = vmatpush.bf16.msra.mxu1 %v8331_v30  ;;  %v7695_v51 = vor.u32 %v9071_v57, %v7692_v1  ;;  %v9171_v20 = vld [vmem:[#allocation11 + $0x354] sm:$0xf]  ;;  %v8030_v1 = vld [vmem:[#allocation11 + $0x2d8] sm:$0xf] }
 0x293   :  { %v3788_v4 = vadd.f32 %v9794_v55, %v3775_v27  ;;  %v8172_v55 = vld [vmem:[#allocation11 + $0x404] sm:$0xf0]  ;;  %v8432_v27 = vld [vmem:[#allocation11 + $0x60c] sm:$0xf0]  ;;  %v9834_v23 = vld [vmem:[%s9881_s6] sm:$0x1f] }
 0x294   :  { %5268 = vmatpush.bf16.msra.mxu0 %v7851_v14  ;;  %v8110_v14 = vld [vmem:[#allocation11 + $0x378] sm:$0xf]  ;;  %v8175_v15 = vor.u32 %v9191_v10, %v8172_v55  ;;  %v9246_v55 = vld [vmem:[#allocation11 + $0x5ac] sm:$0xf]  ;;  %v4069_v56 = vperm.slane %v9834_v23, 0 }
 0x295   :  { %v3801_v7 = vadd.f32 %v9808_v34, %v3788_v4  ;;  %v8135_v34 = vor.u32 %v9181_v5, %v8132_v8  ;;  %v8111_v45 = vor.u32 %v9178_v0, %v8110_v14  ;;  %v8098_v4 = vld [vmem:[#allocation11 + $0x358] sm:$0xf]  ;;  %v8078_v5 = vld [vmem:[#allocation11 + $0x330] sm:$0xf]  ;;  %v9169_v8 = vld [vmem:[#allocation11 + $0x340] sm:$0xf0] }
 0x296   :  { %v3763_v18 = vpop.f32.mrf.mxu0  ;;  %5308 = vmatpush.bf16.msra.mxu1 %v8311_v16  ;;  %v8112_v16 = vld [vmem:[#allocation11 + $0x38c] sm:$0xf0]  ;;  %v8079_v14 = vor.u32 %v9169_v8, %v8078_v5  ;;  %v9149_v5 = vld [vmem:[#allocation11 + $0x2a0] sm:$0xf0] }
 0x297   :  { %v8152_v18 = vld [vmem:[#allocation11 + $0x3dc] sm:$0xf0] }
 0x298   :  { %5269 = vmatpush.bf16.msra.mxu0 %v7831_v19  ;;  %v7672_v19 = vld [vmem:[#allocation11 + $0x1c] sm:$0xf0]  ;;  %v8155_v28 = vor.u32 %v9186_v61, %v8152_v18  ;;  %v9241_v61 = vld [vmem:[#allocation11 + $0x584] sm:$0xf]  ;;  %v8372_v18 = vld [vmem:[#allocation11 + $0x594] sm:$0xf0] }
 0x29a   :  { %5353 = vmatpush.bf16.msrb.mxu1 %v8295_v53  ;;  %v9066_v53 = vld [vmem:[#allocation11 + $0xc] sm:$0xf] }
 0x29b   :  { %5270 = vmatmul.bf16.vlgmr.msra.gmra.mxu0 %v9779_v24  ;;  %v7675_v6 = vor.u32 %v9066_v53, %v7672_v19  ;;  %v8010_v19 = vld [vmem:[#allocation11 + $0x2b0] sm:$0xf] }
 0x29c   :  { %5314 = vmatpush.bf16.msrb.mxu0 %v7815_v22 }
 0x29e   :  { %5354 = vmatpush.bf16.msrb.mxu1 %v8275_v48  ;;  %v8115_v48 = vor.u32 %v9176_v2, %v8112_v16  ;;  %v8058_v2 = vld [vmem:[#allocation11 + $0x308] sm:$0xf]  ;;  %v9164_v16 = vld [vmem:[#allocation11 + $0x318] sm:$0xf0] }
 0x29f   :  { %v8059_v21 = vor.u32 %v9164_v16, %v8058_v2  ;;  %v7932_v2 = vld [vmem:[#allocation11 + $0x224] sm:$0xf0]  ;;  %v7938_v16 = vld [vmem:[#allocation11 + $0x218] sm:$0xf] }
 0x2a0   :  { %5315 = vmatpush.bf16.msrb.mxu0 %v7795_v17  ;;  %v9173_v17 = vld [vmem:[#allocation11 + $0x360] sm:$0xf0] }
 0x2a1   :  { %v8091_v39 = vor.u32 %v9173_v17, %v8090_v29  ;;  %v9159_v29 = vld [vmem:[#allocation11 + $0x2f0] sm:$0xf0]  ;;  %v8011_v17 = vor.u32 %v9153_v35, %v8010_v19 }
 0x2a2   :  { %5355 = vmatpush.bf16.msrb.mxu1 %v8255_v9  ;;  %v8092_v9 = vld [vmem:[#allocation11 + $0x364] sm:$0xf0]  ;;  %v9219_v19 = vld [vmem:[#allocation11 + $0x4d0] sm:$0xf0] }
 0x2a4   :  { %5316 = vmatpush.bf16.msrb.mxu0 %v7775_v38  ;;  %v9179_v38 = vld [vmem:[#allocation11 + $0x390] sm:$0xf0] }
 0x2a6   :  { %5356 = vmatpush.bf16.msrb.mxu1 %v8235_v54  ;;  %v8095_v54 = vor.u32 %v9171_v20, %v8092_v9  ;;  %v7990_v20 = vld [vmem:[#allocation11 + $0x288] sm:$0xf] }
 0x2a8   :  { %5317 = vmatpush.bf16.msrb.mxu0 %v7755_v43  ;;  %v8119_v43 = vor.u32 %v9179_v38, %v8118_v37  ;;  %v9146_v37 = vld [vmem:[#allocation11 + $0x28c] sm:$0xf]  ;;  %v7992_v38 = vld [vmem:[#allocation11 + $0x29c] sm:$0xf0] }
 0x2aa   :  { %5357 = vmatpush.bf16.msrb.mxu1 %v8215_v47  ;;  %v8435_v47 = vor.u32 %v9256_v26, %v8432_v27  ;;  %v9141_v26 = vld [vmem:[#allocation11 + $0x264] sm:$0xf]  ;;  %v7972_v27 = vld [vmem:[#allocation11 + $0x274] sm:$0xf0] }
 0x2ac   :  { %5318 = vmatpush.bf16.msrb.mxu0 %v7735_v13  ;;  %v9251_v13 = vld [vmem:[#allocation11 + $0x5d4] sm:$0xf] }
 0x2ad   :  { %v8415_v41 = vor.u32 %v9251_v13, %v8412_v49  ;;  %v7975_v13 = vor.u32 %v9141_v26, %v7972_v27  ;;  %v8238_v27 = vld [vmem:[#allocation11 + $0x470] sm:$0xf] }
 0x2ae   :  { %v3813_v36 = vpop.f32.mrf.mxu0  ;;  %5358 = vmatpush.bf16.msrb.mxu1 %v8195_v44  ;;  %v9163_v44 = vld [vmem:[#allocation11 + $0x310] sm:$0xf0] }
 0x2af   :  { %v3814_v52 = vadd.f32 %v3813_v36, %v3801_v7  ;;  %v8050_v7 = vld [vmem:[#allocation11 + $0x300] sm:$0xf]  ;;  %v8099_v36 = vor.u32 %v9174_v62, %v8098_v4  ;;  %v9231_v4 = vld [vmem:[#allocation11 + $0x534] sm:$0xf]  ;;  %v8332_v62 = vld [vmem:[#allocation11 + $0x544] sm:$0xf0] }
 0x2b0   :  { %5319 = vmatpush.bf16.msrb.mxu0 %v7715_v58  ;;  %v8052_v58 = vld [vmem:[#allocation11 + $0x314] sm:$0xf0]  ;;  %v8051_v10 = vor.u32 %v9163_v44, %v8050_v7  ;;  %v9136_v7 = vld [vmem:[#allocation11 + $0x23c] sm:$0xf]  ;;  %v7952_v44 = vld [vmem:[#allocation11 + $0x24c] sm:$0xf0] }
 0x2b1   :  { %v3821_v30 = vmax.f32 %v3814_v52, 0.0  ;;  %v9161_v52 = vld [vmem:[#allocation11 + $0x304] sm:$0xf] }
 0x2b2   :  { %5359 = vmatpush.bf16.msrb.mxu1 %v8175_v15  ;;  %v8055_v57 = vor.u32 %v9161_v52, %v8052_v58  ;;  %v8032_v15 = vld [vmem:[#allocation11 + $0x2ec] sm:$0xf0]  ;;  %v8335_v52 = vor.u32 %v9231_v4, %v8332_v62  ;;  %v9139_v58 = vld [vmem:[#allocation11 + $0x250] sm:$0xf0] }
 0x2b3   :  { %v9820_v50 = vpack.c.bf16 %v3821_v30, %v3821_v30  ;;  %v8392_v30 = vld [vmem:[#allocation11 + $0x5bc] sm:$0xf0] }
 0x2b4   :  { %5320 = vmatpush.bf16.msrb.mxu0 %v7695_v51  ;;  %v8395_v0 = vor.u32 %v9246_v55, %v8392_v30  ;;  %v8312_v55 = vld [vmem:[#allocation11 + $0x51c] sm:$0xf0] }
 0x2b5   :  { %5179 = vmatmul.bf16.vlgmr.msra.gmra.mxu2 %v9820_v50  ;;  %5244 = vmatmul.bf16.vlgmr.msra.gmra.mxu3 %v9820_v50 }
 0x2b6   :  { %5275 = vmatpush.bf16.msra.mxu2 %v8131_v11  ;;  %5309 = vmatmul.bf16.vlgmr.msra.gmra.mxu1 %v9820_v50  ;;  %v3815_v22 = vpop.f32.mrf.mxu0  ;;  %v9158_v11 = vld [vmem:[#allocation11 + $0x2e8] sm:$0xf0] }
 0x2b7   :  { %5340 = vmatpush.bf16.msra.mxu3 %v8135_v34  ;;  %5360 = vmatpush.bf16.msrb.mxu1 %v8155_v28  ;;  %v9156_v34 = vld [vmem:[#allocation11 + $0x2dc] sm:$0xf]  ;;  %v8031_v51 = vor.u32 %v9158_v11, %v8030_v1  ;;  %v9151_v22 = vld [vmem:[#allocation11 + $0x2b4] sm:$0xf]  ;;  %v8038_v28 = vld [vmem:[#allocation11 + $0x2e0] sm:$0xf] }
 0x2b8   :  { %5321 = vmatpush.bf16.msrb.mxu0 %v7675_v6  ;;  %v9826_v60 = vpop.f32.mrf.mxu2  ;;  %v8035_v53 = vor.u32 %v9156_v34, %v8032_v15  ;;  %v9236_v6 = vld [vmem:[#allocation11 + $0x55c] sm:$0xf]  ;;  %v8298_v1 = vld [vmem:[#allocation11 + $0x4e8] sm:$0xf] }
 0x2b9   :  { %v5129_v8 = vadd.f32 %v9826_v60, %v4069_v56  ;;  %v9224_v11 = vld [vmem:[#allocation11 + $0x4f8] sm:$0xf0]  ;;  %v9119_v56 = vld [vmem:[#allocation11 + $0x1b0] sm:$0xf0] }
 0x2ba   :  { %5276 = vmatpush.bf16.msra.mxu2 %v8111_v45  ;;  %v8012_v45 = vld [vmem:[#allocation11 + $0x2c4] sm:$0xf0] }
 0x2bb   :  { %5341 = vmatpush.bf16.msra.mxu3 %v8115_v48  ;;  %5405 = vmatpush.bf16.msra.mxu1 %v8139_v31  ;;  %v8375_v48 = vor.u32 %v9241_v61, %v8372_v18  ;;  %v8352_v31 = vld [vmem:[#allocation11 + $0x56c] sm:$0xf0]  ;;  %v8015_v9 = vor.u32 %v9151_v22, %v8012_v45  ;;  %v8299_v61 = vor.u32 %v9224_v11, %v8298_v1  ;;  %v7912_v22 = vld [vmem:[#allocation11 + $0x1fc] sm:$0xf0]  ;;  %v9109_v1 = vld [vmem:[#allocation11 + $0x160] sm:$0xf0] }
 0x2bc   :  { %5366 = vmatpush.bf16.msra.mxu0 %v8455_v32  ;;  %v9148_v32 = vld [vmem:[#allocation11 + $0x298] sm:$0xf0]  ;;  %v8355_v40 = vor.u32 %v9236_v6, %v8352_v31  ;;  %v7918_v45 = vld [vmem:[#allocation11 + $0x1f0] sm:$0xf]  ;;  %v9214_v6 = vld [vmem:[#allocation11 + $0x4a8] sm:$0xf0] }
 0x2bd   :  { %5322 = vmatmul.bf16.vlgmr.msrb.gmra.mxu0 %v9770_v3  ;;  %v7818_v11 = vld [vmem:[#allocation11 + $0x128] sm:$0xf] }
 0x2be   :  { %5277 = vmatpush.bf16.msra.mxu2 %v8091_v39  ;;  %v8039_v39 = vor.u32 %v9159_v29, %v8038_v28 }
 0x2bf   :  { %5342 = vmatpush.bf16.msra.mxu3 %v8095_v54  ;;  %5406 = vmatpush.bf16.msra.mxu1 %v8119_v43  ;;  %v7978_v54 = vld [vmem:[#allocation11 + $0x268] sm:$0xf]  ;;  %v8018_v43 = vld [vmem:[#allocation11 + $0x2b8] sm:$0xf] }
 0x2c0   :  { %5367 = vmatpush.bf16.msra.mxu0 %v8435_v47  ;;  %v5130_v25 = vpop.f32.mrf.mxu2  ;;  %v7991_v47 = vor.u32 %v9148_v32, %v7990_v20  ;;  %v7979_v49 = vor.u32 %v9144_v42, %v7978_v54  ;;  %v9121_v20 = vld [vmem:[#allocation11 + $0x1c4] sm:$0xf]  ;;  %v7898_v32 = vld [vmem:[#allocation11 + $0x1c8] sm:$0xf]  ;;  %v9116_v42 = vld [vmem:[#allocation11 + $0x19c] sm:$0xf] }
 0x2c1   :  { %v9129_v25 = vld [vmem:[#allocation11 + $0x200] sm:$0xf0] }
 0x2c2   :  { %5278 = vmatpush.bf16.msra.mxu2 %v8071_v33  ;;  %v7995_v33 = vor.u32 %v9146_v37, %v7992_v38  ;;  %v7919_v31 = vor.u32 %v9129_v25, %v7918_v45  ;;  %v9124_v37 = vld [vmem:[#allocation11 + $0x1d8] sm:$0xf0]  ;;  %v9189_v45 = vld [vmem:[#allocation11 + $0x3e0] sm:$0xf0] }
 0x2c3   :  { %5343 = vmatpush.bf16.msra.mxu3 %v8075_v63  ;;  %5407 = vmatpush.bf16.msra.mxu1 %v8099_v36  ;;  %v8019_v63 = vor.u32 %v9154_v46, %v8018_v43  ;;  %v7958_v36 = vld [vmem:[#allocation11 + $0x240] sm:$0xf]  ;;  %v7872_v43 = vld [vmem:[#allocation11 + $0x1ac] sm:$0xf0] }
 0x2c4   :  { %5368 = vmatpush.bf16.msra.mxu0 %v8415_v41  ;;  %v7998_v41 = vld [vmem:[#allocation11 + $0x290] sm:$0xf]  ;;  %v7959_v34 = vor.u32 %v9139_v58, %v7958_v36  ;;  %v7878_v46 = vld [vmem:[#allocation11 + $0x1a0] sm:$0xf]  ;;  %v7875_v62 = vor.u32 %v9116_v42, %v7872_v43  ;;  %v9114_v36 = vld [vmem:[#allocation11 + $0x188] sm:$0xf0] }
 0x2c5   :  { %5231 = vmatmul.bf16.vlgmr.msrb.gmra.mxu2 %v9810_v59  ;;  %5296 = vmatmul.bf16.vlgmr.msrb.gmra.mxu3 %v9810_v59  ;;  %v7999_v15 = vor.u32 %v9149_v5, %v7998_v41  ;;  %v8198_v5 = vld [vmem:[#allocation11 + $0x420] sm:$0xf]  ;;  %v9272_v42 = vld [vmem:[#allocation13 + $0x38] sm:$0xff] }
 0x2c6   :  { %5279 = vmatpush.bf16.msra.mxu2 %v8051_v10  ;;  %5361 = vmatmul.bf16.vlgmr.msrb.gmra.mxu1 %v9810_v59  ;;  %v9226_v10 = vld [vmem:[#allocation11 + $0x50c] sm:$0xf]  ;;  %v7698_v43 = vld [vmem:[#allocation11 + $0x38] sm:$0xf] }
 0x2c7   :  { %5344 = vmatpush.bf16.msra.mxu3 %v8055_v57  ;;  %5408 = vmatpush.bf16.msra.mxu1 %v8079_v14  ;;  %v7955_v57 = vor.u32 %v9136_v7, %v7952_v44  ;;  %v8315_v60 = vor.u32 %v9226_v10, %v8312_v55  ;;  %v7852_v7 = vld [vmem:[#allocation11 + $0x184] sm:$0xf0]  ;;  %v7858_v44 = vld [vmem:[#allocation11 + $0x178] sm:$0xf]  ;;  %v9106_v55 = vld [vmem:[#allocation11 + $0x14c] sm:$0xf] }
 0x2c8   :  { %5369 = vmatpush.bf16.msra.mxu0 %v8395_v0  ;;  %v9131_v0 = vld [vmem:[#allocation11 + $0x214] sm:$0xf]  ;;  %v7859_v10 = vor.u32 %v9114_v36, %v7858_v44  ;;  %v8438_v36 = vld [vmem:[#allocation11 + $0x600] sm:$0xf] }
 0x2c9   :  { %v7935_v18 = vor.u32 %v9131_v0, %v7932_v2 }
 0x2ca   :  { %5280 = vmatpush.bf16.msra.mxu2 %v8031_v51  ;;  %v5141_v30 = vpop.f32.mrf.mxu3  ;;  %v9134_v51 = vld [vmem:[#allocation11 + $0x228] sm:$0xf0] }
 0x2cb   :  { %5345 = vmatpush.bf16.msra.mxu3 %v8035_v53  ;;  %5409 = vmatpush.bf16.msra.mxu1 %v8059_v21  ;;  %v5142_v14 = vadd.f32 %v5141_v30, %v5129_v8  ;;  %v8278_v53 = vld [vmem:[#allocation11 + $0x4c0] sm:$0xf]  ;;  %v7939_v35 = vor.u32 %v9134_v51, %v7938_v16  ;;  %v9126_v21 = vld [vmem:[#allocation11 + $0x1ec] sm:$0xf]  ;;  %v9199_v8 = vld [vmem:[#allocation11 + $0x430] sm:$0xf0] }
 0x2cc   :  { %5370 = vmatpush.bf16.msra.mxu0 %v8375_v48  ;;  %v8279_v48 = vor.u32 %v9219_v19, %v8278_v53  ;;  %v7915_v29 = vor.u32 %v9126_v21, %v7912_v22  ;;  %v7832_v30 = vld [vmem:[#allocation11 + $0x15c] sm:$0xf0]  ;;  %v9194_v16 = vld [vmem:[#allocation11 + $0x408] sm:$0xf0]  ;;  %v9099_v53 = vld [vmem:[#allocation11 + $0x110] sm:$0xf0] }
 0x2cd   :  { %v7835_v2 = vor.u32 %v9106_v55, %v7832_v30  ;;  %v8158_v22 = vld [vmem:[#allocation11 + $0x3d0] sm:$0xf]  ;;  %v9268_v55 = vld [vmem:[#allocation13 + $0x18] sm:$0xff] }
 0x2ce   :  { %5281 = vmatpush.bf16.msra.mxu2 %v8011_v17  ;;  %v8258_v17 = vld [vmem:[#allocation11 + $0x498] sm:$0xf] }
 0x2cf   :  { %5346 = vmatpush.bf16.msra.mxu3 %v8015_v9  ;;  %5410 = vmatpush.bf16.msra.mxu1 %v8039_v39  ;;  %v7892_v9 = vld [vmem:[#allocation11 + $0x1d4] sm:$0xf0]  ;;  %v8259_v38 = vor.u32 %v9214_v6, %v8258_v17  ;;  %v8159_v17 = vor.u32 %v9189_v45, %v8158_v22  ;;  %v9234_v45 = vld [vmem:[#allocation11 + $0x548] sm:$0xf0] }
 0x2d0   :  { %5371 = vmatpush.bf16.msra.mxu0 %v8355_v40  ;;  %v7895_v26 = vor.u32 %v9121_v20, %v7892_v9  ;;  %v7899_v40 = vor.u32 %v9124_v37, %v7898_v32  ;;  %v9089_v20 = vld [vmem:[#allocation11 + $0xc0] sm:$0xf0]  ;;  %v7738_v37 = vld [vmem:[#allocation11 + $0x88] sm:$0xf]  ;;  %v8338_v22 = vld [vmem:[#allocation11 + $0x538] sm:$0xf] }
 0x2d2   :  { %5282 = vmatpush.bf16.msra.mxu2 %v7991_v47  ;;  %v5143_v28 = vpop.f32.mrf.mxu3 }
 0x2d3   :  { %5347 = vmatpush.bf16.msra.mxu3 %v7995_v33  ;;  %5411 = vmatpush.bf16.msra.mxu1 %v8019_v63  ;;  %v8218_v33 = vld [vmem:[#allocation11 + $0x448] sm:$0xf]  ;;  %v9111_v63 = vld [vmem:[#allocation11 + $0x174] sm:$0xf]  ;;  %v7778_v28 = vld [vmem:[#allocation11 + $0xd8] sm:$0xf] }
 0x2d4   :  { %5372 = vmatpush.bf16.msra.mxu0 %v8335_v52  ;;  %v7855_v41 = vor.u32 %v9111_v63, %v7852_v7  ;;  %v9270_v7 = vld [vmem:[#allocation13 + $0x28] sm:$0xff] }
 0x2d5   :  { %5283 = vmatmul.bf16.vlgmr.msra.gmra.mxu2 %v9796_v12 }
 0x2d6   :  { %5327 = vmatpush.bf16.msrb.mxu2 %v7975_v13  ;;  %5348 = vmatmul.bf16.vlgmr.msra.gmra.mxu3 %v9796_v12  ;;  %v5154_v39 = vpop.f32.mrf.mxu1  ;;  %v9204_v13 = vld [vmem:[#allocation11 + $0x458] sm:$0xf0] }
 0x2d7   :  { %5392 = vmatpush.bf16.msrb.mxu3 %v7979_v49  ;;  %5412 = vmatpush.bf16.msra.mxu1 %v7999_v15  ;;  %v9842_v54 = vadd.f32 %v5154_v39, %v5142_v14  ;;  %v7879_v49 = vor.u32 %v9119_v56, %v7878_v46  ;;  %v8219_v52 = vor.u32 %v9204_v13, %v8218_v33  ;;  %v9104_v14 = vld [vmem:[#allocation11 + $0x138] sm:$0xf0]  ;;  %v9074_v46 = vld [vmem:[#allocation11 + $0x48] sm:$0xf0]  ;;  %v8458_v33 = vld [vmem:[#allocation11 + $0x628] sm:$0xf] }
 0x2d8   :  { %5373 = vmatpush.bf16.msra.mxu0 %v8315_v60  ;;  %v8199_v15 = vor.u32 %v9199_v8, %v8198_v5  ;;  %v8178_v60 = vld [vmem:[#allocation11 + $0x3f8] sm:$0xf]  ;;  %v7699_v56 = vor.u32 %v9074_v46, %v7698_v43  ;;  %v9264_v13 = vld [vmem:[#allocation11 + $0x638] sm:$0xf0] }
 0x2d9   :  { %v8459_v44 = vor.u32 %v9264_v13, %v8458_v33  ;;  %v8418_v8 = vld [vmem:[#allocation11 + $0x5d8] sm:$0xf] }
 0x2da   :  { %5328 = vmatpush.bf16.msrb.mxu2 %v7955_v57  ;;  %5413 = vmatmul.bf16.vlgmr.msra.gmra.mxu1 %v9796_v12  ;;  %v9209_v12 = vld [vmem:[#allocation11 + $0x480] sm:$0xf0]  ;;  %v5193_v4 = vpop.f32.mrf.mxu3  ;;  %v7838_v57 = vld [vmem:[#allocation11 + $0x150] sm:$0xf] }
 0x2db   :  { %5393 = vmatpush.bf16.msrb.mxu3 %v7959_v34  ;;  %5374 = vmatmul.bf16.vlgmr.msra.gmra.mxu0 %v9820_v50  ;;  %v8239_v47 = vor.u32 %v9209_v12, %v8238_v27  ;;  %v4070_v34 = vperm.slane %v9834_v23, 1  ;;  %v7839_v51 = vor.u32 %v9109_v1, %v7838_v57  ;;  %v9079_v27 = vld [vmem:[#allocation11 + $0x70] sm:$0xf0]  ;;  %v8398_v57 = vld [vmem:[#allocation11 + $0x5b0] sm:$0xf] }
 0x2dc   :  { %5418 = vmatpush.bf16.msrb.mxu0 %v8299_v61  ;;  %v7819_v61 = vor.u32 %v9104_v14, %v7818_v11  ;;  %v9249_v1 = vld [vmem:[#allocation11 + $0x5c0] sm:$0xf0]  ;;  %v9280_v11 = vld [vmem:[#allocation13 + $0x78] sm:$0xff]  ;;  %v9267_v14 = vld [vmem:[#allocation13 + $0x10] sm:$0xff] }
 0x2dd   :  { %v5194_v19 = vadd.f32 %v5193_v4, %v4070_v34  ;;  %v9069_v4 = vld [vmem:[#allocation11 + $0x20] sm:$0xf0]  ;;  %5791 = vmatpush.bf16.msrb.mxu1 %v9280_v11  ;;  %v9279_v34 = vld [vmem:[#allocation13 + $0x70] sm:$0xff]  ;;  %v9292_v11 = vld [vmem:[#allocation13 + $0xd8] sm:$0xff] }
 0x2de   :  { %5329 = vmatpush.bf16.msrb.mxu2 %v7935_v18  ;;  %v5156_v58 = vpop.f32.mrf.mxu1  ;;  %v7798_v18 = vld [vmem:[#allocation11 + $0x100] sm:$0xf] }
 0x2df   :  { %5394 = vmatpush.bf16.msrb.mxu3 %v7939_v35  ;;  %v8179_v35 = vor.u32 %v9194_v16, %v8178_v60  ;;  %v9269_v58 = vld [vmem:[#allocation13 + $0x20] sm:$0xff]  ;;  %v9244_v60 = vld [vmem:[#allocation11 + $0x598] sm:$0xf0]  ;;  %v9266_v16 = vld [vmem:[#allocation13 + $0x8] sm:$0xff] }
 0x2e0   :  { %5419 = vmatpush.bf16.msrb.mxu0 %v8279_v48  ;;  %v7799_v48 = vor.u32 %v9099_v53, %v7798_v18  ;;  %v9278_v18 = vld [vmem:[#allocation13 + $0x68] sm:$0xff]  ;;  %v9265_v53 = vld [vmem:[#allocation13] sm:$0xff] }
 0x2e1   :  { %5792 = vmatpush.bf16.msrb.mxu1 %v9279_v34  ;;  %v4071_v34 = vperm.slane %v9834_v23, 2 }
 0x2e2   :  { %5330 = vmatpush.bf16.msrb.mxu2 %v7915_v29  ;;  %v5195_v0 = vpop.f32.mrf.mxu3  ;;  %v9094_v29 = vld [vmem:[#allocation11 + $0xe8] sm:$0xf0] }
 0x2e3   :  { %5395 = vmatpush.bf16.msrb.mxu3 %v7919_v31  ;;  %v7779_v6 = vor.u32 %v9094_v29, %v7778_v28  ;;  %v7758_v31 = vld [vmem:[#allocation11 + $0xb0] sm:$0xf]  ;;  %v9229_v29 = vld [vmem:[#allocation11 + $0x520] sm:$0xf0] }
 0x2e4   :  { %5420 = vmatpush.bf16.msrb.mxu0 %v8259_v38  ;;  %v7759_v32 = vor.u32 %v9089_v20, %v7758_v31  ;;  %v9084_v38 = vld [vmem:[#allocation11 + $0x98] sm:$0xf0]  ;;  %v8318_v28 = vld [vmem:[#allocation11 + $0x510] sm:$0xf] }
 0x2e5   :  { %v7739_v39 = vor.u32 %v9084_v38, %v7738_v37  ;;  %5793 = vmatpush.bf16.msrb.mxu1 %v9278_v18  ;;  %v9275_v31 = vld [vmem:[#allocation13 + $0x50] sm:$0xff]  ;;  %v8319_v20 = vor.u32 %v9229_v29, %v8318_v28  ;;  %v9274_v37 = vld [vmem:[#allocation13 + $0x48] sm:$0xff] }
 0x2e6   :  { %5331 = vmatpush.bf16.msrb.mxu2 %v7895_v26  ;;  %v5206_v21 = vpop.f32.mrf.mxu1  ;;  %v7718_v26 = vld [vmem:[#allocation11 + $0x60] sm:$0xf]  ;;  %v9286_v38 = vld [vmem:[#allocation13 + $0xa8] sm:$0xff] }
 0x2e7   :  { %5396 = vmatpush.bf16.msrb.mxu3 %v7899_v40  ;;  %v9845_v25 = vadd.f32 %v5206_v21, %v5194_v19 }
 0x2e8   :  { %5421 = vmatpush.bf16.msrb.mxu0 %v8239_v47  ;;  %v9271_v47 = vld [vmem:[#allocation13 + $0x30] sm:$0xff] }
 0x2ea   :  { %5332 = vmatpush.bf16.msrb.mxu2 %v7875_v62 }
 0x2eb   :  { %5397 = vmatpush.bf16.msrb.mxu3 %v7879_v49 }
 0x2ec   :  { %5422 = vmatpush.bf16.msrb.mxu0 %v8219_v52  ;;  %v9259_v52 = vld [vmem:[#allocation11 + $0x610] sm:$0xf0] }
 0x2ee   :  { %5333 = vmatpush.bf16.msrb.mxu2 %v7855_v41  ;;  %v5208_v9 = vpop.f32.mrf.mxu1  ;;  %v8439_v41 = vor.u32 %v9259_v52, %v8438_v36  ;;  %v9294_v52 = vld [vmem:[#allocation13 + $0xe8] sm:$0xff] }
 0x2ef   :  { %5398 = vmatpush.bf16.msrb.mxu3 %v7859_v10  ;;  %v9254_v10 = vld [vmem:[#allocation11 + $0x5e8] sm:$0xf0] }
 0x2f0   :  { %5423 = vmatpush.bf16.msrb.mxu0 %v8199_v15  ;;  %v8419_v30 = vor.u32 %v9254_v10, %v8418_v8  ;;  %v8399_v15 = vor.u32 %v9249_v1, %v8398_v57 }
 0x2f2   :  { %5334 = vmatpush.bf16.msrb.mxu2 %v7835_v2  ;;  %v8378_v2 = vld [vmem:[#allocation11 + $0x588] sm:$0xf] }
 0x2f3   :  { %5399 = vmatpush.bf16.msrb.mxu3 %v7839_v51  ;;  %v8379_v51 = vor.u32 %v9244_v60, %v8378_v2 }
 0x2f4   :  { %5424 = vmatpush.bf16.msrb.mxu0 %v8179_v35  ;;  %v9277_v35 = vld [vmem:[#allocation13 + $0x60] sm:$0xff] }
 0x2f5   :  { %5335 = vmatmul.bf16.vlgmr.msrb.gmra.mxu2 %v9779_v24  ;;  %5794 = vmatpush.bf16.msrb.mxu1 %v9277_v35 }
 0x2f6   :  { %5379 = vmatpush.bf16.msra.mxu2 %v7819_v61  ;;  %5400 = vmatmul.bf16.vlgmr.msrb.gmra.mxu3 %v9779_v24  ;;  %v9852_v40 = vpop.f32.mrf.mxu1  ;;  %v7719_v24 = vor.u32 %v9079_v27, %v7718_v26  ;;  %v9239_v61 = vld [vmem:[#allocation11 + $0x570] sm:$0xf0]  ;;  %v9285_v26 = vld [vmem:[#allocation13 + $0xa0] sm:$0xff]  ;;  %v9284_v27 = vld [vmem:[#allocation13 + $0x98] sm:$0xff] }
 0x2f7   :  { %5778 = vmatpush.bf16.msra.mxu3 %v9272_v42 }
 0x2f8   :  { %5425 = vmatpush.bf16.msrb.mxu0 %v8159_v17  ;;  %v9850_v12 = vpop.f32.mrf.mxu0  ;;  %v9276_v17 = vld [vmem:[#allocation13 + $0x58] sm:$0xff] }
 0x2f9   :  { %5795 = vmatpush.bf16.msrb.mxu1 %v9276_v17  ;;  %v5168_v42 = vadd.f32 %v9850_v12, %v9842_v54 }
 0x2fa   :  { %5380 = vmatpush.bf16.msra.mxu2 %v7799_v48  ;;  %v8339_v48 = vor.u32 %v9234_v45, %v8338_v22 }
 0x2fb   :  { %5426 = vmatmul.bf16.vlgmr.msrb.gmra.mxu0 %v9810_v59  ;;  %v7678_v59 = vld [vmem:[#allocation11 + $0x10] sm:$0xf]  ;;  %5779 = vmatpush.bf16.msra.mxu3 %v9271_v47 }
 0x2fc   :  { %v7679_v63 = vor.u32 %v9069_v4, %v7678_v59 }
 0x2fd   :  { %5796 = vmatpush.bf16.msrb.mxu1 %v9275_v31 }
 0x2fe   :  { %5381 = vmatpush.bf16.msra.mxu2 %v7779_v6  ;;  %v5260_v49 = vpop.f32.mrf.mxu1  ;;  %v9288_v6 = vld [vmem:[#allocation13 + $0xb8] sm:$0xff] }
 0x2ff   :  { %5780 = vmatpush.bf16.msra.mxu3 %v9270_v7  ;;  %5804 = vmatpush.bf16.msra.mxu0 %v9288_v6  ;;  %v9296_v7 = vld [vmem:[#allocation13 + $0xf8] sm:$0xff] }
 0x300   :  { %v5169_v62 = vpop.f32.mrf.mxu0  ;;  %v9304_v6 = vld [vmem:[#allocation13 + $0x138] sm:$0xff] }
 0x301   :  { %5797 = vmatpush.bf16.msrb.mxu1 %v9274_v37  ;;  %v9282_v62 = vld [vmem:[#allocation13 + $0x88] sm:$0xff] }
 0x302   :  { %5382 = vmatpush.bf16.msra.mxu2 %v7759_v32  ;;  %v9287_v32 = vld [vmem:[#allocation13 + $0xb0] sm:$0xff] }
 0x303   :  { %5781 = vmatpush.bf16.msra.mxu3 %v9269_v58  ;;  %5805 = vmatpush.bf16.msra.mxu0 %v9287_v32 }
 0x306   :  { %5383 = vmatpush.bf16.msra.mxu2 %v7739_v39  ;;  %v9273_v39 = vld [vmem:[#allocation13 + $0x40] sm:$0xff] }
 0x307   :  { %5782 = vmatpush.bf16.msra.mxu3 %v9268_v55  ;;  %5806 = vmatpush.bf16.msra.mxu0 %v9286_v38  ;;  %v9293_v55 = vld [vmem:[#allocation13 + $0xe0] sm:$0xff]  ;;  %v9303_v38 = vld [vmem:[#allocation13 + $0x130] sm:$0xff] }
 0x308   :  { %v9854_v5 = vpop.f32.mrf.mxu0  ;;  %5798 = vmatpush.bf16.msrb.mxu1 %v9273_v39 }
 0x309   :  { %v5220_v36 = vadd.f32 %v9854_v5, %v9845_v25  ;;  %v5259_v25 = vadd.f32 %v9852_v40, %v4071_v34  ;;  %v9291_v5 = vld [vmem:[#allocation13 + $0xd0] sm:$0xff] }
 0x30a   :  { %5384 = vmatpush.bf16.msra.mxu2 %v7719_v24 }
 0x30b   :  { %5783 = vmatpush.bf16.msra.mxu3 %v9267_v14  ;;  %5807 = vmatpush.bf16.msra.mxu0 %v9285_v26  ;;  %v9302_v26 = vld [vmem:[#allocation13 + $0x128] sm:$0xff] }
 0x30e   :  { %5385 = vmatpush.bf16.msra.mxu2 %v7699_v56  ;;  %v9283_v56 = vld [vmem:[#allocation13 + $0x90] sm:$0xff] }
 0x30f   :  { %5784 = vmatpush.bf16.msra.mxu3 %v9266_v16  ;;  %5808 = vmatpush.bf16.msra.mxu0 %v9284_v27 }
 0x310   :  { %v5221_v0 = vpop.f32.mrf.mxu0 }
 0x312   :  { %5386 = vmatpush.bf16.msra.mxu2 %v7679_v63  ;;  %v9281_v63 = vld [vmem:[#allocation13 + $0x80] sm:$0xff] }
 0x313   :  { %5785 = vmatpush.bf16.msra.mxu3 %v9265_v53  ;;  %5809 = vmatpush.bf16.msra.mxu0 %v9283_v56  ;;  %v9301_v56 = vld [vmem:[#allocation13 + $0x120] sm:$0xff] }
 0x315   :  { %5387 = vmatmul.bf16.vlgmr.msra.gmra.mxu2 %v9770_v3  ;;  %v8358_v3 = vld [vmem:[#allocation11 + $0x560] sm:$0xf] }
 0x316   :  { %5431 = vmatpush.bf16.msrb.mxu2 %v8459_v44  ;;  %v8359_v19 = vor.u32 %v9239_v61, %v8358_v3  ;;  %v9295_v44 = vld [vmem:[#allocation13 + $0xf0] sm:$0xff]  ;;  %v9290_v61 = vld [vmem:[#allocation13 + $0xc8] sm:$0xff] }
 0x317   :  { %5810 = vmatpush.bf16.msra.mxu0 %v9282_v62  ;;  %5830 = vmatpush.bf16.msrb.mxu3 %v9304_v6  ;;  %v9297_v62 = vld [vmem:[#allocation13 + $0x100] sm:$0xff] }
 0x318   :  { %v9857_v21 = vpop.f32.mrf.mxu0 }
 0x319   :  { %v5272_v0 = vadd.f32 %v9857_v21, %v5259_v25  ;;  %v4072_v21 = vperm.slane %v9834_v23, 3 }
 0x31a   :  { %5432 = vmatpush.bf16.msrb.mxu2 %v8439_v41 }
 0x31b   :  { %5811 = vmatpush.bf16.msra.mxu0 %v9281_v63  ;;  %5831 = vmatpush.bf16.msrb.mxu3 %v9303_v38 }
 0x31e   :  { %5433 = vmatpush.bf16.msrb.mxu2 %v8419_v30 }
 0x31f   :  { %5832 = vmatpush.bf16.msrb.mxu3 %v9302_v26 }
 0x320   :  { %v5273_v9 = vpop.f32.mrf.mxu0 }
 0x322   :  { %5434 = vmatpush.bf16.msrb.mxu2 %v8399_v15 }
 0x323   :  { %5833 = vmatpush.bf16.msrb.mxu3 %v9301_v56 }
 0x326   :  { %5435 = vmatpush.bf16.msrb.mxu2 %v8379_v51 }
 0x32a   :  { %5436 = vmatpush.bf16.msrb.mxu2 %v8359_v19  ;;  %v9289_v19 = vld [vmem:[#allocation13 + $0xc0] sm:$0xff] }
 0x32e   :  { %5437 = vmatpush.bf16.msrb.mxu2 %v8339_v48 }
 0x332   :  { %5438 = vmatpush.bf16.msrb.mxu2 %v8319_v20 }
 0x333   :  { %v5310_v24 = vpop.f32.mrf.mxu1 }
 0x335   :  { %5439 = vmatmul.bf16.vlgmr.msrb.gmra.mxu2 %v9820_v50 }
 0x336   :  { %5817 = vmatpush.bf16.msra.mxu2 %v9296_v7 }
 0x338   :  { %v5180_v43 = vpop.f32.mrf.mxu2  ;;  %v5245_v46 = vpop.f32.mrf.mxu3 }
 0x339   :  { %v5181_v47 = vadd.f32 %v5180_v43, %v5168_v42 }
 0x33a   :  { %v5323_v4 = vpop.f32.mrf.mxu0  ;;  %5818 = vmatpush.bf16.msra.mxu2 %v9295_v44 }
 0x33b   :  { %v5444_v59 = vmax.f32 %v5181_v47, 0.0  ;;  %v5312_v50 = vpop.f32.mrf.mxu1  ;;  %v5324_v29 = vadd.f32 %v5323_v4, %v4072_v21  ;;  %v9300_v47 = vld [vmem:[#allocation13 + $0x118] sm:$0xff] }
 0x33c   :  { %5834 = vmatpush.bf16.msrb.mxu3 %v9300_v47  ;;  %v9298_v50 = vld [vmem:[#allocation13 + $0x108] sm:$0xff] }
 0x33d   :  { %v5449_v33 = vpack.c.bf16 %v5444_v59, %v5444_v59  ;;  %v9299_v59 = vld [vmem:[#allocation13 + $0x110] sm:$0xff] }
 0x33e   :  { %5819 = vmatpush.bf16.msra.mxu2 %v9294_v52 }
 0x33f   :  { %5786 = vmatmul.bf16.vlgmr.msra.gmra.mxu3 %v5449_v33 }
 0x340   :  { %v5182_v13 = vpop.f32.mrf.mxu2  ;;  %v5247_v49 = vpop.f32.mrf.mxu3  ;;  %5835 = vmatpush.bf16.msrb.mxu3 %v9299_v59 }
 0x341   :  { %v4073_v13 = vperm.slane %v9834_v23, 4 }
 0x342   :  { %v5325_v54 = vpop.f32.mrf.mxu0  ;;  %5820 = vmatpush.bf16.msra.mxu2 %v9293_v55 }
 0x343   :  { %v5362_v12 = vpop.f32.mrf.mxu1 }
 0x344   :  { %5836 = vmatpush.bf16.msrb.mxu3 %v9298_v50 }
 0x346   :  { %5821 = vmatpush.bf16.msra.mxu2 %v9292_v11 }
 0x348   :  { %v5232_v58 = vpop.f32.mrf.mxu2  ;;  %v5297_v8 = vpop.f32.mrf.mxu3  ;;  %5837 = vmatpush.bf16.msrb.mxu3 %v9297_v62 }
 0x349   :  { %v5233_v41 = vadd.f32 %v5232_v58, %v5220_v36 }
 0x34a   :  { %5822 = vmatpush.bf16.msra.mxu2 %v9291_v5 }
 0x34b   :  { %v5246_v10 = vadd.f32 %v5245_v46, %v5233_v41  ;;  %v5364_v30 = vpop.f32.mrf.mxu1 }
 0x34d   :  { %v5445_v57 = vmax.f32 %v5246_v10, 0.0 }
 0x34e   :  { %5823 = vmatpush.bf16.msra.mxu2 %v9290_v61 }
 0x34f   :  { %v5450_v1 = vpack.c.bf16 %v5445_v57, %v5445_v57 }
 0x350   :  { %v5234_v14 = vpop.f32.mrf.mxu2  ;;  %v5299_v15 = vpop.f32.mrf.mxu3 }
 0x351   :  { %5799 = vmatmul.bf16.vlgmr.msrb.gmra.mxu1 %v5450_v1 }
 0x352   :  { %5824 = vmatpush.bf16.msra.mxu2 %v9289_v19 }
 0x357   :  { %v5414_v2 = vpop.f32.mrf.mxu1 }
 0x358   :  { %v5284_v60 = vpop.f32.mrf.mxu2  ;;  %v5375_v16 = vpop.f32.mrf.mxu0 }
 0x359   :  { %v5285_v51 = vadd.f32 %v5284_v60, %v5272_v0  ;;  %v5349_v3 = vpop.f32.mrf.mxu3 }
 0x35b   :  { %v5298_v18 = vadd.f32 %v5297_v8, %v5285_v51  ;;  %v9317_v8 = vld [vmem:[%s9883_s8] ss:$0 sm:$0xff]  ;;  %s9537_s8 = smov [#allocation14]  }
 0x35c   :  { %s5860_s23 = sshll.u32 %s9537_s8, 4  ;;  %s5861_s23 = int_to_ptr.vmem [resolvable:$true] %s5860_s23 }
 0x35d   :  { %v5311_v53 = vadd.f32 %v5310_v24, %v5298_v18 }
 0x35f   :  { %v5446_v35 = vmax.f32 %v5311_v53, 0.0  ;;  %v5416_v22 = vpop.f32.mrf.mxu1 }
 0x360   :  { %v5286_v45 = vpop.f32.mrf.mxu2  ;;  %v5377_v40 = vpop.f32.mrf.mxu0 }
 0x361   :  { %v5451_v48 = vpack.c.bf16 %v5446_v35, %v5446_v35  ;;  %v5351_v28 = vpop.f32.mrf.mxu3 }
 0x363   :  { %5812 = vmatmul.bf16.vlgmr.msra.gmra.mxu0 %v5451_v48 }
 0x378   :  { %v5336_v17 = vpop.f32.mrf.mxu2  ;;  %v5427_v9 = vpop.f32.mrf.mxu0 }
 0x379   :  { %v5337_v31 = vadd.f32 %v5336_v17, %v5324_v29  ;;  %v5401_v20 = vpop.f32.mrf.mxu3 }
 0x37b   :  { %v5350_v32 = vadd.f32 %v5349_v3, %v5337_v31 }
 0x37d   :  { %v5363_v37 = vadd.f32 %v5362_v12, %v5350_v32 }
 0x37f   :  { %v5376_v39 = vadd.f32 %v5375_v16, %v5363_v37 }
 0x380   :  { %v5338_v27 = vpop.f32.mrf.mxu2  ;;  %v5429_v43 = vpop.f32.mrf.mxu0 }
 0x381   :  { %v5447_v24 = vmax.f32 %v5376_v39, 0.0  ;;  %v5403_v42 = vpop.f32.mrf.mxu3 }
 0x383   :  { %v5452_v46 = vpack.c.bf16 %v5447_v24, %v5447_v24 }
 0x385   :  { %5825 = vmatmul.bf16.vlgmr.msra.gmra.mxu2 %v5452_v46 }
 0x398   :  { %v5388_v4 = vpop.f32.mrf.mxu2 }
 0x399   :  { %v5389_v49 = vadd.f32 %v5388_v4, %v4073_v13 }
 0x39b   :  { %v5402_v63 = vadd.f32 %v5401_v20, %v5389_v49 }
 0x39d   :  { %v5415_v7 = vadd.f32 %v5414_v2, %v5402_v63 }
 0x39f   :  { %v5428_v44 = vadd.f32 %v5427_v9, %v5415_v7 }
 0x3a0   :  { %v5390_v33 = vpop.f32.mrf.mxu2 }
 0x3b8   :  { %v5440_v54 = vpop.f32.mrf.mxu2 }
 0x3b9   :  { %v5441_v12 = vadd.f32 %v5440_v54, %v5428_v44 }
 0x3bb   :  { %v5448_v36 = vmax.f32 %v5441_v12, 0.0 }
 0x3bd   :  { %v5453_v52 = vpack.c.bf16 %v5448_v36, %v5448_v36 }
 0x3bf   :  { %5838 = vmatmul.bf16.vlgmr.msrb.gmra.mxu3 %v5453_v52 }
 0x3c0   :  { %v5442_v58 = vpop.f32.mrf.mxu2 }
 0x3c2   :  { %v5787_v41 = vpop.f32.mrf.mxu3 }
 0x3c3   :  { %v5788_v55 = vadd.f32 %v9317_v8, %v5787_v41 }
 0x3ca   :  { %v5789_v10 = vpop.f32.mrf.mxu3 }
 0x3ce   :  { %v5800_v30 = vpop.f32.mrf.mxu1 }
 0x3cf   :  { %v5801_v57 = vadd.f32 %v5800_v30, %v5788_v55 }
 0x3d6   :  { %v5802_v23 = vpop.f32.mrf.mxu1 }
 0x3e0   :  { %v5813_v1 = vpop.f32.mrf.mxu0 }
 0x3e1   :  { %v5814_v11 = vadd.f32 %v5813_v1, %v5801_v57 }
 0x3e8   :  { %v5815_v14 = vpop.f32.mrf.mxu0 }
 0x408   :  { %v5826_v34 = vpop.f32.mrf.mxu2 }
 0x409   :  { %v5827_v25 = vadd.f32 %v5826_v34, %v5814_v11 }
 0x410   :  { %v5828_v15 = vpop.f32.mrf.mxu2 }
 0x442   :  { %v5839_v5 = vpop.f32.mrf.mxu3 }
 0x443   :  { %v5840_v0 = vadd.f32 %v5839_v5, %v5827_v25 }
 0x445   :  { %5843 = vmax.xlane.f32.xlu0 %v5840_v0 }
 0x44a   :  { %v5841_v2 = vpop.f32.mrf.mxu3 }
 0x4b8   :  { %v5844_v60 = vpop.xlane.xlu0 %5843 }
 0x4b9   :  { %v5845_v16 = vsub.f32 %v5840_v0, %v5844_v60 }
 0x4bb   :  { %v5846_v51 = vmul.f32 1.442695, %v5845_v16 }
 0x4bd   :  { %9318 = vpow2.f32 %v5846_v51 }
 0x4c3   :  { %v9319_v3 = vpop.eup %9318 }
 0x4c4   :  { %5848 = vadd.xlane.f32.xlu0 %v9319_v3 }
 0x537   :  { %v5849_v61 = vpop.xlane.xlu0 %5848 }
 0x538   :  { %9320 = vlog2.f32 %v5849_v61 }
 0x53e   :  { %v9321_v18 = vpop.eup %9320 }
 0x53f   :  { %v5851_v53 = vmul.f32 0.6931472, %v9321_v18 }
 0x541   :  { %v5852_v19 = vsub.f32 %v5845_v16, %v5851_v53 }
 0x543   :  { %v5853_v35 = vmax.f32 %v5852_v19, -9.2103405 }
 0x545   :  { %5854 = vst [vmem:[#allocation14] sm:$0xff] %v5853_v35 }
 0x546   :  { %5865 = dma.vmem_to_hbm [thread:$0]  %s5861_s23, 128, %s5863_s25, [#allocation4]  }
 0x547   :  { %9524 = dma.done.wait [#allocation4], 128  }
 0x548   :  { %9525 = vsyncadd [#allocation4], 4294967168 }
 0x549   :  { %5870 = vsyncpa [#allocation3], 1 }
 0x54a   :  { %5871 = vsyncpa [#allocation6], 1 }
 0x54b   :  { %5872 = vsyncpa [#allocation9], 1 }
 0x54c   :  { %5873 = vsyncpa [#allocation12], 1 }
 0x54d   :  { %5874 = vsyncpa [#allocation4], 1 }

</bundles_post_ra>
